<compile_context>
chip_gen: v7x
topology: tpu7x:2x2x1
jax: 0.10.0
libtpu: 0.0.40
codegen_flags: <defaults>
</compile_context>

<pallas_src>
import jax
import jax.numpy as jnp
from jax import lax
from jax.experimental import pallas as pl
from jax.experimental.pallas import tpu as pltpu

# ----- synthetic DistilBERT-like config (small) ------------------------------
VOCAB = 100
VOCAB_PAD = 128        # lane-aligned embedding table rows (token ids stay < VOCAB)
SEQ = 17               # QuestionEmbed.max_len
SEQ_PAD = 32           # padded to a clean sublane / square MXU tile
DIM = 32
HEADS = 4
HEAD_DIM = DIM // HEADS
FFN = 64
LAYERS = 2
EPS = 1e-12


def _layernorm(x, g, b):
    mu = jnp.mean(x, axis=-1, keepdims=True)
    var = jnp.mean((x - mu) ** 2, axis=-1, keepdims=True)
    return (x - mu) * lax.rsqrt(var + EPS) * g + b


# ----- fused Pallas kernel: embedding + LN + all encoder layers --------------
def qembed_kernel(ids_ref, maskb_ref, wemb_ref, pemb_ref, embln_ref,
                  wqkv_ref, bqkv_ref, wo_ref, bo_ref, lngb_ref,
                  w1_ref, b1_ref, w2_ref, b2_ref, o_ref):
    ids = ids_ref[0]                     # [S, 1] int32 token ids of this question
    mask_bias = maskb_ref[0]             # [1, S] additive key mask (0 keep / -1e9 drop)

    # embedding gather as a one-hot MXU matmul (contraction over VOCAB_PAD) + pos emb
    onehot = (ids == lax.broadcasted_iota(jnp.int32, (SEQ_PAD, VOCAB_PAD), 1)
              ).astype(jnp.float32)                                        # [S, V]
    emb = jnp.dot(onehot, wemb_ref[...],
                  preferred_element_type=jnp.float32) + pemb_ref[...]       # [S, D]
    h = _layernorm(emb, embln_ref[0:1, :], embln_ref[1:2, :])

    scale = 1.0 / (HEAD_DIM ** 0.5)
    for l in range(LAYERS):              # static unroll; hidden state never leaves VMEM
        wqkv, bqkv = wqkv_ref[l], bqkv_ref[l]      # [D, 3D], [1, 3D]
        wo, bo = wo_ref[l], bo_ref[l]              # [D, D],  [1, D]
        lngb = lngb_ref[l]                         # [4, D] rows: g1, b1, g2, b2

        # fused QKV projection: one [S,D] x [D,3D] MXU matmul instead of three
        qkv = jnp.dot(h, wqkv, preferred_element_type=jnp.float32) + bqkv   # [S, 3D]

        attn_out = jnp.zeros((SEQ_PAD, DIM), jnp.float32)
        for hd in range(HEADS):          # static unroll over heads (per-head 2-D matmuls)
            sl = slice(hd * HEAD_DIM, (hd + 1) * HEAD_DIM)
            qh = qkv[:, hd * HEAD_DIM:(hd + 1) * HEAD_DIM]
            kh = qkv[:, DIM + hd * HEAD_DIM:DIM + (hd + 1) * HEAD_DIM]
            vh = qkv[:, 2 * DIM + hd * HEAD_DIM:2 * DIM + (hd + 1) * HEAD_DIM]
            scores = lax.dot_general(qh, kh, (((1,), (1,)), ((), ())),
                                     preferred_element_type=jnp.float32) * scale
            scores = scores + mask_bias                         # additive mask (VALU add)
            scores = scores - jnp.max(scores, axis=-1, keepdims=True)
            p = jnp.exp(scores)                                 # [S, S]
            row_sum = jnp.sum(p, axis=-1, keepdims=True)        # [S, 1]
            ctx_h = jnp.dot(p, vh, preferred_element_type=jnp.float32)       # [S, Dh]
            # deferred softmax normalization on the small [S, Dh] tensor (EUP vrcp)
            ctx_h = ctx_h * pl.reciprocal(row_sum, approx=True)
            # fold the output projection per head to avoid a lane-dim concatenate
            attn_out = attn_out + jnp.dot(ctx_h, wo[sl, :],
                                          preferred_element_type=jnp.float32)
        attn_out = attn_out + bo

        sa = _layernorm(attn_out + h, lngb[0:1, :], lngb[1:2, :])

        f = jnp.dot(sa, w1_ref[l], preferred_element_type=jnp.float32) + b1_ref[l]
        # TODO(synk): HF DistilBERT uses exact erf-GELU; tanh approximation used here.
        f = jax.nn.gelu(f)
        f = jnp.dot(f, w2_ref[l], preferred_element_type=jnp.float32) + b2_ref[l]
        h = _layernorm(f + sa, lngb[2:3, :], lngb[3:4, :])

    o_ref[0] = h                          # clean [32, 32] store; wrapper takes row 0 (CLS)


# ----- parameters (packed / stacked) -----------------------------------------
def init_params(key):
    def nrm(k, shape, scale=0.02):
        return scale * jax.random.normal(k, shape, jnp.float32)

    keys = jax.random.split(key, 2 + LAYERS)
    wqkv, wo, w1, w2 = [], [], [], []
    for li in range(LAYERS):
        ks = jax.random.split(keys[2 + li], 6)
        wqkv.append(jnp.concatenate([nrm(ks[0], (DIM, DIM)),
                                     nrm(ks[1], (DIM, DIM)),
                                     nrm(ks[2], (DIM, DIM))], axis=1))   # [D, 3D]
        wo.append(nrm(ks[3], (DIM, DIM)))
        w1.append(nrm(ks[4], (DIM, FFN)))
        w2.append(nrm(ks[5], (FFN, DIM)))
    ln_row = jnp.stack([jnp.ones((DIM,), jnp.float32), jnp.zeros((DIM,), jnp.float32),
                        jnp.ones((DIM,), jnp.float32), jnp.zeros((DIM,), jnp.float32)])
    return {
        "word_emb": nrm(keys[0], (VOCAB_PAD, DIM)),
        "pos_emb": nrm(keys[1], (SEQ_PAD, DIM)),
        "emb_ln": jnp.stack([jnp.ones((DIM,), jnp.float32),
                             jnp.zeros((DIM,), jnp.float32)]),            # [2, D]
        "wqkv": jnp.stack(wqkv), "bqkv": jnp.zeros((LAYERS, 1, 3 * DIM), jnp.float32),
        "wo": jnp.stack(wo),     "bo": jnp.zeros((LAYERS, 1, DIM), jnp.float32),
        "ln_gb": jnp.tile(ln_row[None], (LAYERS, 1, 1)),                  # [L, 4, D]
        "w1": jnp.stack(w1), "b1": jnp.zeros((LAYERS, 1, FFN), jnp.float32),
        "w2": jnp.stack(w2), "b2": jnp.zeros((LAYERS, 1, DIM), jnp.float32),
    }


# ----- wrappers ---------------------------------------------------------------
def _shared_spec(shape):
    zeros = (0,) * len(shape)
    return pl.BlockSpec(shape, lambda b, _z=zeros: _z)   # weights: same block every step


def question_embed_forward_batched(params, token_ids, attn_mask):
    """token_ids/attn_mask: [B, SEQ] int32 -> CLS embeddings [B, DIM]."""
    B, S = token_ids.shape
    pad = SEQ_PAD - S
    ids = jnp.pad(token_ids.astype(jnp.int32), ((0, 0), (0, pad)))[:, :, None]     # [B, Sp, 1]
    mask = jnp.pad(attn_mask.astype(jnp.float32), ((0, 0), (0, pad)))
    mask_bias = ((mask - 1.0) * 1e9)[:, None, :]                                    # [B, 1, Sp]

    p = params
    weight_args = (p["word_emb"], p["pos_emb"], p["emb_ln"],
                   p["wqkv"], p["bqkv"], p["wo"], p["bo"], p["ln_gb"],
                   p["w1"], p["b1"], p["w2"], p["b2"])
    in_specs = ([pl.BlockSpec((1, SEQ_PAD, 1), lambda b: (b, 0, 0)),
                 pl.BlockSpec((1, 1, SEQ_PAD), lambda b: (b, 0, 0))]
                + [_shared_spec(w.shape) for w in weight_args])

    hidden = pl.pallas_call(
        qembed_kernel,
        out_shape=jax.ShapeDtypeStruct((B, SEQ_PAD, DIM), jnp.float32),
        grid=(B,),
        in_specs=in_specs,
        out_specs=pl.BlockSpec((1, SEQ_PAD, DIM), lambda b: (b, 0, 0)),
        compiler_params=pltpu.CompilerParams(
            dimension_semantics=("parallel",)),   # batch axis shards across TCs (v7x)
    )(ids, mask_bias, *weight_args)
    return hidden[:, 0, :]                        # CLS token per question


def question_embed_forward(params, token_ids, attn_mask):
    """Original module semantics: one question [SEQ] -> CLS embedding [1, DIM]."""
    return question_embed_forward_batched(params, token_ids[None, :], attn_mask[None, :])


if __name__ == "__main__":
    key = jax.random.PRNGKey(0)
    pkey, tkey = jax.random.split(key)
    params = init_params(pkey)

    # deterministic "tokenized sentences": batch of 2 questions (8 and 5 real tokens),
    # zero-padded to max_len = 17; mask = (token != 0) exactly as QuestionEmbed.process
    B = 2
    rand_toks = jax.random.randint(tkey, (B, SEQ), 1, VOCAB, jnp.int32)
    lens = jnp.array([8, 5], jnp.int32)
    keep = jnp.arange(SEQ)[None, :] < lens[:, None]
    token_ids = jnp.where(keep, rand_toks, 0).astype(jnp.int32)
    attn_mask = (token_ids != 0).astype(jnp.int32)

    cls_batched = question_embed_forward_batched(params, token_ids, attn_mask)  # [B, DIM]
    cls_single = question_embed_forward(params, token_ids[0], attn_mask[0])     # [1, DIM]
    jax.block_until_ready((cls_batched, cls_single))

    assert cls_batched.shape == (B, DIM)
    assert cls_single.shape == (1, DIM)
    assert bool(jnp.all(jnp.isfinite(cls_batched)))
    assert bool(jnp.all(jnp.isfinite(cls_single)))
    print("KERNEL_OK")
</pallas_src>

<mosaic_0001>
module attributes {stable_mosaic.version = 11 : i64} {
  func.func @qembed_kernel(%arg0: i32, %arg1: memref<1x32x1xi32, #tpu.memory_space<vmem>>, %arg2: memref<1x1x32xf32, #tpu.memory_space<vmem>>, %arg3: memref<128x32xf32, #tpu.memory_space<vmem>>, %arg4: memref<32x32xf32, #tpu.memory_space<vmem>>, %arg5: memref<2x32xf32, #tpu.memory_space<vmem>>, %arg6: memref<2x32x96xf32, #tpu.memory_space<vmem>>, %arg7: memref<2x1x96xf32, #tpu.memory_space<vmem>>, %arg8: memref<2x32x32xf32, #tpu.memory_space<vmem>>, %arg9: memref<2x1x32xf32, #tpu.memory_space<vmem>>, %arg10: memref<2x4x32xf32, #tpu.memory_space<vmem>>, %arg11: memref<2x32x64xf32, #tpu.memory_space<vmem>>, %arg12: memref<2x1x64xf32, #tpu.memory_space<vmem>>, %arg13: memref<2x64x32xf32, #tpu.memory_space<vmem>>, %arg14: memref<2x1x32xf32, #tpu.memory_space<vmem>>, %arg15: memref<1x32x32xf32, #tpu.memory_space<vmem>>) attributes {dimension_semantics = [#tpu.dimension_semantics<parallel>], iteration_bounds = array<i64: 2>, scalar_prefetch = 0 : i64, scratch_operands = 0 : i64, tpu.core_type = #tpu.core_type<tc>, window_params = [{transform_indices = @transform_0, window_bounds = array<i64: 1, 32, 1>}, {transform_indices = @transform_1, window_bounds = array<i64: 1, 1, 32>}, {pipeline_mode = #tpu.pipeline_mode<synchronous>, transform_indices = @transform_2, window_bounds = array<i64: 128, 32>}, {pipeline_mode = #tpu.pipeline_mode<synchronous>, transform_indices = @transform_3, window_bounds = array<i64: 32, 32>}, {pipeline_mode = #tpu.pipeline_mode<synchronous>, transform_indices = @transform_4, window_bounds = array<i64: 2, 32>}, {pipeline_mode = #tpu.pipeline_mode<synchronous>, transform_indices = @transform_5, window_bounds = array<i64: 2, 32, 96>}, {pipeline_mode = #tpu.pipeline_mode<synchronous>, transform_indices = @transform_6, window_bounds = array<i64: 2, 1, 96>}, {pipeline_mode = #tpu.pipeline_mode<synchronous>, transform_indices = @transform_7, window_bounds = array<i64: 2, 32, 32>}, {pipeline_mode = #tpu.pipeline_mode<synchronous>, transform_indices = @transform_8, window_bounds = array<i64: 2, 1, 32>}, {pipeline_mode = #tpu.pipeline_mode<synchronous>, transform_indices = @transform_9, window_bounds = array<i64: 2, 4, 32>}, {pipeline_mode = #tpu.pipeline_mode<synchronous>, transform_indices = @transform_10, window_bounds = array<i64: 2, 32, 64>}, {pipeline_mode = #tpu.pipeline_mode<synchronous>, transform_indices = @transform_11, window_bounds = array<i64: 2, 1, 64>}, {pipeline_mode = #tpu.pipeline_mode<synchronous>, transform_indices = @transform_12, window_bounds = array<i64: 2, 64, 32>}, {pipeline_mode = #tpu.pipeline_mode<synchronous>, transform_indices = @transform_13, window_bounds = array<i64: 2, 1, 32>}, {transform_indices = @transform_14, window_bounds = array<i64: 1, 32, 32>}]} {
    %c0 = arith.constant 0 : index
    %c0_0 = arith.constant 0 : index
    %c0_1 = arith.constant 0 : index
    %0 = vector.load %arg1[%c0, %c0_0, %c0_1] : memref<1x32x1xi32, #tpu.memory_space<vmem>>, vector<1x32x1xi32>
    %1 = vector.shape_cast %0 : vector<1x32x1xi32> to vector<32x1xi32>
    %c0_2 = arith.constant 0 : index
    %c0_3 = arith.constant 0 : index
    %c0_4 = arith.constant 0 : index
    %2 = vector.load %arg2[%c0_2, %c0_3, %c0_4] : memref<1x1x32xf32, #tpu.memory_space<vmem>>, vector<1x1x32xf32>
    %3 = vector.shape_cast %2 : vector<1x1x32xf32> to vector<1x32xf32>
    %4 = tpu.iota {dimensions = array<i32: 1>} : vector<32x128xi32>
    %5 = vector.broadcast %1 : vector<32x1xi32> to vector<32x128xi32>
    %6 = arith.cmpi eq, %5, %4 : vector<32x128xi32>
    %7 = arith.extui %6 : vector<32x128xi1> to vector<32x128xi32>
    %8 = arith.sitofp %7 : vector<32x128xi32> to vector<32x128xf32>
    %c0_5 = arith.constant 0 : index
    %c0_6 = arith.constant 0 : index
    %9 = vector.load %arg3[%c0_5, %c0_6] : memref<128x32xf32, #tpu.memory_space<vmem>>, vector<128x32xf32>
    %cst = arith.constant dense<0.000000e+00> : vector<32x32xf32>
    %10 = tpu.matmul %8, %9, %cst {dimension_numbers = #tpu.dot_dimension_numbers<[1], [0], [0], [1], [0, 0, 1, 1], [], []>} : vector<32x128xf32>, vector<128x32xf32>, vector<32x32xf32> -> vector<32x32xf32>
    %c0_7 = arith.constant 0 : index
    %c0_8 = arith.constant 0 : index
    %11 = vector.load %arg4[%c0_7, %c0_8] : memref<32x32xf32, #tpu.memory_space<vmem>>, vector<32x32xf32>
    %12 = arith.addf %10, %11 : vector<32x32xf32>
    %c0_9 = arith.constant 0 : index
    %c0_10 = arith.constant 0 : index
    %13 = vector.load %arg5[%c0_9, %c0_10] : memref<2x32xf32, #tpu.memory_space<vmem>>, vector<1x32xf32>
    %c1 = arith.constant 1 : index
    %c0_11 = arith.constant 0 : index
    %14 = vector.load %arg5[%c1, %c0_11] : memref<2x32xf32, #tpu.memory_space<vmem>>, vector<1x32xf32>
    %cst_12 = arith.constant dense<0.000000e+00> : vector<32xf32>
    %15 = vector.multi_reduction <add>, %12, %cst_12 [1] : vector<32x32xf32> to vector<32xf32>
    %16 = vector.shape_cast %15 : vector<32xf32> to vector<32x1xf32>
    %cst_13 = arith.constant 3.200000e+01 : f32
    %17 = vector.broadcast %cst_13 : f32 to vector<32x1xf32>
    %18 = arith.divf %16, %17 : vector<32x1xf32>
    %19 = vector.broadcast %18 : vector<32x1xf32> to vector<32x32xf32>
    %20 = arith.subf %12, %19 : vector<32x32xf32>
    %21 = arith.mulf %20, %20 : vector<32x32xf32>
    %cst_14 = arith.constant dense<0.000000e+00> : vector<32xf32>
    %22 = vector.multi_reduction <add>, %21, %cst_14 [1] : vector<32x32xf32> to vector<32xf32>
    %23 = vector.shape_cast %22 : vector<32xf32> to vector<32x1xf32>
    %cst_15 = arith.constant 3.200000e+01 : f32
    %24 = vector.broadcast %cst_15 : f32 to vector<32x1xf32>
    %25 = arith.divf %23, %24 : vector<32x1xf32>
    %26 = vector.broadcast %18 : vector<32x1xf32> to vector<32x32xf32>
    %27 = arith.subf %12, %26 : vector<32x32xf32>
    %cst_16 = arith.constant 9.99999996E-13 : f32
    %28 = vector.broadcast %cst_16 : f32 to vector<32x1xf32>
    %29 = arith.addf %25, %28 : vector<32x1xf32>
    %30 = math.rsqrt %29 : vector<32x1xf32>
    %31 = vector.broadcast %30 : vector<32x1xf32> to vector<32x32xf32>
    %32 = arith.mulf %27, %31 : vector<32x32xf32>
    %33 = vector.broadcast %13 : vector<1x32xf32> to vector<32x32xf32>
    %34 = arith.mulf %32, %33 : vector<32x32xf32>
    %35 = vector.broadcast %14 : vector<1x32xf32> to vector<32x32xf32>
    %36 = arith.addf %34, %35 : vector<32x32xf32>
    %c0_17 = arith.constant 0 : index
    %c0_18 = arith.constant 0 : index
    %c0_19 = arith.constant 0 : index
    %37 = vector.load %arg6[%c0_17, %c0_18, %c0_19] : memref<2x32x96xf32, #tpu.memory_space<vmem>>, vector<1x32x96xf32>
    %38 = vector.shape_cast %37 : vector<1x32x96xf32> to vector<32x96xf32>
    %c0_20 = arith.constant 0 : index
    %c0_21 = arith.constant 0 : index
    %c0_22 = arith.constant 0 : index
    %39 = vector.load %arg7[%c0_20, %c0_21, %c0_22] : memref<2x1x96xf32, #tpu.memory_space<vmem>>, vector<1x1x96xf32>
    %40 = vector.shape_cast %39 : vector<1x1x96xf32> to vector<1x96xf32>
    %c0_23 = arith.constant 0 : index
    %c0_24 = arith.constant 0 : index
    %c0_25 = arith.constant 0 : index
    %41 = vector.load %arg8[%c0_23, %c0_24, %c0_25] : memref<2x32x32xf32, #tpu.memory_space<vmem>>, vector<1x32x32xf32>
    %42 = vector.shape_cast %41 : vector<1x32x32xf32> to vector<32x32xf32>
    %c0_26 = arith.constant 0 : index
    %c0_27 = arith.constant 0 : index
    %c0_28 = arith.constant 0 : index
    %43 = vector.load %arg9[%c0_26, %c0_27, %c0_28] : memref<2x1x32xf32, #tpu.memory_space<vmem>>, vector<1x1x32xf32>
    %44 = vector.shape_cast %43 : vector<1x1x32xf32> to vector<1x32xf32>
    %c0_29 = arith.constant 0 : index
    %c0_30 = arith.constant 0 : index
    %c0_31 = arith.constant 0 : index
    %45 = vector.load %arg10[%c0_29, %c0_30, %c0_31] : memref<2x4x32xf32, #tpu.memory_space<vmem>>, vector<1x4x32xf32>
    %46 = vector.shape_cast %45 : vector<1x4x32xf32> to vector<4x32xf32>
    %cst_32 = arith.constant dense<0.000000e+00> : vector<32x96xf32>
    %47 = tpu.matmul %36, %38, %cst_32 {dimension_numbers = #tpu.dot_dimension_numbers<[1], [0], [0], [1], [0, 0, 1, 1], [], []>} : vector<32x32xf32>, vector<32x96xf32>, vector<32x96xf32> -> vector<32x96xf32>
    %48 = vector.broadcast %40 : vector<1x96xf32> to vector<32x96xf32>
    %49 = arith.addf %47, %48 : vector<32x96xf32>
    %cst_33 = arith.constant 0.000000e+00 : f32
    %50 = vector.broadcast %cst_33 : f32 to vector<32x32xf32>
    %51 = vector.extract_strided_slice %49 {offsets = [0, 0], sizes = [32, 8], strides = [1, 1]} : vector<32x96xf32> to vector<32x8xf32>
    %52 = vector.extract_strided_slice %49 {offsets = [0, 32], sizes = [32, 8], strides = [1, 1]} : vector<32x96xf32> to vector<32x8xf32>
    %53 = vector.extract_strided_slice %49 {offsets = [0, 64], sizes = [32, 8], strides = [1, 1]} : vector<32x96xf32> to vector<32x8xf32>
    %cst_34 = arith.constant dense<0.000000e+00> : vector<32x32xf32>
    %54 = tpu.matmul %51, %52, %cst_34 {dimension_numbers = #tpu.dot_dimension_numbers<[1], [1], [0], [0], [0, 0, 1, 0], [], []>} : vector<32x8xf32>, vector<32x8xf32>, vector<32x32xf32> -> vector<32x32xf32>
    %cst_35 = arith.constant 0.353553385 : f32
    %55 = vector.broadcast %cst_35 : f32 to vector<32x32xf32>
    %56 = arith.mulf %54, %55 : vector<32x32xf32>
    %57 = vector.broadcast %3 : vector<1x32xf32> to vector<32x32xf32>
    %58 = arith.addf %56, %57 : vector<32x32xf32>
    %cst_36 = arith.constant dense<0xFF800000> : vector<32xf32>
    %59 = vector.multi_reduction <maximumf>, %58, %cst_36 [1] : vector<32x32xf32> to vector<32xf32>
    %60 = vector.shape_cast %59 : vector<32xf32> to vector<32x1xf32>
    %61 = vector.broadcast %60 : vector<32x1xf32> to vector<32x32xf32>
    %62 = arith.subf %58, %61 : vector<32x32xf32>
    %63 = math.exp %62 : vector<32x32xf32>
    %cst_37 = arith.constant dense<0.000000e+00> : vector<32xf32>
    %64 = vector.multi_reduction <add>, %63, %cst_37 [1] : vector<32x32xf32> to vector<32xf32>
    %65 = vector.shape_cast %64 : vector<32xf32> to vector<32x1xf32>
    %cst_38 = arith.constant dense<0.000000e+00> : vector<32x8xf32>
    %66 = tpu.matmul %63, %53, %cst_38 {dimension_numbers = #tpu.dot_dimension_numbers<[1], [0], [0], [1], [0, 0, 1, 1], [], []>} : vector<32x32xf32>, vector<32x8xf32>, vector<32x8xf32> -> vector<32x8xf32>
    %67 = tpu.reciprocal %65 {approx = true} : vector<32x1xf32> -> vector<32x1xf32>
    %68 = vector.broadcast %67 : vector<32x1xf32> to vector<32x8xf32>
    %69 = arith.mulf %66, %68 : vector<32x8xf32>
    %70 = vector.extract_strided_slice %42 {offsets = [0, 0], sizes = [8, 32], strides = [1, 1]} : vector<32x32xf32> to vector<8x32xf32>
    %cst_39 = arith.constant dense<0.000000e+00> : vector<32x32xf32>
    %71 = tpu.matmul %69, %70, %cst_39 {dimension_numbers = #tpu.dot_dimension_numbers<[1], [0], [0], [1], [0, 0, 1, 1], [], []>} : vector<32x8xf32>, vector<8x32xf32>, vector<32x32xf32> -> vector<32x32xf32>
    %72 = arith.addf %50, %71 : vector<32x32xf32>
    %73 = vector.extract_strided_slice %49 {offsets = [0, 8], sizes = [32, 8], strides = [1, 1]} : vector<32x96xf32> to vector<32x8xf32>
    %74 = vector.extract_strided_slice %49 {offsets = [0, 40], sizes = [32, 8], strides = [1, 1]} : vector<32x96xf32> to vector<32x8xf32>
    %75 = vector.extract_strided_slice %49 {offsets = [0, 72], sizes = [32, 8], strides = [1, 1]} : vector<32x96xf32> to vector<32x8xf32>
    %cst_40 = arith.constant dense<0.000000e+00> : vector<32x32xf32>
    %76 = tpu.matmul %73, %74, %cst_40 {dimension_numbers = #tpu.dot_dimension_numbers<[1], [1], [0], [0], [0, 0, 1, 0], [], []>} : vector<32x8xf32>, vector<32x8xf32>, vector<32x32xf32> -> vector<32x32xf32>
    %cst_41 = arith.constant 0.353553385 : f32
    %77 = vector.broadcast %cst_41 : f32 to vector<32x32xf32>
    %78 = arith.mulf %76, %77 : vector<32x32xf32>
    %79 = vector.broadcast %3 : vector<1x32xf32> to vector<32x32xf32>
    %80 = arith.addf %78, %79 : vector<32x32xf32>
    %cst_42 = arith.constant dense<0xFF800000> : vector<32xf32>
    %81 = vector.multi_reduction <maximumf>, %80, %cst_42 [1] : vector<32x32xf32> to vector<32xf32>
    %82 = vector.shape_cast %81 : vector<32xf32> to vector<32x1xf32>
    %83 = vector.broadcast %82 : vector<32x1xf32> to vector<32x32xf32>
    %84 = arith.subf %80, %83 : vector<32x32xf32>
    %85 = math.exp %84 : vector<32x32xf32>
    %cst_43 = arith.constant dense<0.000000e+00> : vector<32xf32>
    %86 = vector.multi_reduction <add>, %85, %cst_43 [1] : vector<32x32xf32> to vector<32xf32>
    %87 = vector.shape_cast %86 : vector<32xf32> to vector<32x1xf32>
    %cst_44 = arith.constant dense<0.000000e+00> : vector<32x8xf32>
    %88 = tpu.matmul %85, %75, %cst_44 {dimension_numbers = #tpu.dot_dimension_numbers<[1], [0], [0], [1], [0, 0, 1, 1], [], []>} : vector<32x32xf32>, vector<32x8xf32>, vector<32x8xf32> -> vector<32x8xf32>
    %89 = tpu.reciprocal %87 {approx = true} : vector<32x1xf32> -> vector<32x1xf32>
    %90 = vector.broadcast %89 : vector<32x1xf32> to vector<32x8xf32>
    %91 = arith.mulf %88, %90 : vector<32x8xf32>
    %92 = vector.extract_strided_slice %42 {offsets = [8, 0], sizes = [8, 32], strides = [1, 1]} : vector<32x32xf32> to vector<8x32xf32>
    %cst_45 = arith.constant dense<0.000000e+00> : vector<32x32xf32>
    %93 = tpu.matmul %91, %92, %cst_45 {dimension_numbers = #tpu.dot_dimension_numbers<[1], [0], [0], [1], [0, 0, 1, 1], [], []>} : vector<32x8xf32>, vector<8x32xf32>, vector<32x32xf32> -> vector<32x32xf32>
    %94 = arith.addf %72, %93 : vector<32x32xf32>
    %95 = vector.extract_strided_slice %49 {offsets = [0, 16], sizes = [32, 8], strides = [1, 1]} : vector<32x96xf32> to vector<32x8xf32>
    %96 = vector.extract_strided_slice %49 {offsets = [0, 48], sizes = [32, 8], strides = [1, 1]} : vector<32x96xf32> to vector<32x8xf32>
    %97 = vector.extract_strided_slice %49 {offsets = [0, 80], sizes = [32, 8], strides = [1, 1]} : vector<32x96xf32> to vector<32x8xf32>
    %cst_46 = arith.constant dense<0.000000e+00> : vector<32x32xf32>
    %98 = tpu.matmul %95, %96, %cst_46 {dimension_numbers = #tpu.dot_dimension_numbers<[1], [1], [0], [0], [0, 0, 1, 0], [], []>} : vector<32x8xf32>, vector<32x8xf32>, vector<32x32xf32> -> vector<32x32xf32>
    %cst_47 = arith.constant 0.353553385 : f32
    %99 = vector.broadcast %cst_47 : f32 to vector<32x32xf32>
    %100 = arith.mulf %98, %99 : vector<32x32xf32>
    %101 = vector.broadcast %3 : vector<1x32xf32> to vector<32x32xf32>
    %102 = arith.addf %100, %101 : vector<32x32xf32>
    %cst_48 = arith.constant dense<0xFF800000> : vector<32xf32>
    %103 = vector.multi_reduction <maximumf>, %102, %cst_48 [1] : vector<32x32xf32> to vector<32xf32>
    %104 = vector.shape_cast %103 : vector<32xf32> to vector<32x1xf32>
    %105 = vector.broadcast %104 : vector<32x1xf32> to vector<32x32xf32>
    %106 = arith.subf %102, %105 : vector<32x32xf32>
    %107 = math.exp %106 : vector<32x32xf32>
    %cst_49 = arith.constant dense<0.000000e+00> : vector<32xf32>
    %108 = vector.multi_reduction <add>, %107, %cst_49 [1] : vector<32x32xf32> to vector<32xf32>
    %109 = vector.shape_cast %108 : vector<32xf32> to vector<32x1xf32>
    %cst_50 = arith.constant dense<0.000000e+00> : vector<32x8xf32>
    %110 = tpu.matmul %107, %97, %cst_50 {dimension_numbers = #tpu.dot_dimension_numbers<[1], [0], [0], [1], [0, 0, 1, 1], [], []>} : vector<32x32xf32>, vector<32x8xf32>, vector<32x8xf32> -> vector<32x8xf32>
    %111 = tpu.reciprocal %109 {approx = true} : vector<32x1xf32> -> vector<32x1xf32>
    %112 = vector.broadcast %111 : vector<32x1xf32> to vector<32x8xf32>
    %113 = arith.mulf %110, %112 : vector<32x8xf32>
    %114 = vector.extract_strided_slice %42 {offsets = [16, 0], sizes = [8, 32], strides = [1, 1]} : vector<32x32xf32> to vector<8x32xf32>
    %cst_51 = arith.constant dense<0.000000e+00> : vector<32x32xf32>
    %115 = tpu.matmul %113, %114, %cst_51 {dimension_numbers = #tpu.dot_dimension_numbers<[1], [0], [0], [1], [0, 0, 1, 1], [], []>} : vector<32x8xf32>, vector<8x32xf32>, vector<32x32xf32> -> vector<32x32xf32>
    %116 = arith.addf %94, %115 : vector<32x32xf32>
    %117 = vector.extract_strided_slice %49 {offsets = [0, 24], sizes = [32, 8], strides = [1, 1]} : vector<32x96xf32> to vector<32x8xf32>
    %118 = vector.extract_strided_slice %49 {offsets = [0, 56], sizes = [32, 8], strides = [1, 1]} : vector<32x96xf32> to vector<32x8xf32>
    %119 = vector.extract_strided_slice %49 {offsets = [0, 88], sizes = [32, 8], strides = [1, 1]} : vector<32x96xf32> to vector<32x8xf32>
    %cst_52 = arith.constant dense<0.000000e+00> : vector<32x32xf32>
    %120 = tpu.matmul %117, %118, %cst_52 {dimension_numbers = #tpu.dot_dimension_numbers<[1], [1], [0], [0], [0, 0, 1, 0], [], []>} : vector<32x8xf32>, vector<32x8xf32>, vector<32x32xf32> -> vector<32x32xf32>
    %cst_53 = arith.constant 0.353553385 : f32
    %121 = vector.broadcast %cst_53 : f32 to vector<32x32xf32>
    %122 = arith.mulf %120, %121 : vector<32x32xf32>
    %123 = vector.broadcast %3 : vector<1x32xf32> to vector<32x32xf32>
    %124 = arith.addf %122, %123 : vector<32x32xf32>
    %cst_54 = arith.constant dense<0xFF800000> : vector<32xf32>
    %125 = vector.multi_reduction <maximumf>, %124, %cst_54 [1] : vector<32x32xf32> to vector<32xf32>
    %126 = vector.shape_cast %125 : vector<32xf32> to vector<32x1xf32>
    %127 = vector.broadcast %126 : vector<32x1xf32> to vector<32x32xf32>
    %128 = arith.subf %124, %127 : vector<32x32xf32>
    %129 = math.exp %128 : vector<32x32xf32>
    %cst_55 = arith.constant dense<0.000000e+00> : vector<32xf32>
    %130 = vector.multi_reduction <add>, %129, %cst_55 [1] : vector<32x32xf32> to vector<32xf32>
    %131 = vector.shape_cast %130 : vector<32xf32> to vector<32x1xf32>
    %cst_56 = arith.constant dense<0.000000e+00> : vector<32x8xf32>
    %132 = tpu.matmul %129, %119, %cst_56 {dimension_numbers = #tpu.dot_dimension_numbers<[1], [0], [0], [1], [0, 0, 1, 1], [], []>} : vector<32x32xf32>, vector<32x8xf32>, vector<32x8xf32> -> vector<32x8xf32>
    %133 = tpu.reciprocal %131 {approx = true} : vector<32x1xf32> -> vector<32x1xf32>
    %134 = vector.broadcast %133 : vector<32x1xf32> to vector<32x8xf32>
    %135 = arith.mulf %132, %134 : vector<32x8xf32>
    %136 = vector.extract_strided_slice %42 {offsets = [24, 0], sizes = [8, 32], strides = [1, 1]} : vector<32x32xf32> to vector<8x32xf32>
    %cst_57 = arith.constant dense<0.000000e+00> : vector<32x32xf32>
    %137 = tpu.matmul %135, %136, %cst_57 {dimension_numbers = #tpu.dot_dimension_numbers<[1], [0], [0], [1], [0, 0, 1, 1], [], []>} : vector<32x8xf32>, vector<8x32xf32>, vector<32x32xf32> -> vector<32x32xf32>
    %138 = arith.addf %116, %137 : vector<32x32xf32>
    %139 = vector.broadcast %44 : vector<1x32xf32> to vector<32x32xf32>
    %140 = arith.addf %138, %139 : vector<32x32xf32>
    %141 = arith.addf %140, %36 : vector<32x32xf32>
    %142 = vector.extract_strided_slice %46 {offsets = [0, 0], sizes = [1, 32], strides = [1, 1]} : vector<4x32xf32> to vector<1x32xf32>
    %143 = vector.extract_strided_slice %46 {offsets = [1, 0], sizes = [1, 32], strides = [1, 1]} : vector<4x32xf32> to vector<1x32xf32>
    %cst_58 = arith.constant dense<0.000000e+00> : vector<32xf32>
    %144 = vector.multi_reduction <add>, %141, %cst_58 [1] : vector<32x32xf32> to vector<32xf32>
    %145 = vector.shape_cast %144 : vector<32xf32> to vector<32x1xf32>
    %cst_59 = arith.constant 3.200000e+01 : f32
    %146 = vector.broadcast %cst_59 : f32 to vector<32x1xf32>
    %147 = arith.divf %145, %146 : vector<32x1xf32>
    %148 = vector.broadcast %147 : vector<32x1xf32> to vector<32x32xf32>
    %149 = arith.subf %141, %148 : vector<32x32xf32>
    %150 = arith.mulf %149, %149 : vector<32x32xf32>
    %cst_60 = arith.constant dense<0.000000e+00> : vector<32xf32>
    %151 = vector.multi_reduction <add>, %150, %cst_60 [1] : vector<32x32xf32> to vector<32xf32>
    %152 = vector.shape_cast %151 : vector<32xf32> to vector<32x1xf32>
    %cst_61 = arith.constant 3.200000e+01 : f32
    %153 = vector.broadcast %cst_61 : f32 to vector<32x1xf32>
    %154 = arith.divf %152, %153 : vector<32x1xf32>
    %155 = vector.broadcast %147 : vector<32x1xf32> to vector<32x32xf32>
    %156 = arith.subf %141, %155 : vector<32x32xf32>
    %cst_62 = arith.constant 9.99999996E-13 : f32
    %157 = vector.broadcast %cst_62 : f32 to vector<32x1xf32>
    %158 = arith.addf %154, %157 : vector<32x1xf32>
    %159 = math.rsqrt %158 : vector<32x1xf32>
    %160 = vector.broadcast %159 : vector<32x1xf32> to vector<32x32xf32>
    %161 = arith.mulf %156, %160 : vector<32x32xf32>
    %162 = vector.broadcast %142 : vector<1x32xf32> to vector<32x32xf32>
    %163 = arith.mulf %161, %162 : vector<32x32xf32>
    %164 = vector.broadcast %143 : vector<1x32xf32> to vector<32x32xf32>
    %165 = arith.addf %163, %164 : vector<32x32xf32>
    %c0_63 = arith.constant 0 : index
    %c0_64 = arith.constant 0 : index
    %c0_65 = arith.constant 0 : index
    %166 = vector.load %arg11[%c0_63, %c0_64, %c0_65] : memref<2x32x64xf32, #tpu.memory_space<vmem>>, vector<1x32x64xf32>
    %167 = vector.shape_cast %166 : vector<1x32x64xf32> to vector<32x64xf32>
    %cst_66 = arith.constant dense<0.000000e+00> : vector<32x64xf32>
    %168 = tpu.matmul %165, %167, %cst_66 {dimension_numbers = #tpu.dot_dimension_numbers<[1], [0], [0], [1], [0, 0, 1, 1], [], []>} : vector<32x32xf32>, vector<32x64xf32>, vector<32x64xf32> -> vector<32x64xf32>
    %c0_67 = arith.constant 0 : index
    %c0_68 = arith.constant 0 : index
    %c0_69 = arith.constant 0 : index
    %169 = vector.load %arg12[%c0_67, %c0_68, %c0_69] : memref<2x1x64xf32, #tpu.memory_space<vmem>>, vector<1x1x64xf32>
    %170 = vector.shape_cast %169 : vector<1x1x64xf32> to vector<1x64xf32>
    %171 = vector.broadcast %170 : vector<1x64xf32> to vector<32x64xf32>
    %172 = arith.addf %168, %171 : vector<32x64xf32>
    %173 = arith.mulf %172, %172 : vector<32x64xf32>
    %174 = arith.mulf %172, %173 : vector<32x64xf32>
    %cst_70 = arith.constant 4.471500e-02 : f32
    %175 = vector.broadcast %cst_70 : f32 to vector<32x64xf32>
    %176 = arith.mulf %175, %174 : vector<32x64xf32>
    %177 = arith.addf %172, %176 : vector<32x64xf32>
    %cst_71 = arith.constant 0.797884583 : f32
    %178 = vector.broadcast %cst_71 : f32 to vector<32x64xf32>
    %179 = arith.mulf %178, %177 : vector<32x64xf32>
    %180 = math.tanh %179 : vector<32x64xf32>
    %cst_72 = arith.constant 1.000000e+00 : f32
    %181 = vector.broadcast %cst_72 : f32 to vector<32x64xf32>
    %182 = arith.addf %181, %180 : vector<32x64xf32>
    %cst_73 = arith.constant 5.000000e-01 : f32
    %183 = vector.broadcast %cst_73 : f32 to vector<32x64xf32>
    %184 = arith.mulf %183, %182 : vector<32x64xf32>
    %185 = arith.mulf %172, %184 : vector<32x64xf32>
    %c0_74 = arith.constant 0 : index
    %c0_75 = arith.constant 0 : index
    %c0_76 = arith.constant 0 : index
    %186 = vector.load %arg13[%c0_74, %c0_75, %c0_76] : memref<2x64x32xf32, #tpu.memory_space<vmem>>, vector<1x64x32xf32>
    %187 = vector.shape_cast %186 : vector<1x64x32xf32> to vector<64x32xf32>
    %cst_77 = arith.constant dense<0.000000e+00> : vector<32x32xf32>
    %188 = tpu.matmul %185, %187, %cst_77 {dimension_numbers = #tpu.dot_dimension_numbers<[1], [0], [0], [1], [0, 0, 1, 1], [], []>} : vector<32x64xf32>, vector<64x32xf32>, vector<32x32xf32> -> vector<32x32xf32>
    %c0_78 = arith.constant 0 : index
    %c0_79 = arith.constant 0 : index
    %c0_80 = arith.constant 0 : index
    %189 = vector.load %arg14[%c0_78, %c0_79, %c0_80] : memref<2x1x32xf32, #tpu.memory_space<vmem>>, vector<1x1x32xf32>
    %190 = vector.shape_cast %189 : vector<1x1x32xf32> to vector<1x32xf32>
    %191 = vector.broadcast %190 : vector<1x32xf32> to vector<32x32xf32>
    %192 = arith.addf %188, %191 : vector<32x32xf32>
    %193 = arith.addf %192, %165 : vector<32x32xf32>
    %194 = vector.extract_strided_slice %46 {offsets = [2, 0], sizes = [1, 32], strides = [1, 1]} : vector<4x32xf32> to vector<1x32xf32>
    %195 = vector.extract_strided_slice %46 {offsets = [3, 0], sizes = [1, 32], strides = [1, 1]} : vector<4x32xf32> to vector<1x32xf32>
    %cst_81 = arith.constant dense<0.000000e+00> : vector<32xf32>
    %196 = vector.multi_reduction <add>, %193, %cst_81 [1] : vector<32x32xf32> to vector<32xf32>
    %197 = vector.shape_cast %196 : vector<32xf32> to vector<32x1xf32>
    %cst_82 = arith.constant 3.200000e+01 : f32
    %198 = vector.broadcast %cst_82 : f32 to vector<32x1xf32>
    %199 = arith.divf %197, %198 : vector<32x1xf32>
    %200 = vector.broadcast %199 : vector<32x1xf32> to vector<32x32xf32>
    %201 = arith.subf %193, %200 : vector<32x32xf32>
    %202 = arith.mulf %201, %201 : vector<32x32xf32>
    %cst_83 = arith.constant dense<0.000000e+00> : vector<32xf32>
    %203 = vector.multi_reduction <add>, %202, %cst_83 [1] : vector<32x32xf32> to vector<32xf32>
    %204 = vector.shape_cast %203 : vector<32xf32> to vector<32x1xf32>
    %cst_84 = arith.constant 3.200000e+01 : f32
    %205 = vector.broadcast %cst_84 : f32 to vector<32x1xf32>
    %206 = arith.divf %204, %205 : vector<32x1xf32>
    %207 = vector.broadcast %199 : vector<32x1xf32> to vector<32x32xf32>
    %208 = arith.subf %193, %207 : vector<32x32xf32>
    %cst_85 = arith.constant 9.99999996E-13 : f32
    %209 = vector.broadcast %cst_85 : f32 to vector<32x1xf32>
    %210 = arith.addf %206, %209 : vector<32x1xf32>
    %211 = math.rsqrt %210 : vector<32x1xf32>
    %212 = vector.broadcast %211 : vector<32x1xf32> to vector<32x32xf32>
    %213 = arith.mulf %208, %212 : vector<32x32xf32>
    %214 = vector.broadcast %194 : vector<1x32xf32> to vector<32x32xf32>
    %215 = arith.mulf %213, %214 : vector<32x32xf32>
    %216 = vector.broadcast %195 : vector<1x32xf32> to vector<32x32xf32>
    %217 = arith.addf %215, %216 : vector<32x32xf32>
    %c1_86 = arith.constant 1 : index
    %c0_87 = arith.constant 0 : index
    %c0_88 = arith.constant 0 : index
    %218 = vector.load %arg6[%c1_86, %c0_87, %c0_88] : memref<2x32x96xf32, #tpu.memory_space<vmem>>, vector<1x32x96xf32>
    %219 = vector.shape_cast %218 : vector<1x32x96xf32> to vector<32x96xf32>
    %c1_89 = arith.constant 1 : index
    %c0_90 = arith.constant 0 : index
    %c0_91 = arith.constant 0 : index
    %220 = vector.load %arg7[%c1_89, %c0_90, %c0_91] : memref<2x1x96xf32, #tpu.memory_space<vmem>>, vector<1x1x96xf32>
    %221 = vector.shape_cast %220 : vector<1x1x96xf32> to vector<1x96xf32>
    %c1_92 = arith.constant 1 : index
    %c0_93 = arith.constant 0 : index
    %c0_94 = arith.constant 0 : index
    %222 = vector.load %arg8[%c1_92, %c0_93, %c0_94] : memref<2x32x32xf32, #tpu.memory_space<vmem>>, vector<1x32x32xf32>
    %223 = vector.shape_cast %222 : vector<1x32x32xf32> to vector<32x32xf32>
    %c1_95 = arith.constant 1 : index
    %c0_96 = arith.constant 0 : index
    %c0_97 = arith.constant 0 : index
    %224 = vector.load %arg9[%c1_95, %c0_96, %c0_97] : memref<2x1x32xf32, #tpu.memory_space<vmem>>, vector<1x1x32xf32>
    %225 = vector.shape_cast %224 : vector<1x1x32xf32> to vector<1x32xf32>
    %c1_98 = arith.constant 1 : index
    %c0_99 = arith.constant 0 : index
    %c0_100 = arith.constant 0 : index
    %226 = vector.load %arg10[%c1_98, %c0_99, %c0_100] : memref<2x4x32xf32, #tpu.memory_space<vmem>>, vector<1x4x32xf32>
    %227 = vector.shape_cast %226 : vector<1x4x32xf32> to vector<4x32xf32>
    %cst_101 = arith.constant dense<0.000000e+00> : vector<32x96xf32>
    %228 = tpu.matmul %217, %219, %cst_101 {dimension_numbers = #tpu.dot_dimension_numbers<[1], [0], [0], [1], [0, 0, 1, 1], [], []>} : vector<32x32xf32>, vector<32x96xf32>, vector<32x96xf32> -> vector<32x96xf32>
    %229 = vector.broadcast %221 : vector<1x96xf32> to vector<32x96xf32>
    %230 = arith.addf %228, %229 : vector<32x96xf32>
    %cst_102 = arith.constant 0.000000e+00 : f32
    %231 = vector.broadcast %cst_102 : f32 to vector<32x32xf32>
    %232 = vector.extract_strided_slice %230 {offsets = [0, 0], sizes = [32, 8], strides = [1, 1]} : vector<32x96xf32> to vector<32x8xf32>
    %233 = vector.extract_strided_slice %230 {offsets = [0, 32], sizes = [32, 8], strides = [1, 1]} : vector<32x96xf32> to vector<32x8xf32>
    %234 = vector.extract_strided_slice %230 {offsets = [0, 64], sizes = [32, 8], strides = [1, 1]} : vector<32x96xf32> to vector<32x8xf32>
    %cst_103 = arith.constant dense<0.000000e+00> : vector<32x32xf32>
    %235 = tpu.matmul %232, %233, %cst_103 {dimension_numbers = #tpu.dot_dimension_numbers<[1], [1], [0], [0], [0, 0, 1, 0], [], []>} : vector<32x8xf32>, vector<32x8xf32>, vector<32x32xf32> -> vector<32x32xf32>
    %cst_104 = arith.constant 0.353553385 : f32
    %236 = vector.broadcast %cst_104 : f32 to vector<32x32xf32>
    %237 = arith.mulf %235, %236 : vector<32x32xf32>
    %238 = vector.broadcast %3 : vector<1x32xf32> to vector<32x32xf32>
    %239 = arith.addf %237, %238 : vector<32x32xf32>
    %cst_105 = arith.constant dense<0xFF800000> : vector<32xf32>
    %240 = vector.multi_reduction <maximumf>, %239, %cst_105 [1] : vector<32x32xf32> to vector<32xf32>
    %241 = vector.shape_cast %240 : vector<32xf32> to vector<32x1xf32>
    %242 = vector.broadcast %241 : vector<32x1xf32> to vector<32x32xf32>
    %243 = arith.subf %239, %242 : vector<32x32xf32>
    %244 = math.exp %243 : vector<32x32xf32>
    %cst_106 = arith.constant dense<0.000000e+00> : vector<32xf32>
    %245 = vector.multi_reduction <add>, %244, %cst_106 [1] : vector<32x32xf32> to vector<32xf32>
    %246 = vector.shape_cast %245 : vector<32xf32> to vector<32x1xf32>
    %cst_107 = arith.constant dense<0.000000e+00> : vector<32x8xf32>
    %247 = tpu.matmul %244, %234, %cst_107 {dimension_numbers = #tpu.dot_dimension_numbers<[1], [0], [0], [1], [0, 0, 1, 1], [], []>} : vector<32x32xf32>, vector<32x8xf32>, vector<32x8xf32> -> vector<32x8xf32>
    %248 = tpu.reciprocal %246 {approx = true} : vector<32x1xf32> -> vector<32x1xf32>
    %249 = vector.broadcast %248 : vector<32x1xf32> to vector<32x8xf32>
    %250 = arith.mulf %247, %249 : vector<32x8xf32>
    %251 = vector.extract_strided_slice %223 {offsets = [0, 0], sizes = [8, 32], strides = [1, 1]} : vector<32x32xf32> to vector<8x32xf32>
    %cst_108 = arith.constant dense<0.000000e+00> : vector<32x32xf32>
    %252 = tpu.matmul %250, %251, %cst_108 {dimension_numbers = #tpu.dot_dimension_numbers<[1], [0], [0], [1], [0, 0, 1, 1], [], []>} : vector<32x8xf32>, vector<8x32xf32>, vector<32x32xf32> -> vector<32x32xf32>
    %253 = arith.addf %231, %252 : vector<32x32xf32>
    %254 = vector.extract_strided_slice %230 {offsets = [0, 8], sizes = [32, 8], strides = [1, 1]} : vector<32x96xf32> to vector<32x8xf32>
    %255 = vector.extract_strided_slice %230 {offsets = [0, 40], sizes = [32, 8], strides = [1, 1]} : vector<32x96xf32> to vector<32x8xf32>
    %256 = vector.extract_strided_slice %230 {offsets = [0, 72], sizes = [32, 8], strides = [1, 1]} : vector<32x96xf32> to vector<32x8xf32>
    %cst_109 = arith.constant dense<0.000000e+00> : vector<32x32xf32>
    %257 = tpu.matmul %254, %255, %cst_109 {dimension_numbers = #tpu.dot_dimension_numbers<[1], [1], [0], [0], [0, 0, 1, 0], [], []>} : vector<32x8xf32>, vector<32x8xf32>, vector<32x32xf32> -> vector<32x32xf32>
    %cst_110 = arith.constant 0.353553385 : f32
    %258 = vector.broadcast %cst_110 : f32 to vector<32x32xf32>
    %259 = arith.mulf %257, %258 : vector<32x32xf32>
    %260 = vector.broadcast %3 : vector<1x32xf32> to vector<32x32xf32>
    %261 = arith.addf %259, %260 : vector<32x32xf32>
    %cst_111 = arith.constant dense<0xFF800000> : vector<32xf32>
    %262 = vector.multi_reduction <maximumf>, %261, %cst_111 [1] : vector<32x32xf32> to vector<32xf32>
    %263 = vector.shape_cast %262 : vector<32xf32> to vector<32x1xf32>
    %264 = vector.broadcast %263 : vector<32x1xf32> to vector<32x32xf32>
    %265 = arith.subf %261, %264 : vector<32x32xf32>
    %266 = math.exp %265 : vector<32x32xf32>
    %cst_112 = arith.constant dense<0.000000e+00> : vector<32xf32>
    %267 = vector.multi_reduction <add>, %266, %cst_112 [1] : vector<32x32xf32> to vector<32xf32>
    %268 = vector.shape_cast %267 : vector<32xf32> to vector<32x1xf32>
    %cst_113 = arith.constant dense<0.000000e+00> : vector<32x8xf32>
    %269 = tpu.matmul %266, %256, %cst_113 {dimension_numbers = #tpu.dot_dimension_numbers<[1], [0], [0], [1], [0, 0, 1, 1], [], []>} : vector<32x32xf32>, vector<32x8xf32>, vector<32x8xf32> -> vector<32x8xf32>
    %270 = tpu.reciprocal %268 {approx = true} : vector<32x1xf32> -> vector<32x1xf32>
    %271 = vector.broadcast %270 : vector<32x1xf32> to vector<32x8xf32>
    %272 = arith.mulf %269, %271 : vector<32x8xf32>
    %273 = vector.extract_strided_slice %223 {offsets = [8, 0], sizes = [8, 32], strides = [1, 1]} : vector<32x32xf32> to vector<8x32xf32>
    %cst_114 = arith.constant dense<0.000000e+00> : vector<32x32xf32>
    %274 = tpu.matmul %272, %273, %cst_114 {dimension_numbers = #tpu.dot_dimension_numbers<[1], [0], [0], [1], [0, 0, 1, 1], [], []>} : vector<32x8xf32>, vector<8x32xf32>, vector<32x32xf32> -> vector<32x32xf32>
    %275 = arith.addf %253, %274 : vector<32x32xf32>
    %276 = vector.extract_strided_slice %230 {offsets = [0, 16], sizes = [32, 8], strides = [1, 1]} : vector<32x96xf32> to vector<32x8xf32>
    %277 = vector.extract_strided_slice %230 {offsets = [0, 48], sizes = [32, 8], strides = [1, 1]} : vector<32x96xf32> to vector<32x8xf32>
    %278 = vector.extract_strided_slice %230 {offsets = [0, 80], sizes = [32, 8], strides = [1, 1]} : vector<32x96xf32> to vector<32x8xf32>
    %cst_115 = arith.constant dense<0.000000e+00> : vector<32x32xf32>
    %279 = tpu.matmul %276, %277, %cst_115 {dimension_numbers = #tpu.dot_dimension_numbers<[1], [1], [0], [0], [0, 0, 1, 0], [], []>} : vector<32x8xf32>, vector<32x8xf32>, vector<32x32xf32> -> vector<32x32xf32>
    %cst_116 = arith.constant 0.353553385 : f32
    %280 = vector.broadcast %cst_116 : f32 to vector<32x32xf32>
    %281 = arith.mulf %279, %280 : vector<32x32xf32>
    %282 = vector.broadcast %3 : vector<1x32xf32> to vector<32x32xf32>
    %283 = arith.addf %281, %282 : vector<32x32xf32>
    %cst_117 = arith.constant dense<0xFF800000> : vector<32xf32>
    %284 = vector.multi_reduction <maximumf>, %283, %cst_117 [1] : vector<32x32xf32> to vector<32xf32>
    %285 = vector.shape_cast %284 : vector<32xf32> to vector<32x1xf32>
    %286 = vector.broadcast %285 : vector<32x1xf32> to vector<32x32xf32>
    %287 = arith.subf %283, %286 : vector<32x32xf32>
    %288 = math.exp %287 : vector<32x32xf32>
    %cst_118 = arith.constant dense<0.000000e+00> : vector<32xf32>
    %289 = vector.multi_reduction <add>, %288, %cst_118 [1] : vector<32x32xf32> to vector<32xf32>
    %290 = vector.shape_cast %289 : vector<32xf32> to vector<32x1xf32>
    %cst_119 = arith.constant dense<0.000000e+00> : vector<32x8xf32>
    %291 = tpu.matmul %288, %278, %cst_119 {dimension_numbers = #tpu.dot_dimension_numbers<[1], [0], [0], [1], [0, 0, 1, 1], [], []>} : vector<32x32xf32>, vector<32x8xf32>, vector<32x8xf32> -> vector<32x8xf32>
    %292 = tpu.reciprocal %290 {approx = true} : vector<32x1xf32> -> vector<32x1xf32>
    %293 = vector.broadcast %292 : vector<32x1xf32> to vector<32x8xf32>
    %294 = arith.mulf %291, %293 : vector<32x8xf32>
    %295 = vector.extract_strided_slice %223 {offsets = [16, 0], sizes = [8, 32], strides = [1, 1]} : vector<32x32xf32> to vector<8x32xf32>
    %cst_120 = arith.constant dense<0.000000e+00> : vector<32x32xf32>
    %296 = tpu.matmul %294, %295, %cst_120 {dimension_numbers = #tpu.dot_dimension_numbers<[1], [0], [0], [1], [0, 0, 1, 1], [], []>} : vector<32x8xf32>, vector<8x32xf32>, vector<32x32xf32> -> vector<32x32xf32>
    %297 = arith.addf %275, %296 : vector<32x32xf32>
    %298 = vector.extract_strided_slice %230 {offsets = [0, 24], sizes = [32, 8], strides = [1, 1]} : vector<32x96xf32> to vector<32x8xf32>
    %299 = vector.extract_strided_slice %230 {offsets = [0, 56], sizes = [32, 8], strides = [1, 1]} : vector<32x96xf32> to vector<32x8xf32>
    %300 = vector.extract_strided_slice %230 {offsets = [0, 88], sizes = [32, 8], strides = [1, 1]} : vector<32x96xf32> to vector<32x8xf32>
    %cst_121 = arith.constant dense<0.000000e+00> : vector<32x32xf32>
    %301 = tpu.matmul %298, %299, %cst_121 {dimension_numbers = #tpu.dot_dimension_numbers<[1], [1], [0], [0], [0, 0, 1, 0], [], []>} : vector<32x8xf32>, vector<32x8xf32>, vector<32x32xf32> -> vector<32x32xf32>
    %cst_122 = arith.constant 0.353553385 : f32
    %302 = vector.broadcast %cst_122 : f32 to vector<32x32xf32>
    %303 = arith.mulf %301, %302 : vector<32x32xf32>
    %304 = vector.broadcast %3 : vector<1x32xf32> to vector<32x32xf32>
    %305 = arith.addf %303, %304 : vector<32x32xf32>
    %cst_123 = arith.constant dense<0xFF800000> : vector<32xf32>
    %306 = vector.multi_reduction <maximumf>, %305, %cst_123 [1] : vector<32x32xf32> to vector<32xf32>
    %307 = vector.shape_cast %306 : vector<32xf32> to vector<32x1xf32>
    %308 = vector.broadcast %307 : vector<32x1xf32> to vector<32x32xf32>
    %309 = arith.subf %305, %308 : vector<32x32xf32>
    %310 = math.exp %309 : vector<32x32xf32>
    %cst_124 = arith.constant dense<0.000000e+00> : vector<32xf32>
    %311 = vector.multi_reduction <add>, %310, %cst_124 [1] : vector<32x32xf32> to vector<32xf32>
    %312 = vector.shape_cast %311 : vector<32xf32> to vector<32x1xf32>
    %cst_125 = arith.constant dense<0.000000e+00> : vector<32x8xf32>
    %313 = tpu.matmul %310, %300, %cst_125 {dimension_numbers = #tpu.dot_dimension_numbers<[1], [0], [0], [1], [0, 0, 1, 1], [], []>} : vector<32x32xf32>, vector<32x8xf32>, vector<32x8xf32> -> vector<32x8xf32>
    %314 = tpu.reciprocal %312 {approx = true} : vector<32x1xf32> -> vector<32x1xf32>
    %315 = vector.broadcast %314 : vector<32x1xf32> to vector<32x8xf32>
    %316 = arith.mulf %313, %315 : vector<32x8xf32>
    %317 = vector.extract_strided_slice %223 {offsets = [24, 0], sizes = [8, 32], strides = [1, 1]} : vector<32x32xf32> to vector<8x32xf32>
    %cst_126 = arith.constant dense<0.000000e+00> : vector<32x32xf32>
    %318 = tpu.matmul %316, %317, %cst_126 {dimension_numbers = #tpu.dot_dimension_numbers<[1], [0], [0], [1], [0, 0, 1, 1], [], []>} : vector<32x8xf32>, vector<8x32xf32>, vector<32x32xf32> -> vector<32x32xf32>
    %319 = arith.addf %297, %318 : vector<32x32xf32>
    %320 = vector.broadcast %225 : vector<1x32xf32> to vector<32x32xf32>
    %321 = arith.addf %319, %320 : vector<32x32xf32>
    %322 = arith.addf %321, %217 : vector<32x32xf32>
    %323 = vector.extract_strided_slice %227 {offsets = [0, 0], sizes = [1, 32], strides = [1, 1]} : vector<4x32xf32> to vector<1x32xf32>
    %324 = vector.extract_strided_slice %227 {offsets = [1, 0], sizes = [1, 32], strides = [1, 1]} : vector<4x32xf32> to vector<1x32xf32>
    %cst_127 = arith.constant dense<0.000000e+00> : vector<32xf32>
    %325 = vector.multi_reduction <add>, %322, %cst_127 [1] : vector<32x32xf32> to vector<32xf32>
    %326 = vector.shape_cast %325 : vector<32xf32> to vector<32x1xf32>
    %cst_128 = arith.constant 3.200000e+01 : f32
    %327 = vector.broadcast %cst_128 : f32 to vector<32x1xf32>
    %328 = arith.divf %326, %327 : vector<32x1xf32>
    %329 = vector.broadcast %328 : vector<32x1xf32> to vector<32x32xf32>
    %330 = arith.subf %322, %329 : vector<32x32xf32>
    %331 = arith.mulf %330, %330 : vector<32x32xf32>
    %cst_129 = arith.constant dense<0.000000e+00> : vector<32xf32>
    %332 = vector.multi_reduction <add>, %331, %cst_129 [1] : vector<32x32xf32> to vector<32xf32>
    %333 = vector.shape_cast %332 : vector<32xf32> to vector<32x1xf32>
    %cst_130 = arith.constant 3.200000e+01 : f32
    %334 = vector.broadcast %cst_130 : f32 to vector<32x1xf32>
    %335 = arith.divf %333, %334 : vector<32x1xf32>
    %336 = vector.broadcast %328 : vector<32x1xf32> to vector<32x32xf32>
    %337 = arith.subf %322, %336 : vector<32x32xf32>
    %cst_131 = arith.constant 9.99999996E-13 : f32
    %338 = vector.broadcast %cst_131 : f32 to vector<32x1xf32>
    %339 = arith.addf %335, %338 : vector<32x1xf32>
    %340 = math.rsqrt %339 : vector<32x1xf32>
    %341 = vector.broadcast %340 : vector<32x1xf32> to vector<32x32xf32>
    %342 = arith.mulf %337, %341 : vector<32x32xf32>
    %343 = vector.broadcast %323 : vector<1x32xf32> to vector<32x32xf32>
    %344 = arith.mulf %342, %343 : vector<32x32xf32>
    %345 = vector.broadcast %324 : vector<1x32xf32> to vector<32x32xf32>
    %346 = arith.addf %344, %345 : vector<32x32xf32>
    %c1_132 = arith.constant 1 : index
    %c0_133 = arith.constant 0 : index
    %c0_134 = arith.constant 0 : index
    %347 = vector.load %arg11[%c1_132, %c0_133, %c0_134] : memref<2x32x64xf32, #tpu.memory_space<vmem>>, vector<1x32x64xf32>
    %348 = vector.shape_cast %347 : vector<1x32x64xf32> to vector<32x64xf32>
    %cst_135 = arith.constant dense<0.000000e+00> : vector<32x64xf32>
    %349 = tpu.matmul %346, %348, %cst_135 {dimension_numbers = #tpu.dot_dimension_numbers<[1], [0], [0], [1], [0, 0, 1, 1], [], []>} : vector<32x32xf32>, vector<32x64xf32>, vector<32x64xf32> -> vector<32x64xf32>
    %c1_136 = arith.constant 1 : index
    %c0_137 = arith.constant 0 : index
    %c0_138 = arith.constant 0 : index
    %350 = vector.load %arg12[%c1_136, %c0_137, %c0_138] : memref<2x1x64xf32, #tpu.memory_space<vmem>>, vector<1x1x64xf32>
    %351 = vector.shape_cast %350 : vector<1x1x64xf32> to vector<1x64xf32>
    %352 = vector.broadcast %351 : vector<1x64xf32> to vector<32x64xf32>
    %353 = arith.addf %349, %352 : vector<32x64xf32>
    %354 = arith.mulf %353, %353 : vector<32x64xf32>
    %355 = arith.mulf %353, %354 : vector<32x64xf32>
    %cst_139 = arith.constant 4.471500e-02 : f32
    %356 = vector.broadcast %cst_139 : f32 to vector<32x64xf32>
    %357 = arith.mulf %356, %355 : vector<32x64xf32>
    %358 = arith.addf %353, %357 : vector<32x64xf32>
    %cst_140 = arith.constant 0.797884583 : f32
    %359 = vector.broadcast %cst_140 : f32 to vector<32x64xf32>
    %360 = arith.mulf %359, %358 : vector<32x64xf32>
    %361 = math.tanh %360 : vector<32x64xf32>
    %cst_141 = arith.constant 1.000000e+00 : f32
    %362 = vector.broadcast %cst_141 : f32 to vector<32x64xf32>
    %363 = arith.addf %362, %361 : vector<32x64xf32>
    %cst_142 = arith.constant 5.000000e-01 : f32
    %364 = vector.broadcast %cst_142 : f32 to vector<32x64xf32>
    %365 = arith.mulf %364, %363 : vector<32x64xf32>
    %366 = arith.mulf %353, %365 : vector<32x64xf32>
    %c1_143 = arith.constant 1 : index
    %c0_144 = arith.constant 0 : index
    %c0_145 = arith.constant 0 : index
    %367 = vector.load %arg13[%c1_143, %c0_144, %c0_145] : memref<2x64x32xf32, #tpu.memory_space<vmem>>, vector<1x64x32xf32>
    %368 = vector.shape_cast %367 : vector<1x64x32xf32> to vector<64x32xf32>
    %cst_146 = arith.constant dense<0.000000e+00> : vector<32x32xf32>
    %369 = tpu.matmul %366, %368, %cst_146 {dimension_numbers = #tpu.dot_dimension_numbers<[1], [0], [0], [1], [0, 0, 1, 1], [], []>} : vector<32x64xf32>, vector<64x32xf32>, vector<32x32xf32> -> vector<32x32xf32>
    %c1_147 = arith.constant 1 : index
    %c0_148 = arith.constant 0 : index
    %c0_149 = arith.constant 0 : index
    %370 = vector.load %arg14[%c1_147, %c0_148, %c0_149] : memref<2x1x32xf32, #tpu.memory_space<vmem>>, vector<1x1x32xf32>
    %371 = vector.shape_cast %370 : vector<1x1x32xf32> to vector<1x32xf32>
    %372 = vector.broadcast %371 : vector<1x32xf32> to vector<32x32xf32>
    %373 = arith.addf %369, %372 : vector<32x32xf32>
    %374 = arith.addf %373, %346 : vector<32x32xf32>
    %375 = vector.extract_strided_slice %227 {offsets = [2, 0], sizes = [1, 32], strides = [1, 1]} : vector<4x32xf32> to vector<1x32xf32>
    %376 = vector.extract_strided_slice %227 {offsets = [3, 0], sizes = [1, 32], strides = [1, 1]} : vector<4x32xf32> to vector<1x32xf32>
    %cst_150 = arith.constant dense<0.000000e+00> : vector<32xf32>
    %377 = vector.multi_reduction <add>, %374, %cst_150 [1] : vector<32x32xf32> to vector<32xf32>
    %378 = vector.shape_cast %377 : vector<32xf32> to vector<32x1xf32>
    %cst_151 = arith.constant 3.200000e+01 : f32
    %379 = vector.broadcast %cst_151 : f32 to vector<32x1xf32>
    %380 = arith.divf %378, %379 : vector<32x1xf32>
    %381 = vector.broadcast %380 : vector<32x1xf32> to vector<32x32xf32>
    %382 = arith.subf %374, %381 : vector<32x32xf32>
    %383 = arith.mulf %382, %382 : vector<32x32xf32>
    %cst_152 = arith.constant dense<0.000000e+00> : vector<32xf32>
    %384 = vector.multi_reduction <add>, %383, %cst_152 [1] : vector<32x32xf32> to vector<32xf32>
    %385 = vector.shape_cast %384 : vector<32xf32> to vector<32x1xf32>
    %cst_153 = arith.constant 3.200000e+01 : f32
    %386 = vector.broadcast %cst_153 : f32 to vector<32x1xf32>
    %387 = arith.divf %385, %386 : vector<32x1xf32>
    %388 = vector.broadcast %380 : vector<32x1xf32> to vector<32x32xf32>
    %389 = arith.subf %374, %388 : vector<32x32xf32>
    %cst_154 = arith.constant 9.99999996E-13 : f32
    %390 = vector.broadcast %cst_154 : f32 to vector<32x1xf32>
    %391 = arith.addf %387, %390 : vector<32x1xf32>
    %392 = math.rsqrt %391 : vector<32x1xf32>
    %393 = vector.broadcast %392 : vector<32x1xf32> to vector<32x32xf32>
    %394 = arith.mulf %389, %393 : vector<32x32xf32>
    %395 = vector.broadcast %375 : vector<1x32xf32> to vector<32x32xf32>
    %396 = arith.mulf %394, %395 : vector<32x32xf32>
    %397 = vector.broadcast %376 : vector<1x32xf32> to vector<32x32xf32>
    %398 = arith.addf %396, %397 : vector<32x32xf32>
    %c0_155 = arith.constant 0 : index
    %c0_156 = arith.constant 0 : index
    %c0_157 = arith.constant 0 : index
    %399 = vector.load %arg15[%c0_155, %c0_156, %c0_157] : memref<1x32x32xf32, #tpu.memory_space<vmem>>, vector<1x32x32xf32>
    %400 = vector.shape_cast %399 : vector<1x32x32xf32> to vector<32x32xf32>
    %401 = vector.shape_cast %398 : vector<32x32xf32> to vector<1x32x32xf32>
    tpu.vector_store %arg15[%c0_155, %c0_156, %c0_157], %401 {strides = array<i32>} : memref<1x32x32xf32, #tpu.memory_space<vmem>>, vector<1x32x32xf32>,
    return
  }
  func.func @transform_0(%arg0: i32) -> (i32, i32, i32) {
    %c0_i32 = arith.constant 0 : i32
    %c0_i32_0 = arith.constant 0 : i32
    %c0_i32_1 = arith.constant 0 : i32
    return %arg0, %c0_i32, %c0_i32_0 : i32, i32, i32
  }
  func.func @transform_1(%arg0: i32) -> (i32, i32, i32) {
    %c0_i32 = arith.constant 0 : i32
    %c0_i32_0 = arith.constant 0 : i32
    %c0_i32_1 = arith.constant 0 : i32
    return %arg0, %c0_i32, %c0_i32_0 : i32, i32, i32
  }
  func.func @transform_2(%arg0: i32) -> (i32, i32) {
    %c0_i32 = arith.constant 0 : i32
    %c0_i32_0 = arith.constant 0 : i32
    %c0_i32_1 = arith.constant 0 : i32
    return %c0_i32, %c0_i32_0 : i32, i32
  }
  func.func @transform_3(%arg0: i32) -> (i32, i32) {
    %c0_i32 = arith.constant 0 : i32
    %c0_i32_0 = arith.constant 0 : i32
    %c0_i32_1 = arith.constant 0 : i32
    return %c0_i32, %c0_i32_0 : i32, i32
  }
  func.func @transform_4(%arg0: i32) -> (i32, i32) {
    %c0_i32 = arith.constant 0 : i32
    %c0_i32_0 = arith.constant 0 : i32
    %c0_i32_1 = arith.constant 0 : i32
    return %c0_i32, %c0_i32_0 : i32, i32
  }
  func.func @transform_5(%arg0: i32) -> (i32, i32, i32) {
    %c0_i32 = arith.constant 0 : i32
    %c0_i32_0 = arith.constant 0 : i32
    %c0_i32_1 = arith.constant 0 : i32
    %c0_i32_2 = arith.constant 0 : i32
    return %c0_i32, %c0_i32_0, %c0_i32_1 : i32, i32, i32
  }
  func.func @transform_6(%arg0: i32) -> (i32, i32, i32) {
    %c0_i32 = arith.constant 0 : i32
    %c0_i32_0 = arith.constant 0 : i32
    %c0_i32_1 = arith.constant 0 : i32
    %c0_i32_2 = arith.constant 0 : i32
    return %c0_i32, %c0_i32_0, %c0_i32_1 : i32, i32, i32
  }
  func.func @transform_7(%arg0: i32) -> (i32, i32, i32) {
    %c0_i32 = arith.constant 0 : i32
    %c0_i32_0 = arith.constant 0 : i32
    %c0_i32_1 = arith.constant 0 : i32
    %c0_i32_2 = arith.constant 0 : i32
    return %c0_i32, %c0_i32_0, %c0_i32_1 : i32, i32, i32
  }
  func.func @transform_8(%arg0: i32) -> (i32, i32, i32) {
    %c0_i32 = arith.constant 0 : i32
    %c0_i32_0 = arith.constant 0 : i32
    %c0_i32_1 = arith.constant 0 : i32
    %c0_i32_2 = arith.constant 0 : i32
    return %c0_i32, %c0_i32_0, %c0_i32_1 : i32, i32, i32
  }
  func.func @transform_9(%arg0: i32) -> (i32, i32, i32) {
    %c0_i32 = arith.constant 0 : i32
    %c0_i32_0 = arith.constant 0 : i32
    %c0_i32_1 = arith.constant 0 : i32
    %c0_i32_2 = arith.constant 0 : i32
    return %c0_i32, %c0_i32_0, %c0_i32_1 : i32, i32, i32
  }
  func.func @transform_10(%arg0: i32) -> (i32, i32, i32) {
    %c0_i32 = arith.constant 0 : i32
    %c0_i32_0 = arith.constant 0 : i32
    %c0_i32_1 = arith.constant 0 : i32
    %c0_i32_2 = arith.constant 0 : i32
    return %c0_i32, %c0_i32_0, %c0_i32_1 : i32, i32, i32
  }
  func.func @transform_11(%arg0: i32) -> (i32, i32, i32) {
    %c0_i32 = arith.constant 0 : i32
    %c0_i32_0 = arith.constant 0 : i32
    %c0_i32_1 = arith.constant 0 : i32
    %c0_i32_2 = arith.constant 0 : i32
    return %c0_i32, %c0_i32_0, %c0_i32_1 : i32, i32, i32
  }
  func.func @transform_12(%arg0: i32) -> (i32, i32, i32) {
    %c0_i32 = arith.constant 0 : i32
    %c0_i32_0 = arith.constant 0 : i32
    %c0_i32_1 = arith.constant 0 : i32
    %c0_i32_2 = arith.constant 0 : i32
    return %c0_i32, %c0_i32_0, %c0_i32_1 : i32, i32, i32
  }
  func.func @transform_13(%arg0: i32) -> (i32, i32, i32) {
    %c0_i32 = arith.constant 0 : i32
    %c0_i32_0 = arith.constant 0 : i32
    %c0_i32_1 = arith.constant 0 : i32
    %c0_i32_2 = arith.constant 0 : i32
    return %c0_i32, %c0_i32_0, %c0_i32_1 : i32, i32, i32
  }
  func.func @transform_14(%arg0: i32) -> (i32, i32, i32) {
    %c0_i32 = arith.constant 0 : i32
    %c0_i32_0 = arith.constant 0 : i32
    %c0_i32_1 = arith.constant 0 : i32
    return %arg0, %c0_i32, %c0_i32_0 : i32, i32, i32
  }
}

</mosaic_0001>

<bundles_post_ra>
// kernel: tpu_custom_call.1
= control target key start
LH: loop header
LB: loop body
LE: loop exit
PB: predicated region body
PF: predicated region fallthrough
CT: control target
= control target key end

     0   :  { %19 = vsyncpa [#allocation3], 0  ;;  %s7585_s0 = inlined_call_operand.vmem [shape: s32[2,32,1], index: 0, kind: input, shape index: {}]   ;;  %s7586_s1 = inlined_call_operand.vmem [shape: f32[2,1,32], index: 1, kind: input, shape index: {}]   ;;  %s7587_s2 = inlined_call_operand.vmem [shape: f32[128,32], index: 2, kind: input, shape index: {}]   ;;  %s7588_s3 = inlined_call_operand.vmem [shape: f32[32,32], index: 3, kind: input, shape index: {}]   ;;  %s7589_s4 = inlined_call_operand.vmem [shape: f32[2,32], index: 4, kind: input, shape index: {}]   ;;  %s7590_s5 = inlined_call_operand.vmem [shape: f32[2,32,96], index: 5, kind: input, shape index: {}]   ;;  %s7591_s6 = inlined_call_operand.vmem [shape: f32[2,1,96], index: 6, kind: input, shape index: {}]   ;;  %s7592_s7 = inlined_call_operand.vmem [shape: f32[2,32,32], index: 7, kind: input, shape index: {}]   ;;  %s7593_s8 = inlined_call_operand.vmem [shape: f32[2,1,32], index: 8, kind: input, shape index: {}]   ;;  %s7594_s9 = inlined_call_operand.vmem [shape: f32[2,4,32], index: 9, kind: input, shape index: {}]   ;;  %s7595_s10 = inlined_call_operand.vmem [shape: f32[2,32,64], index: 10, kind: input, shape index: {}]   ;;  %s7596_s11 = inlined_call_operand.vmem [shape: f32[2,1,64], index: 11, kind: input, shape index: {}]   ;;  %s7597_s12 = inlined_call_operand.vmem [shape: f32[2,64,32], index: 12, kind: input, shape index: {}]   ;;  %s7598_s13 = inlined_call_operand.vmem [shape: f32[2,1,32], index: 13, kind: input, shape index: {}]   ;;  %s7599_s14 = inlined_call_operand.hbm [shape: f32[2,32,32], index: 14, kind: output, shape index: {}]  }
   0x1   :  { %21 = vsyncpa [#allocation3 + $0x1], 0  ;;  %s6566_s29 = smov 0   ;;  %s6568_s30 = smov 0  }
   0x2   :  { %s6570_s15 = smov 0   ;;  %s6572_s16 = smov 0  }
   0x3 LB: > { %7622 = sst [smem:[#allocation5_spill]] %s6469_s15  ;;  %s6587_s17 = sadd.s32 4294967295, %s6473_s16   ;;  %s6473_s16 = sphi %s6572_s16, %s7640_s16   ;;  %s6469_s15 = sphi %s6570_s15, %s7645_s15   ;;  %s6465_s30 = sphi %s6568_s30, %s7644_s30   ;;  %s6461_s29 = sphi %s6566_s29, %s7643_s29  }
   0x4   : > { %s4850_s18 = sadd.s32 4294967294, %s6473_s16   ;;  %s6591_s19 = sadd.s32 1, %s6473_s16  }
   0x5   : > { %7623 = sst [smem:[#allocation6_spill]] %s6591_s19  ;;  %s338_s20 = sadd.s32 1, %s6469_s15 }
   0x6   : > { %s335_s21 = ssub.s32 %s6473_s16, %s6591_s19  ;;  %p348_p0 = scmp.ne.s32.totalorder %s6469_s15, %s6465_s30 }
   0x7   : > { %p336_p1 = scmp.eq.s32.totalorder %s335_s21, 0  ;;  %p349_p2 = scmp.eq.s32.totalorder %s6587_s17, 1 }
   0x8   : > { %p354_p3 = scmp.ne.s32.totalorder %s6465_s30, %s6461_s29  ;;  %p355_p4 = scmp.eq.s32.totalorder %s4850_s18, 1 }
   0x9   : > { %s6602_s22 = scalar_select %p336_p1, %s6469_s15, %s338_s20  }
   0xa   : > { %p6604_p5 = por %p349_p2, %p348_p0  ;;  %p6608_p6 = por %p355_p4, %p354_p3 }
   0xb   : > { %7624 = sst [smem:[#allocation7_spill]] %s6602_s22  ;;  %p4853_p7 = scmp.ge.s32.totalorder %s6473_s16, 1 }
   0xc   : > { %s7626_s24 = scalar_select %p6608_p6, 1, 0 }
   0xd   : > { %p423_p8 = scmp.lt.s32.totalorder %s6473_s16, 3 }
   0xe   : > { %7627 = sst [smem:[#allocation8_spill]] %s7626_s24 }
   0xf   : > { %p424_p9 = pnand %p4853_p7, %p423_p8 }
  0x10   : > { %p472_p10 = scmp.lt.s32.totalorder (!%p424_p9), %s6587_s17, 1  ;;  %v511_v0 = vld [vmem:[%s7587_s2] sm:$0xff] (!%p424_p9)  ;;  %v512_v1 = vld [vmem:[%s7587_s2 + $0x8] sm:$0xff] (!%p424_p9)  ;;  %v513_v2 = vld [vmem:[%s7587_s2 + $0x10] sm:$0xff] (!%p424_p9)  ;;  %v6475_v3 = vmov (!%p424_p9), 0   ;;  %v485_v29 = vlaneseq (!%p424_p9)  ;;  %v6476_v33 = vmov (!%p424_p9), 1.0  }
  0x11   : > { %427 = sbr.rel (%p424_p9) target bundleno = 6614 (0x19d6), region = 76  ;;  %6064 = vset.pattern.permute.xlu0 (!%p424_p9), %v6475_v3  ;;  %6065 = vset.pattern.permute.xlu1 (!%p424_p9), %v6475_v3  ;;  %v5730_v4 = vpack.c.bf16 (!%p424_p9), %v512_v1, %v511_v0  ;;  %v514_v5 = vld [vmem:[%s7587_s2 + $0x18] sm:$0xff] (!%p424_p9)  ;;  %v515_v7 = vld [vmem:[%s7587_s2 + $0x20] sm:$0xff] (!%p424_p9)  ;;  %v516_v8 = vld [vmem:[%s7587_s2 + $0x28] sm:$0xff] (!%p424_p9)  ;;  %vm618_vm4 = vcmask (!%p424_p9), 261120   ;;  %vm814_vm5 = vcmask (!%p424_p9), 64512  }
  0x12   : > { %v5734_v6 = vpack.c.bf16 (!%p424_p9), %v514_v5, %v513_v2  ;;  %v5738_v9 = vpack.c.bf16 (!%p424_p9), %v516_v8, %v515_v7  ;;  %v517_v10 = vld [vmem:[%s7587_s2 + $0x30] sm:$0xff] (!%p424_p9)  ;;  %v518_v13 = vld [vmem:[%s7587_s2 + $0x38] sm:$0xff] (!%p424_p9)  ;;  %v519_v17 = vld [vmem:[%s7587_s2 + $0x40] sm:$0xff] (!%p424_p9)  ;;  %v486_v30 = vand.u32 (!%p424_p9), 127, %v485_v29  ;;  %s6477_s25 = smov (!%p424_p9), 96   ;;  %s7620_s26 = smov (!%p424_p9), 88  }
  0x13   : > { %5731 = vmatprep.subr.bf16.mxu0 (!%p424_p9), %v5730_v4  ;;  %v5742_v16 = vpack.c.bf16 (!%p424_p9), %v518_v13, %v517_v10  ;;  %v520_v18 = vld [vmem:[%s7587_s2 + $0x48] sm:$0xff] (!%p424_p9)  ;;  %v521_v20 = vld [vmem:[%s7587_s2 + $0x50] sm:$0xff] (!%p424_p9)  ;;  %v522_v21 = vld [vmem:[%s7587_s2 + $0x58] sm:$0xff] (!%p424_p9)  ;;  %s7618_s19 = smov (!%p424_p9), 120   ;;  %s7616_s27 = smov (!%p424_p9), 80   ;;  %vm2554_vm7 = vcmask (!%p424_p9), 523264  }
  0x14   : > { %5733 = vmatpush3.bf16.msra.mxu0 (!%p424_p9), %v5730_v4  ;;  %v5746_v19 = vpack.c.bf16 (!%p424_p9), %v520_v18, %v519_v17  ;;  %v5750_v22 = vpack.c.bf16 (!%p424_p9), %v522_v21, %v521_v20  ;;  %v523_v23 = vld [vmem:[%s7587_s2 + $0x60] sm:$0xff] (!%p424_p9)  ;;  %v524_v24 = vld [vmem:[%s7587_s2 + $0x68] sm:$0xff] (!%p424_p9)  ;;  %v525_v26 = vld [vmem:[%s7587_s2 + $0x70] sm:$0xff] (!%p424_p9)  ;;  %s7610_s28 = smov (!%p424_p9), 112   ;;  %s6482_s24 = smov (!%p424_p9), 64  }
  0x15   : > { %5735 = vmatprep.subr.bf16.mxu0 (!%p424_p9), %v5734_v6  ;;  %v5754_v25 = vpack.c.bf16 (!%p424_p9), %v524_v24, %v523_v23  ;;  %v526_v27 = vld [vmem:[%s7587_s2 + $0x78] sm:$0xff] (!%p424_p9)  ;;  %v528_v36 = vld [vmem:[%s7588_s3 + $0x8] sm:$0xff] (!%p424_p9)  ;;  %v527_v37 = vld [vmem:[%s7588_s3] sm:$0xff] (!%p424_p9)  ;;  %s7606_s21 = smov (!%p424_p9), 72   ;;  %s7614_s20 = smov (!%p424_p9), 48  }
  0x16   : > { %v5758_v28 = vpack.c.bf16 (!%p424_p9), %v526_v27, %v525_v26  ;;  %v529_v43 = vld [vmem:[%s7588_s3 + $0x10] sm:$0xff] (!%p424_p9)  ;;  %v530_v46 = vld [vmem:[%s7588_s3 + $0x18] sm:$0xff] (!%p424_p9)  ;;  %v688_v8 = vld [vmem:[%s7590_s5] sm:$0xff] (!%p424_p9) }
  0x17   : > { %v4865_v27 = vld [vmem:[%s7589_s4] ss:$0 sm:$0xff] (!%p424_p9)  ;;  %vm6778_vm6 = vmpackc.low (!%p424_p9), %vm814_vm5, %vm814_vm5 }
  0x18   : > { %s6628_s15 = scalar_select %p472_p10, %s6587_s17, 1  ;;  %5737 = vmatpush3.bf16.msra.mxu0 %v5734_v6 }
  0x19   : > { %5739 = vmatprep.subr.bf16.mxu0 %v5738_v9 }
  0x1a   : > { %s5058_s18 = sshll.u32 %s6628_s15, 5 }
  0x1b   : > { %s476_s22 = scalar_lea.vmem %s7585_s0, %s5058_s18  ;;  %s7604_s18 = smov 104  }
  0x1c   : > { %v480_v11 = vld [vmem:[%s476_s22] sm:$0xff]  ;;  %v482_v12 = vld [vmem:[%s476_s22 + $0x10] sm:$0xff]  ;;  %v481_v14 = vld [vmem:[%s476_s22 + $0x8] sm:$0xff]  ;;  %5741 = vmatpush3.bf16.msra.mxu0 %v5738_v9 }
  0x1d   : > { %488 = vperm.xlu0 %6064, %v480_v11   ;;  %494 = vperm.xlu1 %6065, %v482_v12   ;;  %v483_v15 = vld [vmem:[%s476_s22 + $0x18] sm:$0xff]  ;;  %v689_v9 = vld [vmem:[%s7590_s5 + $0x8] sm:$0xff]  ;;  %v690_v11 = vld [vmem:[%s7590_s5 + $0x10] sm:$0xff]  ;;  %s6824_s22 = scalar_lea.vmem %s7586_s1, %s6628_s15  ;;  %s7608_s15 = smov 56  }
  0x1e   : > { %5743 = vmatprep.subr.bf16.mxu0 %v5742_v16  ;;  %v5762_v10 = vpack.c.bf16 %v689_v9, %v688_v8  ;;  %v691_v12 = vld [vmem:[%s7590_s5 + $0x18] sm:$0xff] }
  0x1f   : > { %v5766_v13 = vpack.c.bf16 %v691_v12, %v690_v11 }
  0x20   : > { %5745 = vmatpush3.bf16.msra.mxu0 %v5742_v16  ;;  %5763 = vmatprep.subr.bf16.mxu1 %v5762_v10 }
  0x21   : > { %491 = vperm.xlu0 %6064, %v481_v14   ;;  %497 = vperm.xlu1 %6065, %v483_v15  }
  0x22   : > { %5747 = vmatprep.subr.bf16.mxu0 %v5746_v19  ;;  %5765 = vmatpush3.bf16.msra.mxu1 %v5762_v10 }
  0x23   : > { %5767 = vmatprep.subr.bf16.mxu1 %v5766_v13 }
  0x24   : > { %5749 = vmatpush3.bf16.msra.mxu0 %v5746_v19 }
  0x25   : > { %5751 = vmatprep.subr.bf16.mxu0 %v5750_v22 }
  0x26   : > { %5769 = vmatpush3.bf16.msra.mxu1 %v5766_v13 }
  0x28   : > { %5753 = vmatpush3.bf16.msra.mxu0 %v5750_v22 }
  0x29   : > { %5755 = vmatprep.subr.bf16.mxu0 %v5754_v25 }
  0x2c   : > { %5757 = vmatpush3.bf16.msra.mxu0 %v5754_v25 }
  0x2d   : > { %5759 = vmatprep.subr.bf16.mxu0 %v5758_v28 }
  0x30   : > { %5761 = vmatpush3.bf16.msra.mxu0 %v5758_v28 }
  0x9c   : > { %v489_v31 = vpop.permute.xlu0 %488  ;;  %v495_v32 = vpop.permute.xlu1 %494 }
  0x9d   : > { %vm499_vm0 = vcmp.eq.s32.totalorder %v489_v31, %v486_v30  ;;  %vm501_vm1 = vcmp.eq.s32.totalorder %v495_v32, %v486_v30  ;;  %v4866_v32 = vld [vmem:[%s7589_s4 + $0x1] ss:$0 sm:$0xff] }
  0x9e   : > { %5336 = vmatprep.mubr.msk.f32.mxu0 %vm499_vm0, %v6476_v33 }
  0xa0   : > { %v492_v34 = vpop.permute.xlu0 %491  ;;  %v498_v35 = vpop.permute.xlu1 %497 }
  0xa1   : > { %vm500_vm2 = vcmp.eq.s32.totalorder %v492_v34, %v486_v30  ;;  %vm502_vm3 = vcmp.eq.s32.totalorder %v498_v35, %v486_v30 }
  0xa2   : > { %5337 = vmatmul.mubr.msk.f32.vlgmr.msra.gmra.mrb[0].mxu0 %vm500_vm2, %v6476_v33 }
  0xa3   : > { %5339 = vmatprep.mubr.msk.f32.mxu0 %vm501_vm1, %v6476_v33 }
  0xa6   : > { %5340 = vmatmul.mubr.msk.f32.gmra.mrb[2].mxu0 %vm502_vm3, %v6476_v33 }
 0x175   : > { %v5338_v38 = vpop.f32.mrb[0].mxu0 }
 0x176   : > { %v603_v39 = vadd.f32 %v5338_v38, %v528_v36  ;;  %v597_v40 = vpop.f32.mrb[1].mxu0 }
 0x177   : > { %v598_v41 = vadd.f32 %v597_v40, %v527_v37 }
 0x178   : > { %v622_v42 = vsel %vm618_vm4, %v603_v39, 0.0 }
 0x179   : > { %623 = vadd.xlane.f32.xlu1 %v622_v42  ;;  %v5341_v44 = vpop.f32.mrb[2].mxu0  ;;  %v619_v45 = vsel %vm618_vm4, %v598_v41, 0.0 }
 0x17a   : > { %v607_v47 = vpop.f32.mrb[3].mxu0  ;;  %620 = vadd.xlane.f32.xlu0 %v619_v45  ;;  %v613_v49 = vadd.f32 %v5341_v44, %v530_v46  ;;  %v4867_v45 = vld [vmem:[%s7591_s6] ss:$0 sm:$0xff] }
 0x17b   : > { %v608_v48 = vadd.f32 %v607_v47, %v529_v43 }
 0x17c   : > { %v628_v51 = vsel %vm618_vm4, %v613_v49, 0.0 }
 0x17d   : > { %v625_v50 = vsel %vm618_vm4, %v608_v48, 0.0 }
 0x17e   : > { %626 = vadd.xlane.f32.xlu0 %v625_v50 }
 0x182   : > { %629 = vadd.xlane.f32.xlu0 %v628_v51 }
 0x206   : > { %v624_v52 = vpop.xlane.xlu1 %623 }
 0x207   : > { %v633_v53 = vmul.f32 0.03125, %v624_v52  ;;  %v621_v54 = vpop.xlane.xlu0 %620 }
 0x208   : > { %v632_v55 = vmul.f32 0.03125, %v621_v54 }
 0x209   : > { %v637_v56 = vsub.f32 %v603_v39, %v633_v53 }
 0x20a   : > { %v636_v57 = vsub.f32 %v598_v41, %v632_v55 }
 0x20b   : > { %v627_v58 = vpop.xlane.xlu0 %626  ;;  %v641_v59 = vmul.f32 %v637_v56, %v637_v56 }
 0x20c   : > { %v634_v60 = vmul.f32 0.03125, %v627_v58  ;;  %v640_v61 = vmul.f32 %v636_v57, %v636_v57 }
 0x20d   : > { %v647_v62 = vsel %vm618_vm4, %v641_v59, 0.0 }
 0x20e   : > { %v638_v63 = vsub.f32 %v608_v48, %v634_v60  ;;  %648 = vadd.xlane.f32.xlu0 %v647_v62  ;;  %v644_v0 = vsel %vm618_vm4, %v640_v61, 0.0 }
 0x20f   : > { %645 = vadd.xlane.f32.xlu1 %v644_v0  ;;  %v630_v1 = vpop.xlane.xlu0 %629 }
 0x210   : > { %v635_v2 = vmul.f32 0.03125, %v630_v1  ;;  %v642_v3 = vmul.f32 %v638_v63, %v638_v63 }
 0x212   : > { %v639_v4 = vsub.f32 %v613_v49, %v635_v2  ;;  %v650_v5 = vsel %vm618_vm4, %v642_v3, 0.0 }
 0x213   : > { %651 = vadd.xlane.f32.xlu1 %v650_v5 }
 0x214   : > { %v643_v6 = vmul.f32 %v639_v4, %v639_v4 }
 0x216   : > { %v653_v7 = vsel %vm618_vm4, %v643_v6, 0.0 }
 0x217   : > { %654 = vadd.xlane.f32.xlu0 %v653_v7 }
 0x29b   : > { %v649_v14 = vpop.xlane.xlu0 %648 }
 0x29c   : > { %v657_v15 = vmul.f32 0.03125, %v649_v14  ;;  %v646_v16 = vpop.xlane.xlu1 %645 }
 0x29d   : > { %v656_v17 = vmul.f32 0.03125, %v646_v16 }
 0x29e   : > { %v661_v18 = vadd.f32 1e-12, %v657_v15 }
 0x29f   : > { %v660_v19 = vadd.f32 1e-12, %v656_v17 }
 0x2a0   : > { %6226 = vrsqrt.f32 %v661_v18  ;;  %v652_v20 = vpop.xlane.xlu1 %651 }
 0x2a1   : > { %6228 = vrsqrt.f32 %v660_v19  ;;  %v658_v21 = vmul.f32 0.03125, %v652_v20 }
 0x2a3   : > { %v662_v22 = vadd.f32 1e-12, %v658_v21 }
 0x2a4   : > { %v655_v23 = vpop.xlane.xlu0 %654 }
 0x2a5   : > { %6230 = vrsqrt.f32 %v662_v22  ;;  %v659_v24 = vmul.f32 0.03125, %v655_v23 }
 0x2a7   : > { %v663_v25 = vadd.f32 1e-12, %v659_v24 }
 0x2a9   : > { %6232 = vrsqrt.f32 %v663_v25 }
 0x2aa   : > { %v6227_v26 = vpop.eup %6226 }
 0x2ab   : > { %v6229_v28 = vpop.eup %6228  ;;  %v669_v30 = vmul.f32 %v6227_v26, %v637_v56 }
 0x2ac   : > { %v668_v31 = vmul.f32 %v6229_v28, %v636_v57 }
 0x2ad   : > { %v677_v33 = vmul.f32 %v4865_v27, %v669_v30  ;;  %v6827_v30 = vld [vmem:[%s6824_s22] ss:$0 sm:$0xff] }
 0x2ae   : > { %v676_v34 = vmul.f32 %v4865_v27, %v668_v31 }
 0x2af   : > { %v6231_v35 = vpop.eup %6230  ;;  %v6711_v38 = vadd.f32 %v4866_v32, %v677_v33 }
 0x2b0   : > { %v6709_v36 = vadd.f32 %v4866_v32, %v676_v34  ;;  %v670_v37 = vmul.f32 %v6231_v35, %v638_v63 }
 0x2b2   : > { %5350 = vmatprep.mubr.msk.f32.mxu1 %vm618_vm4, %v6709_v36  ;;  %v678_v39 = vmul.f32 %v4865_v27, %v670_v37 }
 0x2b3   : > { %v6233_v40 = vpop.eup %6232  ;;  %5351 = vmatmul.mubr.msk.f32.vlgmr.msra.gmra.mrb[0].mxu1 %vm618_vm4, %v6711_v38 }
 0x2b4   : > { %v6717_v41 = vadd.f32 %v4866_v32, %v678_v39  ;;  %v671_v42 = vmul.f32 %v6233_v40, %v639_v4 }
 0x2b6   : > { %5353 = vmatprep.mubr.msk.f32.mxu1 %vm618_vm4, %v6717_v41  ;;  %v679_v43 = vmul.f32 %v4865_v27, %v671_v42 }
 0x2b8   : > { %v6721_v44 = vadd.f32 %v4866_v32, %v679_v43 }
 0x2ba   : > { %5354 = vmatmul.mubr.msk.f32.gmra.mrb[2].mxu1 %vm618_vm4, %v6721_v44 }
 0x386   : > { %v5352_v46 = vpop.f32.mrb[0].mxu1 }
 0x387   : > { %v6728_v47 = vadd.f32 %v5352_v46, %v4867_v45  ;;  %v783_v48 = vpop.f32.mrb[1].mxu1 }
 0x388   : > { %v6730_v49 = vadd.f32 %v4867_v45, %v783_v48 }
 0x38a   : > { %5364 = vmatprep.mubr.msk.f32.mxu1 %vm814_vm5, %v6730_v49  ;;  %v6736_v50 = vpack.i.bf16 %v6728_v47, %v6730_v49 }
 0x38c   : > { %6067 = vrot.lane.b32.xlu1 %v6736_v50, %s6477_s25 }
 0x38d   : > { %v5355_v51 = vpop.f32.mrb[2].mxu1 }
 0x38e   : > { %v6740_v52 = vadd.f32 %v5355_v51, %v4867_v45  ;;  %v793_v53 = vpop.f32.mrb[3].mxu1 }
 0x38f   : > { %v6742_v54 = vadd.f32 %v4867_v45, %v793_v53 }
 0x390   : > { %6077 = vrot.lane.b32.xlu1 %v6736_v50, %s7620_s26 }
 0x391   : > { %v6748_v55 = vpack.i.bf16 %v6740_v52, %v6742_v54 }
 0x393   : > { %6072 = vrot.lane.b32.xlu0 %v6748_v55, %s6477_s25 }
 0x394   : > { %6082 = vrot.lane.b32.xlu1 %v6748_v55, %s7620_s26  ;;  %s7632_s26 = smov 80  }
 0x397   : > { %1083 = vrot.lane.b32.xlu0 %v6730_v49, %s7618_s19 }
 0x398   : > { %1085 = vrot.lane.b32.xlu1 %v6728_v47, %s7618_s19 }
 0x39b   : > { %1087 = vrot.lane.b32.xlu0 %v6742_v54, %s7618_s19 }
 0x39c   : > { %1089 = vrot.lane.b32.xlu1 %v6740_v52, %s7618_s19  ;;  %s7633_s19 = smov 112  }
 0x39f   : > { %6087 = vrot.lane.b32.xlu0 %v6736_v50, %s7616_s27 }
 0x3a0   : > { %1557 = vrot.lane.b32.xlu1 %v6728_v47, %s7610_s28 }
 0x3a3   : > { %1555 = vrot.lane.b32.xlu0 %v6730_v49, %s7610_s28 }
 0x3a4   : > { %1561 = vrot.lane.b32.xlu1 %v6740_v52, %s7610_s28 }
 0x3a7   : > { %1559 = vrot.lane.b32.xlu0 %v6742_v54, %s7610_s28  ;;  %s7612_s28 = smov 40  }
 0x3a8   : > { %6092 = vrot.lane.b32.xlu1 %v6736_v50, %s6482_s24 }
 0x3ac   : > { %6097 = vrot.lane.b32.xlu1 %v6748_v55, %s7616_s27  ;;  %s7635_s27 = smov 72  }
 0x3fe   : > { %v6068_v56 = vpop.permute.xlu1 %6067 }
 0x3ff   : > { %v6070_v57 = vunpack.i.h.bf16 %v6068_v56  ;;  %v6069_v58 = vunpack.i.l.bf16 %v6068_v56 }
 0x401   : > { %v5770_v60 = vpack.c.bf16 %v6070_v57, %v6069_v58 }
 0x402   : > { %v6078_v61 = vpop.permute.xlu1 %6077 }
 0x403   : > { %v6080_v62 = vunpack.i.h.bf16 %v6078_v61  ;;  %v6079_v63 = vunpack.i.l.bf16 %v6078_v61  ;;  %5772 = vmatprep.subr.msk.bf16.mxu1 %vm6778_vm6, %v5770_v60 }
 0x404   : > { %5775 = vmatpush3.bf16.xpose.msk.msra.mxu1 %vm6778_vm6, %v5770_v60 }
 0x405   : > { %v5790_v0 = vpack.c.bf16 %v6080_v62, %v6079_v63  ;;  %v6073_v1 = vpop.permute.xlu0 %6072 }
 0x406   : > { %v6075_v2 = vunpack.i.h.bf16 %v6073_v1  ;;  %v6074_v3 = vunpack.i.l.bf16 %v6073_v1  ;;  %v6083_v4 = vpop.permute.xlu1 %6082 }
 0x407   : > { %v6085_v5 = vunpack.i.h.bf16 %v6083_v4  ;;  %v6084_v6 = vunpack.i.l.bf16 %v6083_v4  ;;  %5792 = vmatprep.subr.msk.bf16.mxu0 %vm6778_vm6, %v5790_v0 }
 0x408   : > { %v5776_v7 = vpack.c.bf16 %v6075_v2, %v6074_v3  ;;  %5795 = vmatpush3.bf16.xpose.msk.msra.mxu0 %vm6778_vm6, %v5790_v0 }
 0x409   : > { %v5796_v8 = vpack.c.bf16 %v6085_v5, %v6084_v6  ;;  %v1084_v9 = vpop.permute.xlu0 %1083 }
 0x40a   : > { %v1086_v10 = vpop.permute.xlu1 %1085  ;;  %5778 = vmatprep.subr.msk.bf16.mxu1 %vm6778_vm6, %v5776_v7  ;;  %5392 = vmatprep.mubr.msk.f32.mxu0 %vm814_vm5, %v1084_v9 }
 0x40b   : > { %5798 = vmatprep.subr.msk.bf16.mxu0 %vm6778_vm6, %v5796_v8 }
 0x40c   : > { %5781 = vmatpush3.bf16.xpose.msk.msra.mxu1 %vm6778_vm6, %v5776_v7 }
 0x40d   : > { %v1088_v11 = vpop.permute.xlu0 %1087 }
 0x40e   : > { %v1090_v12 = vpop.permute.xlu1 %1089 }
 0x410   : > { %5801 = vmatpush3.bf16.xpose.msk.msra.mxu0 %vm6778_vm6, %v5796_v8 }
 0x411   : > { %v6088_v13 = vpop.permute.xlu0 %6087 }
 0x412   : > { %v6090_v14 = vunpack.i.h.bf16 %v6088_v13  ;;  %v6089_v15 = vunpack.i.l.bf16 %v6088_v13  ;;  %v1558_v16 = vpop.permute.xlu1 %1557 }
 0x413   : > { %5365 = vmatmul.mubr.msk.f32.vlgmr.msra.gmra.mrb[4].mxu1 %vm814_vm5, %v6728_v47 }
 0x414   : > { %v5810_v17 = vpack.c.bf16 %v6090_v14, %v6089_v15  ;;  %5367 = vmatprep.mubr.msk.f32.mxu1 %vm814_vm5, %v6742_v54 }
 0x415   : > { %v1556_v20 = vpop.permute.xlu0 %1555 }
 0x416   : > { %v1562_v18 = vpop.permute.xlu1 %1561  ;;  %5812 = vmatprep.subr.msk.bf16.mxu0 %vm6778_vm6, %v5810_v17 }
 0x417   : > { %5368 = vmatmul.mubr.msk.f32.gmra.mrb[6].mxu1 %vm814_vm5, %v6740_v52  ;;  %5393 = vmatmul.mubr.msk.f32.vlgmr.msra.gmra.mrb[4].mxu0 %vm814_vm5, %v1086_v10 }
 0x418   : > { %5395 = vmatprep.mubr.msk.f32.mxu0 %vm814_vm5, %v1088_v11  ;;  %5815 = vmatpush3.bf16.xpose.msk.msra.mxu0 %vm6778_vm6, %v5810_v17 }
 0x419   : > { %v1560_v28 = vpop.permute.xlu0 %1559 }
 0x41a   : > { %v6093_v19 = vpop.permute.xlu1 %6092 }
 0x41b   : > { %v6095_v21 = vunpack.i.h.bf16 %v6093_v19  ;;  %v6094_v22 = vunpack.i.l.bf16 %v6093_v19  ;;  %5396 = vmatmul.mubr.msk.f32.gmra.mrb[6].mxu0 %vm814_vm5, %v1090_v12 }
 0x41c   : > { %5436 = vmatprep.mubr.msk.f32.mxu0 %vm814_vm5, %v1556_v20 }
 0x41d   : > { %v5782_v23 = vpack.c.bf16 %v6095_v21, %v6094_v22 }
 0x41e   : > { %v6098_v24 = vpop.permute.xlu1 %6097 }
 0x41f   : > { %v6100_v25 = vunpack.i.h.bf16 %v6098_v24  ;;  %v6099_v26 = vunpack.i.l.bf16 %v6098_v24  ;;  %5783 = vmatprep.subr.bf16.mxu1 %v5782_v23 }
 0x420   : > { %5785 = vmatpush3.bf16.msra.mxu1 %v5782_v23 }
 0x421   : > { %v5816_v27 = vpack.c.bf16 %v6100_v25, %v6099_v26 }
 0x423   : > { %5818 = vmatprep.subr.msk.bf16.mxu0 %vm6778_vm6, %v5816_v27 }
 0x424   : > { %5821 = vmatpush3.bf16.xpose.msk.msra.mxu0 %vm6778_vm6, %v5816_v27 }
 0x42b   : > { %5437 = vmatmul.mubr.msk.f32.vlgmr.msra.gmra.mrb[8].mxu0 %vm814_vm5, %v1558_v16 }
 0x42c   : > { %5439 = vmatprep.mubr.msk.f32.mxu0 %vm814_vm5, %v1560_v28 }
 0x42f   : > { %5440 = vmatmul.mubr.msk.f32.gmra.mrb[10].mxu0 %vm814_vm5, %v1562_v18 }
 0x4e6   : > { %v5366_v31 = vpop.f32.mrb[4].mxu1 }
 0x4e7   : > { %v917_v32 = vmul.f32 0.35355338, %v5366_v31  ;;  %v897_v33 = vpop.f32.mrb[5].mxu1 }
 0x4e8   : > { %v916_v39 = vmul.f32 0.35355338, %v897_v33 }
 0x4e9   : > { %v6830_v34 = vadd.f32 %v6827_v30, %v917_v32 }
 0x4ea   : > { %v5369_v35 = vpop.f32.mrb[6].mxu1  ;;  %v5394_v37 = vpop.f32.mrb[4].mxu0  ;;  %v6841_v60 = vadd.f32 %v6827_v30, %v916_v39 }
 0x4eb   : > { %v1201_v40 = vmul.f32 0.35355338, %v5394_v37  ;;  %v907_v42 = vpop.f32.mrb[7].mxu1  ;;  %v1181_v43 = vpop.f32.mrb[5].mxu0  ;;  %v933_v46 = vsel %vm618_vm4, %v6830_v34, -inf }
 0x4ec   : > { %v1200_v45 = vmul.f32 0.35355338, %v1181_v43  ;;  %934 = vmax.xlane.f32.xlu1 %v933_v46  ;;  %v919_v56 = vmul.f32 0.35355338, %v5369_v35  ;;  %v930_v63 = vsel %vm618_vm4, %v6841_v60, -inf }
 0x4ed   : > { %v6835_v48 = vadd.f32 %v6827_v30, %v1201_v40  ;;  %v918_v1 = vmul.f32 0.35355338, %v907_v42 }
 0x4ee   : > { %v5397_v51 = vpop.f32.mrb[6].mxu0  ;;  %v1204_v53 = vadd.f32 %v6827_v30, %v1200_v45  ;;  %v6847_v0 = vadd.f32 %v6827_v30, %v919_v56 }
 0x4ef   : > { %v1191_v57 = vpop.f32.mrb[7].mxu0  ;;  %v1211_v58 = vsel %vm618_vm4, %v6835_v48, -inf  ;;  %v1203_v62 = vmul.f32 0.35355338, %v5397_v51  ;;  %v6857_v5 = vadd.f32 %v6827_v30, %v918_v1 }
 0x4f0   : > { %1212 = vmax.xlane.f32.xlu0 %v1211_v58  ;;  %v1208_v61 = vsel %vm618_vm4, %v1204_v53, -inf  ;;  %v939_v2 = vsel %vm618_vm4, %v6847_v0, -inf  ;;  %v1202_v11 = vmul.f32 0.35355338, %v1191_v57 }
 0x4f1   : > { %1209 = vmax.xlane.f32.xlu1 %v1208_v61  ;;  %v6852_v3 = vadd.f32 %v6827_v30, %v1203_v62  ;;  %v936_v8 = vsel %vm618_vm4, %v6857_v5, -inf }
 0x4f2   : > { %v6872_v12 = vadd.f32 %v6827_v30, %v1202_v11 }
 0x4f3   : > { %v1217_v4 = vsel %vm618_vm4, %v6852_v3, -inf }
 0x4f4   : > { %931 = vmax.xlane.f32.xlu0 %v930_v63  ;;  %v1214_v13 = vsel %vm618_vm4, %v6872_v12, -inf }
 0x4f8   : > { %940 = vmax.xlane.f32.xlu0 %v939_v2 }
 0x4fc   : > { %1218 = vmax.xlane.f32.xlu0 %v1217_v4 }
 0x4fe   : > { %v5438_v6 = vpop.f32.mrb[8].mxu0 }
 0x4ff   : > { %v1653_v7 = vpop.f32.mrb[9].mxu0  ;;  %v1673_v14 = vmul.f32 0.35355338, %v5438_v6 }
 0x500   : > { %937 = vmax.xlane.f32.xlu0 %v936_v8 }
 0x501   : > { %v6883_v15 = vadd.f32 %v6827_v30, %v1673_v14 }
 0x502   : > { %v6861_v9 = vpop.f32.mrb[10].mxu0  ;;  %6107 = vrot.lane.b32.xlu1 %v6736_v50, %s7608_s15 }
 0x503   : > { %v1663_v10 = vpop.f32.mrb[11].mxu0 }
 0x504   : > { %v1674_v16 = vmul.f32 0.35355338, %v1663_v10 }
 0x506   : > { %v6897_v19 = vadd.f32 %v6827_v30, %v1674_v16 }
 0x516   : > { %6102 = vrot.lane.b32.xlu0 %v6748_v55, %s6482_s24 }
 0x51a   : > { %6117 = vrot.lane.b32.xlu0 %v6736_v50, %s7606_s21 }
 0x51e   : > { %1934 = vrot.lane.b32.xlu0 %v6730_v49, %s7604_s18  ;;  %v1683_v49 = vsel %vm618_vm4, %v6883_v15, -inf }
 0x522   : > { %1938 = vrot.lane.b32.xlu0 %v6742_v54, %s7604_s18  ;;  %v1672_v54 = vmul.f32 0.35355338, %v1653_v7 }
 0x524   : > { %v6892_v17 = vadd.f32 %v6827_v30, %v1672_v54 }
 0x526   : > { %1215 = vmax.xlane.f32.xlu1 %v1214_v13  ;;  %v1680_v18 = vsel %vm618_vm4, %v6892_v17, -inf }
 0x537   : > { %6112 = vrot.lane.b32.xlu1 %v6748_v55, %s7608_s15 }
 0x53b   : > { %6122 = vrot.lane.b32.xlu1 %v6748_v55, %s7606_s21 }
 0x53f   : > { %1936 = vrot.lane.b32.xlu1 %v6728_v47, %s7604_s18  ;;  %v1686_v47 = vsel %vm618_vm4, %v6897_v19, -inf }
 0x541   : > { %1684 = vmax.xlane.f32.xlu0 %v1683_v49 }
 0x543   : > { %1940 = vrot.lane.b32.xlu1 %v6740_v52, %s7604_s18 }
 0x567   : > { %1681 = vmax.xlane.f32.xlu1 %v1680_v18 }
 0x56b   : > { %1687 = vmax.xlane.f32.xlu1 %v1686_v47 }
 0x579   : > { %v935_v20 = vpop.xlane.xlu1 %934 }
 0x57a   : > { %v943_v21 = vsub.f32 %v6830_v34, %v935_v20 }
 0x57c   : > { %v948_v52 = vmul.f32 1.442695, %v943_v21 }
 0x57d   : > { %v1213_v22 = vpop.xlane.xlu0 %1212 }
 0x57e   : > { %v1221_v23 = vsub.f32 %v6835_v48, %v1213_v22  ;;  %v1210_v24 = vpop.xlane.xlu1 %1209  ;;  %6234 = vpow2.f32 %v948_v52 }
 0x57f   : > { %v1220_v25 = vsub.f32 %v1204_v53, %v1210_v24 }
 0x580   : > { %v1226_v26 = vmul.f32 1.442695, %v1221_v23 }
 0x581   : > { %v1224_v27 = vmul.f32 1.442695, %v1220_v25  ;;  %v932_v28 = vpop.xlane.xlu0 %931 }
 0x582   : > { %6236 = vpow2.f32 %v1226_v26  ;;  %v942_v31 = vsub.f32 %v6841_v60, %v932_v28  ;;  %v6108_v53 = vpop.permute.xlu1 %6107  ;;  %v1675_v28 = vmul.f32 0.35355338, %v6861_v9 }
 0x583   : > { %6238 = vpow2.f32 %v1224_v27  ;;  %v6110_v61 = vunpack.i.h.bf16 %v6108_v53 }
 0x584   : > { %v946_v32 = vmul.f32 1.442695, %v942_v31 }
 0x585   : > { %v941_v33 = vpop.xlane.xlu0 %940 }
 0x586   : > { %6240 = vpow2.f32 %v946_v32  ;;  %v945_v35 = vsub.f32 %v6847_v0, %v941_v33  ;;  %v6109_v0 = vunpack.i.l.bf16 %v6108_v53  ;;  %v6940_v32 = vadd.f32 %v6827_v30, %v1675_v28 }
 0x588   : > { %v6235_v34 = vpop.eup %6234  ;;  %v952_v43 = vmul.f32 1.442695, %v945_v35  ;;  %v5802_v7 = vpack.c.bf16 %v6110_v61, %v6109_v0  ;;  %v1689_v33 = vsel %vm618_vm4, %v6940_v32, -inf }
 0x589   : > { %v1219_v37 = vpop.xlane.xlu0 %1218  ;;  %v957_v40 = vsel %vm618_vm4, %v6235_v34, 0.0 }
 0x58a   : > { %v1223_v39 = vsub.f32 %v6852_v3, %v1219_v37  ;;  %958 = vadd.xlane.f32.xlu0 %v957_v40  ;;  %v694_v37 = vld [vmem:[%s7592_s7 + $0x8] sm:$0xff] }
 0x58c   : > { %v6907_v42 = vpop.eup %6236  ;;  %v1230_v45 = vmul.f32 1.442695, %v1223_v39  ;;  %v693_v39 = vld [vmem:[%s7592_s7] sm:$0xff] }
 0x58d   : > { %v6239_v46 = vpop.eup %6238  ;;  %v938_v48 = vpop.xlane.xlu0 %937  ;;  %v1235_v51 = vsel %vm618_vm4, %v6907_v42, 0.0 }
 0x58e   : > { %6242 = vpow2.f32 %v1230_v45  ;;  %v944_v56 = vsub.f32 %v6857_v5, %v938_v48  ;;  %1236 = vadd.xlane.f32.xlu1 %v1235_v51  ;;  %v1232_v57 = vsel %vm618_vm4, %v6239_v46, 0.0 }
 0x58f   : > { %1233 = vadd.xlane.f32.xlu0 %v1232_v57  ;;  %6244 = vpow2.f32 %v952_v43 }
 0x590   : > { %v6241_v58 = vpop.eup %6240  ;;  %v950_v60 = vmul.f32 1.442695, %v944_v56 }
 0x591   : > { %5378 = vmatprep.mubr.msk.f32.mxu1 %vm618_vm4, %v6241_v58  ;;  %v6103_v62 = vpop.permute.xlu0 %6102  ;;  %v954_v63 = vsel %vm618_vm4, %v6241_v58, 0.0 }
 0x592   : > { %6246 = vpow2.f32 %v950_v60  ;;  %v6105_v1 = vunpack.i.h.bf16 %v6103_v62  ;;  %v6104_v2 = vunpack.i.l.bf16 %v6103_v62  ;;  %955 = vadd.xlane.f32.xlu1 %v954_v63 }
 0x594   : > { %v5786_v3 = vpack.c.bf16 %v6105_v1, %v6104_v2 }
 0x595   : > { %v6118_v4 = vpop.permute.xlu0 %6117 }
 0x596   : > { %v6120_v5 = vunpack.i.h.bf16 %v6118_v4  ;;  %v6119_v6 = vunpack.i.l.bf16 %v6118_v4  ;;  %5787 = vmatprep.subr.bf16.mxu1 %v5786_v3 }
 0x597   : > { %5789 = vmatpush3.bf16.msra.mxu1 %v5786_v3 }
 0x598   : > { %v6243_v8 = vpop.eup %6242  ;;  %v5830_v10 = vpack.c.bf16 %v6120_v5, %v6119_v6  ;;  %5803 = vmatprep.subr.bf16.mxu1 %v5802_v7 }
 0x599   : > { %v1935_v11 = vpop.permute.xlu0 %1934  ;;  %v1241_v13 = vsel %vm618_vm4, %v6243_v8, 0.0  ;;  %v6245_v14 = vpop.eup %6244 }
 0x59a   : > { %1242 = vadd.xlane.f32.xlu0 %v1241_v13  ;;  %5379 = vmatmul.mubr.msk.f32.vlgmr.msra.gmra.mrb[8].mxu1 %vm618_vm4, %v6235_v34  ;;  %v963_v54 = vsel %vm618_vm4, %v6245_v14, 0.0 }
 0x59b   : > { %5832 = vmatprep.subr.msk.bf16.mxu0 %vm6778_vm6, %v5830_v10  ;;  %5472 = vmatprep.mubr.msk.f32.mxu0 %vm814_vm5, %v1935_v11 }
 0x59c   : > { %v6247_v49 = vpop.eup %6246  ;;  %5805 = vmatpush3.bf16.msra.mxu1 %v5802_v7  ;;  %5835 = vmatpush3.bf16.xpose.msk.msra.mxu0 %vm6778_vm6, %v5830_v10 }
 0x59d   : > { %5381 = vmatprep.mubr.msk.f32.mxu1 %vm618_vm4, %v6247_v49  ;;  %v960_v16 = vsel %vm618_vm4, %v6247_v49, 0.0  ;;  %v1939_v35 = vpop.permute.xlu0 %1938 }
 0x59e   : > { %964 = vadd.xlane.f32.xlu0 %v963_v54  ;;  %961 = vadd.xlane.f32.xlu1 %v960_v16 }
 0x59f   : > { %5382 = vmatmul.mubr.msk.f32.gmra.mrb[10].mxu1 %vm618_vm4, %v6245_v14 }
 0x5a0   : > { %5406 = vmatprep.mubr.msk.f32.mxu1 %vm618_vm4, %v6239_v46 }
 0x5af   : > { %6127 = vrot.lane.b32.xlu1 %v6736_v50, %s7614_s20 }
 0x5b3   : > { %v1216_v18 = vpop.xlane.xlu1 %1215 }
 0x5b4   : > { %v1222_v47 = vsub.f32 %v6872_v12, %v1216_v18 }
 0x5b6   : > { %v1228_v20 = vmul.f32 1.442695, %v1222_v47 }
 0x5b7   : > { %v6113_v21 = vpop.permute.xlu1 %6112 }
 0x5b8   : > { %6248 = vpow2.f32 %v1228_v20  ;;  %v6115_v52 = vunpack.i.h.bf16 %v6113_v21  ;;  %v6114_v22 = vunpack.i.l.bf16 %v6113_v21 }
 0x5ba   : > { %v5806_v23 = vpack.c.bf16 %v6115_v52, %v6114_v22 }
 0x5bb   : > { %v6123_v24 = vpop.permute.xlu1 %6122 }
 0x5bc   : > { %v6125_v25 = vunpack.i.h.bf16 %v6123_v24  ;;  %v6124_v26 = vunpack.i.l.bf16 %v6123_v24  ;;  %5807 = vmatprep.subr.bf16.mxu1 %v5806_v23 }
 0x5bd   : > { %5809 = vmatpush3.bf16.msra.mxu1 %v5806_v23 }
 0x5be   : > { %v5836_v27 = vpack.c.bf16 %v6125_v25, %v6124_v26  ;;  %5412 = vmatprep.subr.mxu1 %v694_v37 }
 0x5bf   : > { %v1937_v9 = vpop.permute.xlu1 %1936 }
 0x5c0   : > { %5407 = vmatmul.mubr.msk.f32.vlgmr.msra.gmra.mrb[12].mxu1 %vm618_vm4, %v6907_v42  ;;  %5838 = vmatprep.subr.msk.bf16.mxu0 %vm6778_vm6, %v5836_v27 }
 0x5c1   : > { %5841 = vmatpush3.bf16.xpose.msk.msra.mxu0 %vm6778_vm6, %v5836_v27  ;;  %5413 = vmatpush3.msra.mxu1 %v694_v37 }
 0x5c2   : > { %v6249_v12 = vpop.eup %6248  ;;  %5420 = vmatprep.subr.mxu1 %v693_v39 }
 0x5c3   : > { %5409 = vmatprep.mubr.msk.f32.mxu1 %vm618_vm4, %v6249_v12  ;;  %v1238_v31 = vsel %vm618_vm4, %v6249_v12, 0.0  ;;  %v1941_v34 = vpop.permute.xlu1 %1940 }
 0x5c4   : > { %1239 = vadd.xlane.f32.xlu0 %v1238_v31  ;;  %5410 = vmatmul.mubr.msk.f32.gmra.mrb[14].mxu1 %vm618_vm4, %v6243_v8 }
 0x5c8   : > { %1690 = vmax.xlane.f32.xlu0 %v1689_v33  ;;  %5473 = vmatmul.mubr.msk.f32.vlgmr.msra.gmra.mrb[12].mxu0 %vm814_vm5, %v1937_v9 }
 0x5c9   : > { %5475 = vmatprep.mubr.msk.f32.mxu0 %vm814_vm5, %v1939_v35 }
 0x5cc   : > { %5476 = vmatmul.mubr.msk.f32.gmra.mrb[14].mxu0 %vm814_vm5, %v1941_v34 }
 0x5ce   : > { %v1685_v45 = vpop.xlane.xlu0 %1684 }
 0x5cf   : > { %v1693_v1 = vsub.f32 %v6883_v15, %v1685_v45 }
 0x5d1   : > { %v1698_v13 = vmul.f32 1.442695, %v1693_v1 }
 0x5de   : > { %6132 = vrot.lane.b32.xlu0 %v6748_v55, %s7614_s20  ;;  %s7636_s20 = smov 104  }
 0x5f4   : > { %v1682_v48 = vpop.xlane.xlu1 %1681 }
 0x5f5   : > { %v1692_v2 = vsub.f32 %v6892_v17, %v1682_v48 }
 0x5f7   : > { %v1696_v54 = vmul.f32 1.442695, %v1692_v2 }
 0x5f8   : > { %v1688_v53 = vpop.xlane.xlu1 %1687 }
 0x5f9   : > { %v1694_v14 = vsub.f32 %v6897_v19, %v1688_v53 }
 0x5fb   : > { %v1700_v19 = vmul.f32 1.442695, %v1694_v14 }
 0x617   : > { %v959_v51 = vpop.xlane.xlu0 %958 }
 0x61b   : > { %v1237_v57 = vpop.xlane.xlu1 %1236 }
 0x61c   : > { %v1234_v56 = vpop.xlane.xlu0 %1233 }
 0x61d   : > { %6250 = vrcp.f32 %v1234_v56 }
 0x61e   : > { %6252 = vrcp.f32 %v1237_v57 }
 0x61f   : > { %v956_v60 = vpop.xlane.xlu1 %955 }
 0x627   : > { %v1243_v58 = vpop.xlane.xlu0 %1242  ;;  %v6251_v5 = vpop.eup %6250 }
 0x628   : > { %v6253_v10 = vpop.eup %6252 }
 0x62b   : > { %v965_v61 = vpop.xlane.xlu0 %964  ;;  %v962_v62 = vpop.xlane.xlu1 %961 }
 0x62f   : > { %v6128_v0 = vpop.permute.xlu1 %6127 }
 0x630   : > { %v6130_v6 = vunpack.i.h.bf16 %v6128_v0  ;;  %v6129_v7 = vunpack.i.l.bf16 %v6128_v0 }
 0x632   : > { %v5822_v47 = vpack.c.bf16 %v6130_v6, %v6129_v7 }
 0x651   : > { %v1240_v63 = vpop.xlane.xlu0 %1239 }
 0x652   : > { %6254 = vrcp.f32 %v1240_v63 }
 0x653   : > { %6256 = vrcp.f32 %v1243_v58 }
 0x654   : > { %6258 = vrcp.f32 %v956_v60 }
 0x655   : > { %6260 = vrcp.f32 %v959_v51  ;;  %v1691_v3 = vpop.xlane.xlu0 %1690 }
 0x656   : > { %6262 = vrcp.f32 %v962_v62  ;;  %v1695_v15 = vsub.f32 %v6940_v32, %v1691_v3 }
 0x657   : > { %6264 = vrcp.f32 %v965_v61 }
 0x658   : > { %6266 = vpow2.f32 %v1698_v13  ;;  %v1702_v24 = vmul.f32 1.442695, %v1695_v15 }
 0x659   : > { %v6133_v21 = vpop.permute.xlu0 %6132  ;;  %6268 = vpow2.f32 %v1696_v54 }
 0x65a   : > { %v6135_v27 = vunpack.i.h.bf16 %v6133_v21  ;;  %v6134_v28 = vunpack.i.l.bf16 %v6133_v21  ;;  %6270 = vpow2.f32 %v1700_v19 }
 0x65b   : > { %6272 = vpow2.f32 %v1702_v24 }
 0x65c   : > { %v6255_v17 = vpop.eup %6254  ;;  %v5826_v53 = vpack.c.bf16 %v6135_v27, %v6134_v28 }
 0x65d   : > { %v6257_v20 = vpop.eup %6256 }
 0x65e   : > { %v6259_v22 = vpop.eup %6258 }
 0x65f   : > { %v6261_v32 = vpop.eup %6260 }
 0x660   : > { %v6263_v34 = vpop.eup %6262 }
 0x661   : > { %v6265_v56 = vpop.eup %6264 }
 0x662   : > { %v6267_v61 = vpop.eup %6266 }
 0x663   : > { %v6269_v63 = vpop.eup %6268  ;;  %v1707_v1 = vsel %vm618_vm4, %v6267_v61, 0.0 }
 0x66d   : > { %v6956_v40 = vpop.f32.mrb[8].mxu1 }
 0x66e   : > { %v1056_v42 = vpop.f32.mrb[9].mxu1  ;;  %v1080_v33 = vmul.f32 %v6261_v32, %v6956_v40 }
 0x66f   : > { %v1079_v25 = vmul.f32 %v6259_v22, %v1056_v42 }
 0x672   : > { %v6958_v43 = vpop.f32.mrb[10].mxu1 }
 0x673   : > { %v6960_v46 = vpop.f32.mrb[11].mxu1  ;;  %v1082_v58 = vmul.f32 %v6265_v56, %v6958_v43  ;;  %v6271_v43 = vpop.eup %6270 }
 0x674   : > { %v1081_v42 = vmul.f32 %v6263_v34, %v6960_v46  ;;  %v6273_v2 = vpop.eup %6272 }
 0x675   : > { %v1713_v3 = vsel %vm618_vm4, %v6273_v2, 0.0 }
 0x693   : > { %v5408_v4 = vpop.f32.mrb[12].mxu1 }
 0x694   : > { %v1334_v8 = vpop.f32.mrb[13].mxu1  ;;  %v1358_v49 = vmul.f32 %v6253_v10, %v5408_v4  ;;  %v1710_v4 = vsel %vm618_vm4, %v6271_v43, 0.0 }
 0x695   : > { %v1357_v11 = vmul.f32 %v6251_v5, %v1334_v8  ;;  %v695_v5 = vld [vmem:[%s7592_s7 + $0x10] sm:$0xff] }
 0x697   : > { %v5411_v16 = vpop.f32.mrb[14].mxu1  ;;  %5414 = vmatprep.mubr.msk.f32.mxu1 %vm814_vm5, %v1357_v11 }
 0x698   : > { %v1344_v18 = vpop.f32.mrb[15].mxu1  ;;  %5415 = vmatmul.mubr.msk.f32.vlgmr.msra.gmra.mrb[16].mxu1 %vm814_vm5, %v1358_v49  ;;  %v1360_v23 = vmul.f32 %v6257_v20, %v5411_v16 }
 0x699   : > { %v1359_v52 = vmul.f32 %v6255_v17, %v1344_v18  ;;  %5421 = vmatpush3.msra.mxu1 %v693_v39 }
 0x69a   : > { %5823 = vmatprep.subr.bf16.mxu1 %v5822_v47 }
 0x69b   : > { %5417 = vmatprep.mubr.msk.f32.mxu1 %vm814_vm5, %v1359_v52  ;;  %v5474_v26 = vpop.f32.mrb[12].mxu0 }
 0x69c   : > { %v2052_v12 = vmul.f32 0.35355338, %v5474_v26  ;;  %5418 = vmatmul.mubr.msk.f32.gmra.mrb[18].mxu1 %vm814_vm5, %v1360_v23  ;;  %v2032_v31 = vpop.f32.mrb[13].mxu0 }
 0x69d   : > { %v2051_v9 = vmul.f32 0.35355338, %v2032_v31  ;;  %5422 = vmatprep.mubr.msk.f32.mxu1 %vm814_vm5, %v1079_v25 }
 0x69e   : > { %v2056_v35 = vadd.f32 %v6827_v30, %v2052_v12 }
 0x69f   : > { %v5477_v37 = vpop.f32.mrb[14].mxu0  ;;  %v2055_v39 = vadd.f32 %v6827_v30, %v2051_v9 }
 0x6a0   : > { %v2054_v45 = vmul.f32 0.35355338, %v5477_v37  ;;  %5423 = vmatmul.mubr.msk.f32.vlgmr.msra.gmra.mrb[16].mxu1 %vm814_vm5, %v1080_v33  ;;  %v2042_v48 = vpop.f32.mrb[15].mxu0  ;;  %v2062_v51 = vsel %vm618_vm4, %v2056_v35, -inf }
 0x6a1   : > { %5825 = vmatpush3.bf16.msra.mxu1 %v5822_v47  ;;  %v2053_v57 = vmul.f32 0.35355338, %v2042_v48  ;;  %2063 = vmax.xlane.f32.xlu0 %v2062_v51  ;;  %v2059_v40 = vsel %vm618_vm4, %v2055_v39, -inf }
 0x6a2   : > { %5425 = vmatprep.mubr.msk.f32.mxu1 %vm814_vm5, %v1081_v42  ;;  %5827 = vmatprep.subr.bf16.mxu1 %v5826_v53  ;;  %v2058_v46 = vadd.f32 %v6827_v30, %v2054_v45 }
 0x6a3   : > { %2060 = vmax.xlane.f32.xlu1 %v2059_v40  ;;  %v2057_v60 = vadd.f32 %v6827_v30, %v2053_v57  ;;  %v1704_v30 = vsel %vm618_vm4, %v6269_v63, 0.0 }
 0x6a4   : > { %5426 = vmatmul.mubr.msk.f32.gmra.mrb[18].mxu1 %vm814_vm5, %v1082_v58  ;;  %v2068_v62 = vsel %vm618_vm4, %v2058_v46, -inf  ;;  %v696_v58 = vld [vmem:[%s7592_s7 + $0x18] sm:$0xff] }
 0x6a5   : > { %5829 = vmatpush3.bf16.msra.mxu1 %v5826_v53  ;;  %2069 = vmax.xlane.f32.xlu0 %v2068_v62  ;;  %v2065_v0 = vsel %vm618_vm4, %v2057_v60, -inf }
 0x6a6   : > { %5450 = vmatprep.mubr.msk.f32.mxu1 %vm618_vm4, %v6269_v63  ;;  %5456 = vmatprep.subr.mxu1 %v695_v5 }
 0x6a7   : > { %2066 = vmax.xlane.f32.xlu1 %v2065_v0 }
 0x6a8   : > { %5451 = vmatmul.mubr.msk.f32.vlgmr.msra.gmra.mrb[20].mxu1 %vm618_vm4, %v6267_v61 }
 0x6a9   : > { %1708 = vadd.xlane.f32.xlu0 %v1707_v1  ;;  %5453 = vmatprep.mubr.msk.f32.mxu1 %vm618_vm4, %v6271_v43 }
 0x6aa   : > { %5457 = vmatpush3.msra.mxu1 %v695_v5 }
 0x6ab   : > { %1705 = vadd.xlane.f32.xlu1 %v1704_v30 }
 0x6ac   : > { %5454 = vmatmul.mubr.msk.f32.gmra.mrb[22].mxu1 %vm618_vm4, %v6273_v2 }
 0x6ad   : > { %1714 = vadd.xlane.f32.xlu0 %v1713_v3 }
 0x6af   : > { %1711 = vadd.xlane.f32.xlu1 %v1710_v4 }
 0x6c0   : > { %6137 = vrot.lane.b32.xlu1 %v6736_v50, %s7612_s28 }
 0x6c3   : > { %6142 = vrot.lane.b32.xlu0 %v6748_v55, %s7612_s28  ;;  %s7637_s28 = smov 48  }
 0x72e   : > { %v2064_v6 = vpop.xlane.xlu0 %2063 }
 0x72f   : > { %v2072_v7 = vsub.f32 %v2056_v35, %v2064_v6 }
 0x730   : > { %v2061_v8 = vpop.xlane.xlu1 %2060 }
 0x731   : > { %v2077_v10 = vmul.f32 1.442695, %v2072_v7  ;;  %v2071_v11 = vsub.f32 %v2055_v39, %v2061_v8 }
 0x732   : > { %v2070_v13 = vpop.xlane.xlu0 %2069 }
 0x733   : > { %6274 = vpow2.f32 %v2077_v10  ;;  %v2075_v14 = vmul.f32 1.442695, %v2071_v11  ;;  %v2074_v49 = vsub.f32 %v2058_v46, %v2070_v13  ;;  %v4937_v10 = vld [vmem:[%s7593_s8] ss:$0 sm:$0xff] }
 0x734   : > { %v2067_v54 = vpop.xlane.xlu1 %2066 }
 0x735   : > { %6276 = vpow2.f32 %v2075_v14  ;;  %v2081_v50 = vmul.f32 1.442695, %v2074_v49  ;;  %v2073_v15 = vsub.f32 %v2057_v60, %v2067_v54 }
 0x736   : > { %v1709_v28 = vpop.xlane.xlu0 %1708 }
 0x737   : > { %6278 = vpow2.f32 %v2081_v50  ;;  %v2079_v55 = vmul.f32 1.442695, %v2073_v15 }
 0x738   : > { %v1706_v16 = vpop.xlane.xlu1 %1705 }
 0x739   : > { %6280 = vpow2.f32 %v2079_v55 }
 0x73a   : > { %6282 = vrcp.f32 %v1706_v16  ;;  %v1715_v12 = vpop.xlane.xlu0 %1714 }
 0x73b   : > { %6284 = vrcp.f32 %v1709_v28 }
 0x73c   : > { %v1712_v17 = vpop.xlane.xlu1 %1711 }
 0x73d   : > { %v6275_v18 = vpop.eup %6274  ;;  %6286 = vrcp.f32 %v1712_v17 }
 0x73e   : > { %v2086_v47 = vsel %vm618_vm4, %v6275_v18, 0.0  ;;  %6288 = vrcp.f32 %v1715_v12  ;;  %v6143_v31 = vpop.permute.xlu0 %6142 }
 0x73f   : > { %v6277_v20 = vpop.eup %6276  ;;  %2087 = vadd.xlane.f32.xlu0 %v2086_v47  ;;  %v6145_v33 = vunpack.i.h.bf16 %v6143_v31  ;;  %v6144_v35 = vunpack.i.l.bf16 %v6143_v31 }
 0x740   : > { %v6138_v21 = vpop.permute.xlu1 %6137  ;;  %v2083_v52 = vsel %vm618_vm4, %v6277_v20, 0.0 }
 0x741   : > { %v6279_v22 = vpop.eup %6278  ;;  %v6140_v19 = vunpack.i.h.bf16 %v6138_v21  ;;  %v6139_v23 = vunpack.i.l.bf16 %v6138_v21  ;;  %2084 = vadd.xlane.f32.xlu1 %v2083_v52  ;;  %v5846_v51 = vpack.c.bf16 %v6145_v33, %v6144_v35 }
 0x742   : > { %v2092_v24 = vsel %vm618_vm4, %v6279_v22, 0.0 }
 0x743   : > { %v6281_v25 = vpop.eup %6280  ;;  %v5842_v26 = vpack.c.bf16 %v6140_v19, %v6139_v23  ;;  %2093 = vadd.xlane.f32.xlu0 %v2092_v24 }
 0x744   : > { %v2089_v27 = vsel %vm618_vm4, %v6281_v25, 0.0  ;;  %v6283_v9 = vpop.eup %6282 }
 0x745   : > { %2090 = vadd.xlane.f32.xlu1 %v2089_v27  ;;  %5843 = vmatprep.subr.bf16.mxu1 %v5842_v26  ;;  %v6285_v37 = vpop.eup %6284 }
 0x747   : > { %v6287_v48 = vpop.eup %6286 }
 0x748   : > { %v6289_v56 = vpop.eup %6288 }
 0x77b   : > { %v5452_v32 = vpop.f32.mrb[20].mxu1 }
 0x77c   : > { %v1806_v34 = vpop.f32.mrb[21].mxu1  ;;  %v1830_v42 = vmul.f32 %v6285_v37, %v5452_v32 }
 0x77d   : > { %v1829_v39 = vmul.f32 %v6283_v9, %v1806_v34 }
 0x77f   : > { %v5455_v45 = vpop.f32.mrb[22].mxu1  ;;  %5458 = vmatprep.mubr.msk.f32.mxu1 %vm814_vm5, %v1829_v39 }
 0x780   : > { %v1816_v53 = vpop.f32.mrb[23].mxu1  ;;  %5459 = vmatmul.mubr.msk.f32.vlgmr.msra.gmra.mrb[16].mxu1 %vm814_vm5, %v1830_v42  ;;  %v1832_v40 = vmul.f32 %v6289_v56, %v5455_v45  ;;  %v2395_v42 = vld [vmem:[%s7595_s10] sm:$0xff]  ;;  %v2396_v45 = vld [vmem:[%s7595_s10 + $0x8] sm:$0xff] }
 0x781   : > { %v1831_v57 = vmul.f32 %v6287_v48, %v1816_v53  ;;  %5845 = vmatpush3.bf16.msra.mxu1 %v5842_v26  ;;  %v5850_v48 = vpack.c.bf16 %v2396_v45, %v2395_v42  ;;  %v2398_v53 = vld [vmem:[%s7595_s10 + $0x18] sm:$0xff] }
 0x782   : > { %5847 = vmatprep.subr.bf16.mxu1 %v5846_v51 }
 0x783   : > { %5461 = vmatprep.mubr.msk.f32.mxu1 %vm814_vm5, %v1831_v57 }
 0x784   : > { %5462 = vmatmul.mubr.msk.f32.gmra.mrb[18].mxu1 %vm814_vm5, %v1832_v40 }
 0x785   : > { %5849 = vmatpush3.bf16.msra.mxu1 %v5846_v51  ;;  %5486 = vmatprep.mubr.msk.f32.mxu1 %vm618_vm4, %v6277_v20  ;;  %v2397_v51 = vld [vmem:[%s7595_s10 + $0x10] sm:$0xff] }
 0x786   : > { %5492 = vmatprep.subr.mxu1 %v696_v58  ;;  %v5854_v56 = vpack.c.bf16 %v2398_v53, %v2397_v51 }
 0x788   : > { %5487 = vmatmul.mubr.msk.f32.vlgmr.msra.gmra.mrb[24].mxu1 %vm618_vm4, %v6275_v18 }
 0x789   : > { %5489 = vmatprep.mubr.msk.f32.mxu1 %vm618_vm4, %v6281_v25  ;;  %5493 = vmatpush3.msra.mxu1 %v696_v58 }
 0x78a   : > { %5851 = vmatprep.subr.bf16.mxu1 %v5850_v48 }
 0x78c   : > { %5490 = vmatmul.mubr.msk.f32.gmra.mrb[26].mxu1 %vm618_vm4, %v6279_v22 }
 0x7cc   : > { %v2088_v60 = vpop.xlane.xlu0 %2087 }
 0x7ce   : > { %v2085_v46 = vpop.xlane.xlu1 %2084 }
 0x7cf   : > { %6290 = vrcp.f32 %v2085_v46 }
 0x7d0   : > { %6292 = vrcp.f32 %v2088_v60  ;;  %v2094_v62 = vpop.xlane.xlu0 %2093 }
 0x7d2   : > { %v2091_v61 = vpop.xlane.xlu1 %2090 }
 0x7d3   : > { %6294 = vrcp.f32 %v2091_v61 }
 0x7d4   : > { %6296 = vrcp.f32 %v2094_v62 }
 0x7d9   : > { %v6291_v0 = vpop.eup %6290 }
 0x7da   : > { %v6293_v1 = vpop.eup %6292 }
 0x7dd   : > { %v6295_v4 = vpop.eup %6294 }
 0x7de   : > { %v6297_v6 = vpop.eup %6296 }
 0x85b   : > { %v5488_v63 = vpop.f32.mrb[24].mxu1 }
 0x85c   : > { %v2185_v43 = vpop.f32.mrb[25].mxu1  ;;  %v2209_v30 = vmul.f32 %v6293_v1, %v5488_v63 }
 0x85d   : > { %v2208_v2 = vmul.f32 %v6291_v0, %v2185_v43  ;;  %v7047_v43 = vshrl.u32 %v485_v29, 7 }
 0x85f   : > { %v5491_v3 = vpop.f32.mrb[26].mxu1  ;;  %5494 = vmatprep.mubr.msk.f32.mxu1 %vm814_vm5, %v2208_v2 }
 0x860   : > { %v2195_v5 = vpop.f32.mrb[27].mxu1  ;;  %5495 = vmatmul.mubr.msk.f32.vlgmr.msra.gmra.mrb[16].mxu1 %vm814_vm5, %v2209_v30  ;;  %v2211_v8 = vmul.f32 %v6297_v6, %v5491_v3  ;;  %v2381_v3 = vsub.s32 0, %v7047_v43 }
 0x861   : > { %v2210_v7 = vmul.f32 %v6295_v4, %v2195_v5  ;;  %5853 = vmatpush3.bf16.msra.mxu1 %v5850_v48  ;;  %v7053_v4 = vld [vmem:[%s7594_s9] sm:$0xf]  ;;  %v2389_v5 = vsub.s32 1, %v7047_v43 }
 0x862   : > { %5855 = vmatprep.subr.bf16.mxu1 %v5854_v56  ;;  %v2382_v29 = vrot.slane %v7053_v4, %v2381_v3 }
 0x863   : > { %5497 = vmatprep.mubr.msk.f32.mxu1 %vm814_vm5, %v2210_v7 }
 0x864   : > { %5498 = vmatmul.mubr.msk.f32.gmra.mrb[18].mxu1 %vm814_vm5, %v2211_v8 }
 0x865   : > { %5857 = vmatpush3.bf16.msra.mxu1 %v5854_v56 }
 0x933   : > { %v5496_v11 = vpop.f32.mrb[16].mxu1 }
 0x934   : > { %v2320_v13 = vadd.f32 %v5496_v11, %v4937_v10  ;;  %v2290_v14 = vpop.f32.mrb[17].mxu1  ;;  %v2390_v11 = vrot.slane %v7053_v4, %v2389_v5 }
 0x935   : > { %v2319_v49 = vadd.f32 %v4937_v10, %v2290_v14 }
 0x936   : > { %v2324_v54 = vadd.f32 %v2320_v13, %v6711_v38 }
 0x937   : > { %v5499_v50 = vpop.f32.mrb[18].mxu1  ;;  %v2323_v15 = vadd.f32 %v2319_v49, %v6709_v36 }
 0x938   : > { %v2322_v55 = vadd.f32 %v5499_v50, %v4937_v10  ;;  %v2300_v16 = vpop.f32.mrb[19].mxu1  ;;  %v2330_v17 = vsel %vm618_vm4, %v2324_v54, 0.0 }
 0x939   : > { %v2321_v18 = vadd.f32 %v4937_v10, %v2300_v16  ;;  %2331 = vadd.xlane.f32.xlu0 %v2330_v17  ;;  %v2327_v47 = vsel %vm618_vm4, %v2323_v15, 0.0 }
 0x93a   : > { %2328 = vadd.xlane.f32.xlu1 %v2327_v47  ;;  %v2326_v20 = vadd.f32 %v2322_v55, %v6721_v44 }
 0x93b   : > { %v2325_v21 = vadd.f32 %v2321_v18, %v6717_v41 }
 0x93c   : > { %v2336_v52 = vsel %vm618_vm4, %v2326_v20, 0.0 }
 0x93d   : > { %2337 = vadd.xlane.f32.xlu0 %v2336_v52  ;;  %v2333_v38 = vsel %vm618_vm4, %v2325_v21, 0.0  ;;  %v2540_v52 = vld [vmem:[%s7597_s12 + $0x8] sm:$0xff] }
 0x93e   : > { %2334 = vadd.xlane.f32.xlu1 %v2333_v38 }
 0x9c6   : > { %v2332_v36 = vpop.xlane.xlu0 %2331 }
 0x9c7   : > { %v2340_v22 = vmul.f32 0.03125, %v2332_v36  ;;  %v2329_v19 = vpop.xlane.xlu1 %2328  ;;  %v2541_v36 = vld [vmem:[%s7597_s12 + $0x10] sm:$0xff] }
 0x9c8   : > { %v2339_v23 = vmul.f32 0.03125, %v2329_v19 }
 0x9c9   : > { %v2344_v24 = vsub.f32 %v2324_v54, %v2340_v22  ;;  %v2542_v22 = vld [vmem:[%s7597_s12 + $0x18] sm:$0xff] }
 0x9ca   : > { %v2343_v25 = vsub.f32 %v2323_v15, %v2339_v23  ;;  %v2338_v26 = vpop.xlane.xlu0 %2337  ;;  %v5862_v19 = vpack.c.bf16 %v2542_v22, %v2541_v36  ;;  %v2543_v23 = vld [vmem:[%s7597_s12 + $0x20] sm:$0xff] }
 0x9cb   : > { %v2342_v27 = vmul.f32 0.03125, %v2338_v26  ;;  %v2335_v28 = vpop.xlane.xlu1 %2334  ;;  %v2348_v12 = vmul.f32 %v2344_v24, %v2344_v24  ;;  %v2545_v26 = vld [vmem:[%s7597_s12 + $0x30] sm:$0xff] }
 0x9cc   : > { %v2341_v31 = vmul.f32 0.03125, %v2335_v28  ;;  %v2347_v44 = vmul.f32 %v2343_v25, %v2343_v25 }
 0x9cd   : > { %v2346_v32 = vsub.f32 %v2326_v20, %v2342_v27  ;;  %v2354_v41 = vsel %vm618_vm4, %v2348_v12, 0.0  ;;  %v2546_v27 = vld [vmem:[%s7597_s12 + $0x38] sm:$0xff]  ;;  %v4938_v12 = vld [vmem:[%s7596_s11] ss:$0 sm:$0xff] }
 0x9ce   : > { %v2345_v9 = vsub.f32 %v2325_v21, %v2341_v31  ;;  %2355 = vadd.xlane.f32.xlu0 %v2354_v41  ;;  %v2351_v33 = vsel %vm618_vm4, %v2347_v44, 0.0  ;;  %v2539_v21 = vld [vmem:[%s7597_s12] sm:$0xff]  ;;  %v5870_v28 = vpack.c.bf16 %v2546_v27, %v2545_v26 }
 0x9cf   : > { %2352 = vadd.xlane.f32.xlu1 %v2351_v33  ;;  %v2350_v35 = vmul.f32 %v2346_v32, %v2346_v32  ;;  %v5858_v38 = vpack.c.bf16 %v2540_v52, %v2539_v21 }
 0x9d0   : > { %v2349_v34 = vmul.f32 %v2345_v9, %v2345_v9 }
 0x9d1   : > { %v2360_v37 = vsel %vm618_vm4, %v2350_v35, 0.0  ;;  %5859 = vmatprep.subr.bf16.mxu0 %v5858_v38 }
 0x9d2   : > { %2361 = vadd.xlane.f32.xlu0 %v2360_v37  ;;  %v2357_v39 = vsel %vm618_vm4, %v2349_v34, 0.0  ;;  %5861 = vmatpush3.bf16.msra.mxu0 %v5858_v38  ;;  %v4943_v38 = vld [vmem:[%s7598_s13] ss:$0 sm:$0xff] }
 0x9d3   : > { %2358 = vadd.xlane.f32.xlu1 %v2357_v39  ;;  %5863 = vmatprep.subr.bf16.mxu0 %v5862_v19 }
 0x9d6   : > { %5865 = vmatpush3.bf16.msra.mxu0 %v5862_v19 }
 0xa5b   : > { %v2356_v57 = vpop.xlane.xlu0 %2355 }
 0xa5c   : > { %v2364_v40 = vmul.f32 0.03125, %v2356_v57  ;;  %v2353_v58 = vpop.xlane.xlu1 %2352 }
 0xa5d   : > { %v2363_v46 = vmul.f32 0.03125, %v2353_v58 }
 0xa5e   : > { %v2368_v60 = vadd.f32 1e-12, %v2364_v40 }
 0xa5f   : > { %v2367_v61 = vadd.f32 1e-12, %v2363_v46  ;;  %v2362_v62 = vpop.xlane.xlu0 %2361 }
 0xa60   : > { %6298 = vrsqrt.f32 %v2368_v60  ;;  %v2366_v63 = vmul.f32 0.03125, %v2362_v62  ;;  %v2359_v0 = vpop.xlane.xlu1 %2358 }
 0xa61   : > { %6300 = vrsqrt.f32 %v2367_v61  ;;  %v2365_v1 = vmul.f32 0.03125, %v2359_v0 }
 0xa62   : > { %v2370_v2 = vadd.f32 1e-12, %v2366_v63 }
 0xa63   : > { %v2369_v30 = vadd.f32 1e-12, %v2365_v1 }
 0xa64   : > { %6302 = vrsqrt.f32 %v2370_v2 }
 0xa65   : > { %6304 = vrsqrt.f32 %v2369_v30 }
 0xa6a   : > { %v6299_v6 = vpop.eup %6298 }
 0xa6b   : > { %v6301_v7 = vpop.eup %6300  ;;  %v2376_v8 = vmul.f32 %v6299_v6, %v2344_v24  ;;  %v2544_v24 = vld [vmem:[%s7597_s12 + $0x28] sm:$0xff] }
 0xa6c   : > { %v2375_v10 = vmul.f32 %v6301_v7, %v2343_v25  ;;  %v5866_v25 = vpack.c.bf16 %v2544_v24, %v2543_v23 }
 0xa6d   : > { %v2384_v13 = vmul.f32 %v2382_v29, %v2376_v8 }
 0xa6e   : > { %v6303_v14 = vpop.eup %6302  ;;  %v2383_v49 = vmul.f32 %v2382_v29, %v2375_v10  ;;  %5867 = vmatprep.subr.bf16.mxu0 %v5866_v25 }
 0xa6f   : > { %v6305_v54 = vpop.eup %6304  ;;  %v2378_v50 = vmul.f32 %v6303_v14, %v2346_v32  ;;  %v7064_v16 = vadd.f32 %v2390_v11, %v2384_v13  ;;  %5869 = vmatpush3.bf16.msra.mxu0 %v5866_v25 }
 0xa70   : > { %v7062_v15 = vadd.f32 %v2390_v11, %v2383_v49  ;;  %v2377_v55 = vmul.f32 %v6305_v54, %v2345_v9  ;;  %5871 = vmatprep.subr.bf16.mxu0 %v5870_v28 }
 0xa71   : > { %v2386_v17 = vmul.f32 %v2382_v29, %v2378_v50 }
 0xa72   : > { %5508 = vmatprep.mubr.msk.f32.mxu1 %vm618_vm4, %v7062_v15  ;;  %v2385_v18 = vmul.f32 %v2382_v29, %v2377_v55 }
 0xa73   : > { %5509 = vmatmul.mubr.msk.f32.vlgmr.msra.gmra.mrb[28].mxu1 %vm618_vm4, %v7064_v16  ;;  %v7072_v20 = vadd.f32 %v2390_v11, %v2386_v17  ;;  %5873 = vmatpush3.bf16.msra.mxu0 %v5870_v28 }
 0xa74   : > { %v7070_v47 = vadd.f32 %v2390_v11, %v2385_v18 }
 0xa76   : > { %5511 = vmatprep.mubr.msk.f32.mxu1 %vm618_vm4, %v7070_v47 }
 0xa77   : > { %5512 = vmatmul.mubr.msk.f32.gmra.mrb[30].mxu1 %vm618_vm4, %v7072_v20 }
 0xb46   : > { %v5510_v31 = vpop.f32.mrb[28].mxu1 }
 0xb47   : > { %v2490_v44 = vadd.f32 %v5510_v31, %v4938_v12  ;;  %v2484_v32 = vpop.f32.mrb[29].mxu1 }
 0xb48   : > { %v2485_v41 = vadd.f32 %v4938_v12, %v2484_v32 }
 0xb49   : > { %v2504_v9 = vmul.f32 %v2490_v44, %v2490_v44 }
 0xb4a   : > { %v2503_v33 = vmul.f32 %v2485_v41, %v2485_v41  ;;  %v5513_v35 = vpop.f32.mrb[30].mxu1 }
 0xb4b   : > { %v2508_v34 = vmul.f32 %v2504_v9, %v2490_v44  ;;  %v2500_v37 = vadd.f32 %v5513_v35, %v4938_v12  ;;  %v2494_v39 = vpop.f32.mrb[31].mxu1 }
 0xb4c   : > { %v2507_v42 = vmul.f32 %v2503_v33, %v2485_v41  ;;  %v2495_v45 = vadd.f32 %v4938_v12, %v2494_v39 }
 0xb4d   : > { %v2512_v48 = vmul.f32 0.044715, %v2508_v34  ;;  %v2506_v51 = vmul.f32 %v2500_v37, %v2500_v37 }
 0xb4e   : > { %v2511_v53 = vmul.f32 0.044715, %v2507_v42  ;;  %v2505_v56 = vmul.f32 %v2495_v45, %v2495_v45 }
 0xb4f   : > { %v2516_v57 = vadd.f32 %v2512_v48, %v2490_v44  ;;  %v2510_v40 = vmul.f32 %v2506_v51, %v2500_v37 }
 0xb50   : > { %v2515_v58 = vadd.f32 %v2511_v53, %v2485_v41  ;;  %v2509_v46 = vmul.f32 %v2505_v56, %v2495_v45 }
 0xb51   : > { %v2520_v60 = vmul.f32 0.7978846, %v2516_v57  ;;  %v2514_v61 = vmul.f32 0.044715, %v2510_v40 }
 0xb52   : > { %v2519_v62 = vmul.f32 0.7978846, %v2515_v58  ;;  %v2513_v63 = vmul.f32 0.044715, %v2509_v46 }
 0xb53   : > { %6306 = vtanh.f32 %v2520_v60  ;;  %v2518_v0 = vadd.f32 %v2514_v61, %v2500_v37 }
 0xb54   : > { %6308 = vtanh.f32 %v2519_v62  ;;  %v2517_v1 = vadd.f32 %v2513_v63, %v2495_v45  ;;  %v4948_v62 = vld [vmem:[%s7590_s5 + $0x20] sm:$0xff]  ;;  %v4949_v63 = vld [vmem:[%s7590_s5 + $0x28] sm:$0xff] }
 0xb55   : > { %v2522_v2 = vmul.f32 0.7978846, %v2518_v0  ;;  %v5874_v0 = vpack.c.bf16 %v4949_v63, %v4948_v62 }
 0xb56   : > { %v2521_v30 = vmul.f32 0.7978846, %v2517_v1  ;;  %v4950_v1 = vld [vmem:[%s7590_s5 + $0x30] sm:$0xff] }
 0xb57   : > { %6310 = vtanh.f32 %v2522_v2  ;;  %5875 = vmatprep.subr.bf16.mxu1 %v5874_v0  ;;  %v4951_v2 = vld [vmem:[%s7590_s5 + $0x38] sm:$0xff] }
 0xb58   : > { %6312 = vtanh.f32 %v2521_v30  ;;  %5877 = vmatpush3.bf16.msra.mxu1 %v5874_v0  ;;  %v5878_v30 = vpack.c.bf16 %v4951_v2, %v4950_v1 }
 0xb5a   : > { %5879 = vmatprep.subr.bf16.mxu1 %v5878_v30 }
 0xb5c   : > { %5881 = vmatpush3.bf16.msra.mxu1 %v5878_v30  ;;  %v7202_v30 = vld [vmem:[%s6824_s22] ss:$0 sm:$0xff]  ;;  %s7631_s22 = smov 120  }
 0xb5d   : > { %v6307_v29 = vpop.eup %6306 }
 0xb5e   : > { %v6309_v6 = vpop.eup %6308  ;;  %v2528_v7 = vadd.f32 1.0, %v6307_v29 }
 0xb5f   : > { %v2527_v8 = vadd.f32 1.0, %v6309_v6 }
 0xb60   : > { %v2532_v10 = vmul.f32 0.5, %v2528_v7 }
 0xb61   : > { %v6311_v11 = vpop.eup %6310  ;;  %v2531_v13 = vmul.f32 0.5, %v2527_v8 }
 0xb62   : > { %v6313_v14 = vpop.eup %6312  ;;  %v2530_v49 = vadd.f32 1.0, %v6311_v11  ;;  %v2536_v55 = vmul.f32 %v2532_v10, %v2490_v44 }
 0xb63   : > { %v2535_v54 = vmul.f32 %v2531_v13, %v2485_v41  ;;  %v2529_v50 = vadd.f32 1.0, %v6313_v14 }
 0xb64   : > { %v2534_v17 = vmul.f32 0.5, %v2530_v49 }
 0xb65   : > { %5530 = vmatprep.mubr.msk.f32.mxu0 %vm2554_vm7, %v2535_v54  ;;  %v2533_v18 = vmul.f32 0.5, %v2529_v50 }
 0xb66   : > { %5531 = vmatmul.mubr.msk.f32.vlgmr.msra.gmra.mrb[16].mxu0 %vm2554_vm7, %v2536_v55  ;;  %v2538_v52 = vmul.f32 %v2534_v17, %v2500_v37  ;;  %v2710_v17 = vsub.s32 2, %v7047_v43 }
 0xb67   : > { %v2537_v21 = vmul.f32 %v2533_v18, %v2495_v45  ;;  %v2718_v18 = vsub.s32 3, %v7047_v43 }
 0xb69   : > { %5533 = vmatprep.mubr.msk.f32.mxu0 %vm2554_vm7, %v2537_v21  ;;  %v2711_v21 = vrot.slane %v7053_v4, %v2710_v17 }
 0xb6a   : > { %5534 = vmatmul.mubr.msk.f32.gmra.mrb[18].mxu0 %vm2554_vm7, %v2538_v52 }
 0xc39   : > { %v5532_v36 = vpop.f32.mrb[16].mxu0 }
 0xc3a   : > { %v2639_v22 = vadd.f32 %v5532_v36, %v4943_v38  ;;  %v2633_v19 = vpop.f32.mrb[17].mxu0 }
 0xc3b   : > { %v2634_v23 = vadd.f32 %v4943_v38, %v2633_v19  ;;  %v2719_v19 = vrot.slane %v7053_v4, %v2718_v18 }
 0xc3c   : > { %v2653_v24 = vadd.f32 %v2639_v22, %v7064_v16 }
 0xc3d   : > { %v5535_v25 = vpop.f32.mrb[18].mxu0  ;;  %v2652_v26 = vadd.f32 %v2634_v23, %v7062_v15 }
 0xc3e   : > { %v2649_v27 = vadd.f32 %v5535_v25, %v4943_v38  ;;  %v2643_v28 = vpop.f32.mrb[19].mxu0  ;;  %v2659_v12 = vsel %vm618_vm4, %v2653_v24, 0.0 }
 0xc3f   : > { %v2644_v31 = vadd.f32 %v4943_v38, %v2643_v28  ;;  %2660 = vadd.xlane.f32.xlu0 %v2659_v12  ;;  %v2656_v44 = vsel %vm618_vm4, %v2652_v26, 0.0 }
 0xc40   : > { %2657 = vadd.xlane.f32.xlu1 %v2656_v44  ;;  %v2655_v32 = vadd.f32 %v2649_v27, %v7072_v20 }
 0xc41   : > { %v2654_v41 = vadd.f32 %v2644_v31, %v7070_v47 }
 0xc42   : > { %v2665_v9 = vsel %vm618_vm4, %v2655_v32, 0.0 }
 0xc43   : > { %2666 = vadd.xlane.f32.xlu0 %v2665_v9  ;;  %v2662_v16 = vsel %vm618_vm4, %v2654_v41, 0.0  ;;  %v4959_v9 = vld [vmem:[%s7591_s6 + $0x1] ss:$0 sm:$0xff] }
 0xc44   : > { %2663 = vadd.xlane.f32.xlu1 %v2662_v16 }
 0xccc   : > { %v2661_v15 = vpop.xlane.xlu0 %2660 }
 0xccd   : > { %v2669_v33 = vmul.f32 0.03125, %v2661_v15  ;;  %v2658_v35 = vpop.xlane.xlu1 %2657 }
 0xcce   : > { %v2668_v34 = vmul.f32 0.03125, %v2658_v35 }
 0xccf   : > { %v2673_v37 = vsub.f32 %v2653_v24, %v2669_v33 }
 0xcd0   : > { %v2672_v39 = vsub.f32 %v2652_v26, %v2668_v34  ;;  %v2667_v42 = vpop.xlane.xlu0 %2666 }
 0xcd1   : > { %v2671_v45 = vmul.f32 0.03125, %v2667_v42  ;;  %v2664_v48 = vpop.xlane.xlu1 %2663  ;;  %v2677_v51 = vmul.f32 %v2673_v37, %v2673_v37 }
 0xcd2   : > { %v2670_v53 = vmul.f32 0.03125, %v2664_v48  ;;  %v2676_v20 = vmul.f32 %v2672_v39, %v2672_v39 }
 0xcd3   : > { %v2675_v56 = vsub.f32 %v2655_v32, %v2671_v45  ;;  %v2683_v47 = vsel %vm618_vm4, %v2677_v51, 0.0 }
 0xcd4   : > { %v2674_v57 = vsub.f32 %v2654_v41, %v2670_v53  ;;  %2684 = vadd.xlane.f32.xlu0 %v2683_v47  ;;  %v2680_v40 = vsel %vm618_vm4, %v2676_v20, 0.0 }
 0xcd5   : > { %2681 = vadd.xlane.f32.xlu1 %v2680_v40  ;;  %v2679_v58 = vmul.f32 %v2675_v56, %v2675_v56 }
 0xcd6   : > { %v2678_v46 = vmul.f32 %v2674_v57, %v2674_v57 }
 0xcd7   : > { %v2689_v60 = vsel %vm618_vm4, %v2679_v58, 0.0 }
 0xcd8   : > { %2690 = vadd.xlane.f32.xlu0 %v2689_v60  ;;  %v2686_v61 = vsel %vm618_vm4, %v2678_v46, 0.0 }
 0xcd9   : > { %2687 = vadd.xlane.f32.xlu1 %v2686_v61 }
 0xd61   : > { %v2685_v29 = vpop.xlane.xlu0 %2684 }
 0xd62   : > { %v2693_v6 = vmul.f32 0.03125, %v2685_v29  ;;  %v2682_v7 = vpop.xlane.xlu1 %2681 }
 0xd63   : > { %v2692_v8 = vmul.f32 0.03125, %v2682_v7 }
 0xd64   : > { %v2697_v10 = vadd.f32 1e-12, %v2693_v6 }
 0xd65   : > { %v2696_v11 = vadd.f32 1e-12, %v2692_v8  ;;  %v2691_v13 = vpop.xlane.xlu0 %2690 }
 0xd66   : > { %6314 = vrsqrt.f32 %v2697_v10  ;;  %v2695_v14 = vmul.f32 0.03125, %v2691_v13  ;;  %v2688_v49 = vpop.xlane.xlu1 %2687 }
 0xd67   : > { %6316 = vrsqrt.f32 %v2696_v11  ;;  %v2694_v54 = vmul.f32 0.03125, %v2688_v49 }
 0xd68   : > { %v2699_v50 = vadd.f32 1e-12, %v2695_v14 }
 0xd69   : > { %v2698_v55 = vadd.f32 1e-12, %v2694_v54 }
 0xd6a   : > { %6318 = vrsqrt.f32 %v2699_v50 }
 0xd6b   : > { %6320 = vrsqrt.f32 %v2698_v55 }
 0xd70   : > { %v6315_v52 = vpop.eup %6314 }
 0xd71   : > { %v6317_v38 = vpop.eup %6316  ;;  %v2705_v36 = vmul.f32 %v6315_v52, %v2673_v37 }
 0xd72   : > { %v2704_v22 = vmul.f32 %v6317_v38, %v2672_v39 }
 0xd73   : > { %v2713_v23 = vmul.f32 %v2711_v21, %v2705_v36 }
 0xd74   : > { %v6319_v24 = vpop.eup %6318  ;;  %v2712_v25 = vmul.f32 %v2711_v21, %v2704_v22 }
 0xd75   : > { %v6321_v26 = vpop.eup %6320  ;;  %v2707_v27 = vmul.f32 %v6319_v24, %v2675_v56  ;;  %v7146_v31 = vadd.f32 %v2719_v19, %v2713_v23 }
 0xd76   : > { %v7144_v28 = vadd.f32 %v2719_v19, %v2712_v25  ;;  %v2706_v12 = vmul.f32 %v6321_v26, %v2674_v57 }
 0xd77   : > { %v2715_v44 = vmul.f32 %v2711_v21, %v2707_v27 }
 0xd78   : > { %5544 = vmatprep.mubr.msk.f32.mxu1 %vm618_vm4, %v7144_v28  ;;  %v2714_v32 = vmul.f32 %v2711_v21, %v2706_v12 }
 0xd79   : > { %5545 = vmatmul.mubr.msk.f32.vlgmr.msra.gmra.mrb[32].mxu1 %vm618_vm4, %v7146_v31  ;;  %v7154_v4 = vadd.f32 %v2719_v19, %v2715_v44 }
 0xd7a   : > { %v7152_v41 = vadd.f32 %v2719_v19, %v2714_v32 }
 0xd7c   : > { %5547 = vmatprep.mubr.msk.f32.mxu1 %vm618_vm4, %v7152_v41 }
 0xd7d   : > { %5548 = vmatmul.mubr.msk.f32.gmra.mrb[34].mxu1 %vm618_vm4, %v7154_v4 }
 0xe4c   : > { %v5546_v16 = vpop.f32.mrb[32].mxu1 }
 0xe4d   : > { %v7163_v15 = vadd.f32 %v5546_v16, %v4959_v9  ;;  %v2824_v33 = vpop.f32.mrb[33].mxu1 }
 0xe4e   : > { %v7165_v35 = vadd.f32 %v4959_v9, %v2824_v33 }
 0xe50   : > { %v5549_v34 = vpop.f32.mrb[34].mxu1  ;;  %5558 = vmatprep.mubr.msk.f32.mxu1 %vm814_vm5, %v7165_v35  ;;  %v7171_v37 = vpack.i.bf16 %v7163_v15, %v7165_v35 }
 0xe51   : > { %v7173_v39 = vadd.f32 %v5549_v34, %v4959_v9  ;;  %v2834_v42 = vpop.f32.mrb[35].mxu1 }
 0xe52   : > { %v7175_v45 = vadd.f32 %v4959_v9, %v2834_v42  ;;  %6147 = vrot.lane.b32.xlu1 %v7171_v37, %s6477_s25 }
 0xe54   : > { %v7181_v48 = vpack.i.bf16 %v7173_v39, %v7175_v45 }
 0xe56   : > { %6157 = vrot.lane.b32.xlu1 %v7171_v37, %s6482_s24  ;;  %6152 = vrot.lane.b32.xlu0 %v7181_v48, %s6477_s25  ;;  %s7630_s25 = smov 88  }
 0xec4   : > { %v6148_v51 = vpop.permute.xlu1 %6147 }
 0xec5   : > { %v6150_v53 = vunpack.i.h.bf16 %v6148_v51  ;;  %v6149_v20 = vunpack.i.l.bf16 %v6148_v51 }
 0xec7   : > { %v5882_v56 = vpack.c.bf16 %v6150_v53, %v6149_v20 }
 0xec8   : > { %v6153_v47 = vpop.permute.xlu0 %6152  ;;  %v6158_v57 = vpop.permute.xlu1 %6157 }
 0xec9   : > { %v6155_v40 = vunpack.i.h.bf16 %v6153_v47  ;;  %v6154_v58 = vunpack.i.l.bf16 %v6153_v47  ;;  %v6160_v46 = vunpack.i.h.bf16 %v6158_v57  ;;  %v6159_v60 = vunpack.i.l.bf16 %v6158_v57  ;;  %5884 = vmatprep.subr.msk.bf16.mxu1 %vm6778_vm6, %v5882_v56 }
 0xeca   : > { %5887 = vmatpush3.bf16.xpose.msk.msra.mxu1 %vm6778_vm6, %v5882_v56 }
 0xecb   : > { %v5888_v61 = vpack.c.bf16 %v6155_v40, %v6154_v58  ;;  %v5894_v62 = vpack.c.bf16 %v6160_v46, %v6159_v60 }
 0xecd   : > { %5890 = vmatprep.subr.msk.bf16.mxu1 %vm6778_vm6, %v5888_v61  ;;  %5895 = vmatprep.subr.bf16.mxu0 %v5894_v62 }
 0xece   : > { %5897 = vmatpush3.bf16.msra.mxu0 %v5894_v62 }
 0xed2   : > { %5893 = vmatpush3.bf16.xpose.msk.msra.mxu1 %vm6778_vm6, %v5888_v61 }
 0xed9   : > { %5559 = vmatmul.mubr.msk.f32.vlgmr.msra.gmra.mrb[36].mxu1 %vm814_vm5, %v7163_v15 }
 0xeda   : > { %5561 = vmatprep.mubr.msk.f32.mxu1 %vm814_vm5, %v7175_v45 }
 0xedd   : > { %5562 = vmatmul.mubr.msk.f32.gmra.mrb[38].mxu1 %vm814_vm5, %v7173_v39 }
 0xfac   : > { %v5560_v63 = vpop.f32.mrb[36].mxu1 }
 0xfad   : > { %v2957_v0 = vmul.f32 0.35355338, %v5560_v63  ;;  %v2937_v1 = vpop.f32.mrb[37].mxu1 }
 0xfae   : > { %v2956_v2 = vmul.f32 0.35355338, %v2937_v1 }
 0xfaf   : > { %v2961_v29 = vadd.f32 %v7202_v30, %v2957_v0 }
 0xfb0   : > { %v5563_v6 = vpop.f32.mrb[38].mxu1  ;;  %v2960_v7 = vadd.f32 %v7202_v30, %v2956_v2 }
 0xfb1   : > { %v2959_v8 = vmul.f32 0.35355338, %v5563_v6  ;;  %v2947_v10 = vpop.f32.mrb[39].mxu1  ;;  %v2967_v11 = vsel %vm618_vm4, %v2961_v29, -inf }
 0xfb2   : > { %2968 = vmax.xlane.f32.xlu0 %v2967_v11  ;;  %v2964_v13 = vsel %vm618_vm4, %v2960_v7, -inf  ;;  %v2958_v54 = vmul.f32 0.35355338, %v2947_v10 }
 0xfb3   : > { %2965 = vmax.xlane.f32.xlu1 %v2964_v13  ;;  %v2963_v14 = vadd.f32 %v7202_v30, %v2959_v8 }
 0xfb4   : > { %v2962_v50 = vadd.f32 %v7202_v30, %v2958_v54 }
 0xfb5   : > { %v2973_v49 = vsel %vm618_vm4, %v2963_v14, -inf }
 0xfb6   : > { %2974 = vmax.xlane.f32.xlu0 %v2973_v49  ;;  %v2970_v55 = vsel %vm618_vm4, %v2962_v50, -inf }
 0xfc4   : > { %6167 = vrot.lane.b32.xlu1 %v7171_v37, %s7630_s25 }
 0xfc8   : > { %6172 = vrot.lane.b32.xlu1 %v7181_v48, %s7630_s25 }
 0xfcc   : > { %6162 = vrot.lane.b32.xlu0 %v7181_v48, %s6482_s24  ;;  %s7634_s24 = smov 56  }
 0xfd0   : > { %3117 = vrot.lane.b32.xlu0 %v7165_v35, %s7631_s22 }
 0xfd4   : > { %3121 = vrot.lane.b32.xlu0 %v7175_v45, %s7631_s22 }
 0xfd8   : > { %6177 = vrot.lane.b32.xlu0 %v7171_v37, %s7632_s26 }
 0xfdc   : > { %3589 = vrot.lane.b32.xlu0 %v7165_v35, %s7633_s19 }
 0xfe0   : > { %3593 = vrot.lane.b32.xlu0 %v7175_v45, %s7633_s19 }
 0xfec   : > { %2971 = vmax.xlane.f32.xlu1 %v2970_v55 }
 0xffd   : > { %3119 = vrot.lane.b32.xlu1 %v7163_v15, %s7631_s22 }
0x1001   : > { %3123 = vrot.lane.b32.xlu1 %v7173_v39, %s7631_s22  ;;  %s7638_s22 = smov 40  }
0x1005   : > { %6182 = vrot.lane.b32.xlu1 %v7181_v48, %s7632_s26 }
0x1009   : > { %3591 = vrot.lane.b32.xlu1 %v7163_v15, %s7633_s19 }
0x100d   : > { %3595 = vrot.lane.b32.xlu1 %v7173_v39, %s7633_s19  ;;  %s6488_s19 = smov [#allocation2]  }
0x103f   : > { %v2969_v21 = vpop.xlane.xlu0 %2968 }
0x1040   : > { %v2977_v52 = vsub.f32 %v2961_v29, %v2969_v21  ;;  %v2966_v38 = vpop.xlane.xlu1 %2965 }
0x1041   : > { %v2976_v36 = vsub.f32 %v2960_v7, %v2966_v38 }
0x1042   : > { %v2982_v22 = vmul.f32 1.442695, %v2977_v52 }
0x1043   : > { %v2980_v19 = vmul.f32 1.442695, %v2976_v36  ;;  %v2975_v23 = vpop.xlane.xlu0 %2974 }
0x1044   : > { %v6168_v24 = vpop.permute.xlu1 %6167  ;;  %v2979_v46 = vsub.f32 %v2963_v14, %v2975_v23 }
0x1045   : > { %6322 = vpow2.f32 %v2980_v19  ;;  %v6170_v26 = vunpack.i.h.bf16 %v6168_v24  ;;  %v6169_v27 = vunpack.i.l.bf16 %v6168_v24 }
0x1046   : > { %6324 = vpow2.f32 %v2982_v22  ;;  %v2986_v62 = vmul.f32 1.442695, %v2979_v46 }
0x1047   : > { %v6163_v25 = vpop.permute.xlu0 %6162  ;;  %v5902_v16 = vpack.c.bf16 %v6170_v26, %v6169_v27 }
0x1048   : > { %v6165_v12 = vunpack.i.h.bf16 %v6163_v25  ;;  %v6164_v44 = vunpack.i.l.bf16 %v6163_v25  ;;  %v6173_v33 = vpop.permute.xlu1 %6172 }
0x1049   : > { %v6175_v53 = vunpack.i.h.bf16 %v6173_v33  ;;  %v6174_v20 = vunpack.i.l.bf16 %v6173_v33 }
0x104a   : > { %v5898_v32 = vpack.c.bf16 %v6165_v12, %v6164_v44 }
0x104b   : > { %v3118_v9 = vpop.permute.xlu0 %3117  ;;  %v5908_v56 = vpack.c.bf16 %v6175_v53, %v6174_v20 }
0x104c   : > { %5899 = vmatprep.subr.bf16.mxu0 %v5898_v32 }
0x104d   : > { %5901 = vmatpush3.bf16.msra.mxu0 %v5898_v32 }
0x104e   : > { %5904 = vmatprep.subr.msk.bf16.mxu0 %vm6778_vm6, %v5902_v16 }
0x104f   : > { %v7240_v34 = vpop.eup %6322  ;;  %v3122_v51 = vpop.permute.xlu0 %3121 }
0x1050   : > { %v7242_v42 = vpop.eup %6324  ;;  %5572 = vmatprep.mubr.msk.f32.mxu0 %vm618_vm4, %v7240_v34 }
0x1051   : > { %5573 = vmatmul.mubr.msk.f32.vlgmr.msra.gmra.mrb[20].mxu0 %vm618_vm4, %v7242_v42 }
0x1053   : > { %v6178_v47 = vpop.permute.xlu0 %6177 }
0x1054   : > { %v6180_v57 = vunpack.i.h.bf16 %v6178_v47  ;;  %v6179_v40 = vunpack.i.l.bf16 %v6178_v47 }
0x1056   : > { %5907 = vmatpush3.bf16.xpose.msk.msra.mxu0 %vm6778_vm6, %v5902_v16  ;;  %v5922_v58 = vpack.c.bf16 %v6180_v57, %v6179_v40  ;;  %v2988_v57 = vsel %vm618_vm4, %v7240_v34, 0.0 }
0x1057   : > { %5910 = vmatprep.subr.msk.bf16.mxu0 %vm6778_vm6, %v5908_v56  ;;  %v3590_v11 = vpop.permute.xlu0 %3589 }
0x105b   : > { %v3594_v14 = vpop.permute.xlu0 %3593 }
0x105e   : > { %5913 = vmatpush3.bf16.xpose.msk.msra.mxu0 %vm6778_vm6, %v5908_v56 }
0x105f   : > { %5924 = vmatprep.subr.msk.bf16.mxu0 %vm6778_vm6, %v5922_v58 }
0x1079   : > { %v2972_v60 = vpop.xlane.xlu1 %2971 }
0x107a   : > { %v2978_v61 = vsub.f32 %v2962_v50, %v2972_v60 }
0x107c   : > { %v2984_v63 = vmul.f32 1.442695, %v2978_v61 }
0x107d   : > { %v3120_v0 = vpop.permute.xlu1 %3119 }
0x107e   : > { %6326 = vpow2.f32 %v2984_v63 }
0x107f   : > { %6328 = vpow2.f32 %v2986_v62 }
0x1081   : > { %v3124_v1 = vpop.permute.xlu1 %3123 }
0x1085   : > { %v6183_v2 = vpop.permute.xlu1 %6182 }
0x1086   : > { %v6185_v7 = vunpack.i.h.bf16 %v6183_v2  ;;  %v6184_v8 = vunpack.i.l.bf16 %v6183_v2 }
0x1088   : > { %v7256_v29 = vpop.eup %6326  ;;  %v5928_v10 = vpack.c.bf16 %v6185_v7, %v6184_v8 }
0x1089   : > { %v7258_v6 = vpop.eup %6328  ;;  %5575 = vmatprep.mubr.msk.f32.mxu0 %vm618_vm4, %v7256_v29  ;;  %v3592_v13 = vpop.permute.xlu1 %3591 }
0x108a   : > { %5576 = vmatmul.mubr.msk.f32.gmra.mrb[22].mxu0 %vm618_vm4, %v7258_v6 }
0x108b   : > { %5586 = vmatprep.mubr.msk.f32.mxu0 %vm814_vm5, %v3118_v9 }
0x108d   : > { %v3596_v49 = vpop.permute.xlu1 %3595 }
0x108e   : > { %5587 = vmatmul.mubr.msk.f32.vlgmr.msra.gmra.mrb[24].mxu0 %vm814_vm5, %v3120_v0 }
0x108f   : > { %5927 = vmatpush3.bf16.xpose.msk.msra.mxu0 %vm6778_vm6, %v5922_v58  ;;  %5589 = vmatprep.mubr.msk.f32.mxu0 %vm814_vm5, %v3122_v51 }
0x1090   : > { %5930 = vmatprep.subr.msk.bf16.mxu0 %vm6778_vm6, %v5928_v10 }
0x1092   : > { %5590 = vmatmul.mubr.msk.f32.gmra.mrb[26].mxu0 %vm814_vm5, %v3124_v1 }
0x1093   : > { %5630 = vmatprep.mubr.msk.f32.mxu0 %vm814_vm5, %v3590_v11 }
0x1097   : > { %5933 = vmatpush3.bf16.xpose.msk.msra.mxu0 %vm6778_vm6, %v5928_v10 }
0x109e   : > { %5631 = vmatmul.mubr.msk.f32.vlgmr.msra.gmra.mrb[28].mxu0 %vm814_vm5, %v3592_v13 }
0x109f   : > { %5633 = vmatprep.mubr.msk.f32.mxu0 %vm814_vm5, %v3594_v14 }
0x10a2   : > { %5634 = vmatmul.mubr.msk.f32.gmra.mrb[30].mxu0 %vm814_vm5, %v3596_v49 }
0x1124   : > { %v7278_v54 = vpop.f32.mrb[20].mxu0 }
0x1125   : > { %v7280_v50 = vpop.f32.mrb[21].mxu0 }
0x115d   : > { %v7282_v55 = vpop.f32.mrb[22].mxu0 }
0x115e   : > { %v7284_v21 = vpop.f32.mrb[23].mxu0 }
0x1161   : > { %v5588_v52 = vpop.f32.mrb[24].mxu0 }
0x1162   : > { %v3235_v38 = vmul.f32 0.35355338, %v5588_v52  ;;  %v3215_v36 = vpop.f32.mrb[25].mxu0 }
0x1163   : > { %v3234_v22 = vmul.f32 0.35355338, %v3215_v36 }
0x1164   : > { %v3239_v19 = vadd.f32 %v7202_v30, %v3235_v38 }
0x1165   : > { %v3238_v23 = vadd.f32 %v7202_v30, %v3234_v22  ;;  %v5591_v24 = vpop.f32.mrb[26].mxu0 }
0x1166   : > { %v3237_v25 = vmul.f32 0.35355338, %v5591_v24  ;;  %v3225_v26 = vpop.f32.mrb[27].mxu0  ;;  %v3245_v27 = vsel %vm618_vm4, %v3239_v19, -inf }
0x1167   : > { %v3236_v12 = vmul.f32 0.35355338, %v3225_v26  ;;  %3246 = vmax.xlane.f32.xlu1 %v3245_v27  ;;  %v3242_v44 = vsel %vm618_vm4, %v3238_v23, -inf }
0x1168   : > { %v3241_v32 = vadd.f32 %v7202_v30, %v3237_v25  ;;  %3243 = vmax.xlane.f32.xlu0 %v3242_v44 }
0x1169   : > { %v3240_v16 = vadd.f32 %v7202_v30, %v3236_v12 }
0x116a   : > { %v3251_v9 = vsel %vm618_vm4, %v3241_v32, -inf }
0x116b   : > { %v3248_v33 = vsel %vm618_vm4, %v3240_v16, -inf }
0x116c   : > { %3252 = vmax.xlane.f32.xlu0 %v3251_v9 }
0x1170   : > { %3249 = vmax.xlane.f32.xlu0 %v3248_v33 }
0x1171   : > { %v5632_v51 = vpop.f32.mrb[28].mxu0 }
0x1172   : > { %v3687_v53 = vpop.f32.mrb[29].mxu0  ;;  %v3707_v40 = vmul.f32 0.35355338, %v5632_v51 }
0x1173   : > { %v3706_v47 = vmul.f32 0.35355338, %v3687_v53 }
0x1174   : > { %v7322_v46 = vadd.f32 %v7202_v30, %v3707_v40 }
0x1175   : > { %v7294_v20 = vpop.f32.mrb[30].mxu0  ;;  %v7317_v58 = vadd.f32 %v7202_v30, %v3706_v47 }
0x1176   : > { %v3697_v56 = vpop.f32.mrb[31].mxu0  ;;  %v3717_v60 = vsel %vm618_vm4, %v7322_v46, -inf  ;;  %v3709_v40 = vmul.f32 0.35355338, %v7294_v20 }
0x1178   : > { %6187 = vrot.lane.b32.xlu1 %v7171_v37, %s7634_s24 }
0x117c   : > { %6197 = vrot.lane.b32.xlu1 %v7171_v37, %s7635_s27 }
0x1180   : > { %6202 = vrot.lane.b32.xlu1 %v7181_v48, %s7635_s27  ;;  %s469_s27 = sand.u32 1, %s6465_s30  }
0x1184   : > { %3970 = vrot.lane.b32.xlu1 %v7163_v15, %s7636_s20  ;;  %v2991_v15 = vsel %vm618_vm4, %v7242_v42, 0.0  ;;  %v3714_v42 = vsel %vm618_vm4, %v7317_v58, -inf }
0x1186   : > { %6192 = vrot.lane.b32.xlu0 %v7181_v48, %s7634_s24  ;;  %s6415_s24 = sshll.u32 %s6488_s19, 4  ;;  %s6416_s24 = int_to_ptr.vmem [resolvable:$false] %s6415_s24 }
0x1188   : > { %3974 = vrot.lane.b32.xlu1 %v7173_v39, %s7636_s20  ;;  %v3708_v39 = vmul.f32 0.35355338, %v3697_v56 }
0x118a   : > { %3968 = vrot.lane.b32.xlu0 %v7165_v35, %s7636_s20  ;;  %v2994_v35 = vsel %vm618_vm4, %v7256_v29, 0.0  ;;  %v7327_v34 = vadd.f32 %v7202_v30, %v3708_v39 }
0x118c   : > { %v3720_v61 = vsel %vm618_vm4, %v7327_v34, -inf }
0x118e   : > { %3972 = vrot.lane.b32.xlu0 %v7175_v45, %s7636_s20  ;;  %v2997_v45 = vsel %vm618_vm4, %v7258_v6, 0.0  ;;  %s4854_s20 = sshll.u32 %s469_s27, 5 }
0x118f   : > { %s471_s15 = scalar_lea.vmem [#allocation2], %s4854_s20  ;;  %s6417_s20 = scalar_lea.vmem %s6416_s24, 1024 }
0x1190   : > { %s4779_s21 = sshll.u32 %s471_s15, 4  ;;  %s7540_s21 = int_to_ptr.vmem [resolvable:$true] %s4779_s21 }
0x1191   : > { %s6411_s26 = scalar_lea.vmem %s7540_s21, 512  ;;  %p6418_p0 = scmp.lt.s32.totalorder %s7540_s21, %s6416_s24 }
0x1192   : > { %p6412_p11 = scmp.ne.s32.totalorder %s7540_s21, %s6411_s26  ;;  %p6419_p1 = scmp.lt.s32.totalorder %s6417_s20, %s6411_s26 }
0x1194   : > { %p6413_p12 = pnand %p6412_p11, %p6604_p5  ;;  %p6420_p2 = por %p6419_p1, %p6418_p0 }
0x1196   : > { %p6414_p13 = pneg %p6413_p12 }
0x1198   : > { %p6421_p3 = pnand %p6420_p2, %p6414_p13 }
0x11ac   : > { %2989 = vadd.xlane.f32.xlu1 %v2988_v57 }
0x11ad   : > { %2992 = vadd.xlane.f32.xlu0 %v2991_v15 }
0x11b0   : > { %2995 = vadd.xlane.f32.xlu1 %v2994_v35  ;;  %v3713_v35 = vadd.f32 %v7202_v30, %v3709_v40 }
0x11b1   : > { %2998 = vadd.xlane.f32.xlu0 %v2997_v45 }
0x11b2   : > { %v3723_v59 = vsel %vm618_vm4, %v3713_v35, -inf }
0x11b4   : > { %3715 = vmax.xlane.f32.xlu1 %v3714_v42 }
0x11b5   : > { %3718 = vmax.xlane.f32.xlu0 %v3717_v60  ;;  %v4954_v60 = vld [vmem:[%s7592_s7 + $0x28] sm:$0xff] }
0x11b8   : > { %3721 = vmax.xlane.f32.xlu1 %v3720_v61  ;;  %v4953_v61 = vld [vmem:[%s7592_s7 + $0x20] sm:$0xff] }
0x11f4   : > { %v3247_v62 = vpop.xlane.xlu1 %3246 }
0x11f5   : > { %v3255_v63 = vsub.f32 %v3239_v19, %v3247_v62  ;;  %v3244_v0 = vpop.xlane.xlu0 %3243 }
0x11f6   : > { %v3254_v1 = vsub.f32 %v3238_v23, %v3244_v0 }
0x11f7   : > { %v3260_v2 = vmul.f32 1.442695, %v3255_v63 }
0x11f8   : > { %v3258_v29 = vmul.f32 1.442695, %v3254_v1  ;;  %v6188_v6 = vpop.permute.xlu1 %6187 }
0x11f9   : > { %6330 = vpow2.f32 %v3260_v2  ;;  %v6190_v7 = vunpack.i.h.bf16 %v6188_v6  ;;  %v6189_v8 = vunpack.i.l.bf16 %v6188_v6  ;;  %v3253_v10 = vpop.xlane.xlu0 %3252 }
0x11fa   : > { %6332 = vpow2.f32 %v3258_v29  ;;  %v3257_v11 = vsub.f32 %v3241_v32, %v3253_v10 }
0x11fb   : > { %v5914_v13 = vpack.c.bf16 %v6190_v7, %v6189_v8 }
0x11fc   : > { %v3264_v14 = vmul.f32 1.442695, %v3257_v11  ;;  %v6198_v49 = vpop.permute.xlu1 %6197 }
0x11fd   : > { %v6200_v52 = vunpack.i.h.bf16 %v6198_v49  ;;  %v6199_v38 = vunpack.i.l.bf16 %v6198_v49  ;;  %v3250_v36 = vpop.xlane.xlu0 %3249  ;;  %5915 = vmatprep.subr.bf16.mxu1 %v5914_v13 }
0x11fe   : > { %6334 = vpow2.f32 %v3264_v14  ;;  %v3256_v22 = vsub.f32 %v3240_v16, %v3250_v36  ;;  %5917 = vmatpush3.bf16.msra.mxu1 %v5914_v13 }
0x11ff   : > { %v5942_v19 = vpack.c.bf16 %v6200_v52, %v6199_v38 }
0x1200   : > { %v3262_v23 = vmul.f32 1.442695, %v3256_v22  ;;  %v6203_v24 = vpop.permute.xlu1 %6202 }
0x1201   : > { %v6205_v25 = vunpack.i.h.bf16 %v6203_v24  ;;  %v6204_v26 = vunpack.i.l.bf16 %v6203_v24  ;;  %v6193_v27 = vpop.permute.xlu0 %6192  ;;  %5944 = vmatprep.subr.msk.bf16.mxu0 %vm6778_vm6, %v5942_v19 }
0x1202   : > { %6336 = vpow2.f32 %v3262_v23  ;;  %v6195_v12 = vunpack.i.h.bf16 %v6193_v27  ;;  %v6194_v44 = vunpack.i.l.bf16 %v6193_v27  ;;  %5947 = vmatpush3.bf16.xpose.msk.msra.mxu0 %vm6778_vm6, %v5942_v19 }
0x1203   : > { %v6331_v32 = vpop.eup %6330  ;;  %v5948_v9 = vpack.c.bf16 %v6205_v25, %v6204_v26 }
0x1204   : > { %v6333_v33 = vpop.eup %6332  ;;  %v5918_v16 = vpack.c.bf16 %v6195_v12, %v6194_v44  ;;  %v3269_v51 = vsel %vm618_vm4, %v6331_v32, 0.0  ;;  %v3971_v45 = vpop.permute.xlu1 %3970 }
0x1205   : > { %5600 = vmatprep.mubr.msk.f32.mxu1 %vm618_vm4, %v6333_v33  ;;  %v3969_v53 = vpop.permute.xlu0 %3968  ;;  %5950 = vmatprep.subr.msk.bf16.mxu0 %vm6778_vm6, %v5948_v9  ;;  %v3266_v56 = vsel %vm618_vm4, %v6333_v33, 0.0 }
0x1206   : > { %3270 = vadd.xlane.f32.xlu1 %v3269_v51  ;;  %5919 = vmatprep.subr.bf16.mxu1 %v5918_v16 }
0x1207   : > { %5666 = vmatprep.mubr.msk.f32.mxu0 %vm814_vm5, %v3969_v53  ;;  %3267 = vadd.xlane.f32.xlu0 %v3266_v56 }
0x1208   : > { %v6335_v47 = vpop.eup %6334  ;;  %5921 = vmatpush3.bf16.msra.mxu1 %v5918_v16  ;;  %v3975_v20 = vpop.permute.xlu1 %3974 }
0x1209   : > { %v3275_v57 = vsel %vm618_vm4, %v6335_v47, 0.0  ;;  %v3973_v42 = vpop.permute.xlu0 %3972  ;;  %5606 = vmatprep.subr.mxu1 %v4954_v60 }
0x120a   : > { %5953 = vmatpush3.bf16.xpose.msk.msra.mxu0 %vm6778_vm6, %v5948_v9 }
0x120b   : > { %5601 = vmatmul.mubr.msk.f32.vlgmr.msra.gmra.mrb[40].mxu1 %vm618_vm4, %v6331_v32  ;;  %3276 = vadd.xlane.f32.xlu0 %v3275_v57 }
0x120c   : > { %v6337_v15 = vpop.eup %6336  ;;  %5607 = vmatpush3.msra.mxu1 %v4954_v60 }
0x120d   : > { %5603 = vmatprep.mubr.msk.f32.mxu1 %vm618_vm4, %v6337_v15  ;;  %v3272_v39 = vsel %vm618_vm4, %v6337_v15, 0.0  ;;  %5614 = vmatprep.subr.mxu1 %v4953_v61 }
0x120f   : > { %5604 = vmatmul.mubr.msk.f32.gmra.mrb[42].mxu1 %vm618_vm4, %v6335_v47  ;;  %3273 = vadd.xlane.f32.xlu0 %v3272_v39 }
0x1211   : > { %5667 = vmatmul.mubr.msk.f32.vlgmr.msra.gmra.mrb[32].mxu0 %vm814_vm5, %v3971_v45 }
0x1212   : > { %5669 = vmatprep.mubr.msk.f32.mxu0 %vm814_vm5, %v3973_v42 }
0x1213   : > { %3724 = vmax.xlane.f32.xlu0 %v3723_v59 }
0x1215   : > { %5670 = vmatmul.mubr.msk.f32.gmra.mrb[34].mxu0 %vm814_vm5, %v3975_v20 }
0x1217   : > { %6207 = vrot.lane.b32.xlu1 %v7171_v37, %s7637_s28 }
0x1229   : > { %6212 = vrot.lane.b32.xlu0 %v7181_v48, %s7637_s28  ;;  %s5059_s28 = sshll.u32 %s6587_s17, 9  ;;  %s7544_s17 = scalar_lea.sflag [#allocation3], %s469_s27 }
0x1239   : > { %v2990_v63 = vpop.xlane.xlu1 %2989 }
0x123a   : > { %v2993_v62 = vpop.xlane.xlu0 %2992 }
0x123d   : > { %v2996_v1 = vpop.xlane.xlu1 %2995 }
0x123e   : > { %v2999_v0 = vpop.xlane.xlu0 %2998 }
0x1241   : > { %v3716_v29 = vpop.xlane.xlu1 %3715 }
0x1242   : > { %v3719_v2 = vpop.xlane.xlu0 %3718  ;;  %v3726_v49 = vsub.f32 %v7317_v58, %v3716_v29 }
0x1243   : > { %v3727_v13 = vsub.f32 %v7322_v46, %v3719_v2 }
0x1244   : > { %v3730_v12 = vmul.f32 1.442695, %v3726_v49 }
0x1245   : > { %v3722_v7 = vpop.xlane.xlu1 %3721  ;;  %v3732_v25 = vmul.f32 1.442695, %v3727_v13 }
0x1246   : > { %v3728_v44 = vsub.f32 %v7327_v34, %v3722_v7 }
0x1248   : > { %v3734_v40 = vmul.f32 1.442695, %v3728_v44 }
0x1293   : > { %v3271_v10 = vpop.xlane.xlu1 %3270 }
0x1294   : > { %v3268_v6 = vpop.xlane.xlu0 %3267 }
0x1295   : > { %6338 = vrcp.f32 %v3268_v6 }
0x1296   : > { %6340 = vrcp.f32 %v3271_v10 }
0x1297   : > { %6342 = vrcp.f32 %v2990_v63  ;;  %v6208_v14 = vpop.permute.xlu1 %6207 }
0x1298   : > { %v3277_v8 = vpop.xlane.xlu0 %3276  ;;  %v6210_v22 = vunpack.i.h.bf16 %v6208_v14  ;;  %v6209_v19 = vunpack.i.l.bf16 %v6208_v14 }
0x129a   : > { %v5934_v33 = vpack.c.bf16 %v6210_v22, %v6209_v19 }
0x129c   : > { %v3274_v11 = vpop.xlane.xlu0 %3273 }
0x129d   : > { %6344 = vrcp.f32 %v3274_v11 }
0x129e   : > { %6346 = vrcp.f32 %v3277_v8 }
0x129f   : > { %6348 = vrcp.f32 %v2993_v62  ;;  %v6339_v36 = vpop.eup %6338 }
0x12a0   : > { %6350 = vrcp.f32 %v2996_v1  ;;  %v3725_v52 = vpop.xlane.xlu0 %3724  ;;  %v6341_v24 = vpop.eup %6340 }
0x12a1   : > { %6352 = vrcp.f32 %v2999_v0  ;;  %v3729_v26 = vsub.f32 %v3713_v35, %v3725_v52  ;;  %v6343_v46 = vpop.eup %6342 }
0x12a2   : > { %6354 = vpow2.f32 %v3732_v25  ;;  %v3113_v42 = vmul.f32 %v6343_v46, %v7280_v50 }
0x12a3   : > { %v3736_v53 = vmul.f32 1.442695, %v3729_v26  ;;  %6356 = vpow2.f32 %v3730_v12 }
0x12a4   : > { %v6213_v56 = vpop.permute.xlu0 %6212 }
0x12a5   : > { %v6215_v20 = vunpack.i.h.bf16 %v6213_v56  ;;  %v6214_v60 = vunpack.i.l.bf16 %v6213_v56  ;;  %6358 = vpow2.f32 %v3736_v53 }
0x12a6   : > { %6360 = vpow2.f32 %v3734_v40 }
0x12a7   : > { %v6345_v58 = vpop.eup %6344  ;;  %v5938_v10 = vpack.c.bf16 %v6215_v20, %v6214_v60 }
0x12a8   : > { %v6347_v51 = vpop.eup %6346 }
0x12a9   : > { %v6349_v35 = vpop.eup %6348 }
0x12aa   : > { %v6351_v59 = vpop.eup %6350  ;;  %v3114_v0 = vmul.f32 %v6349_v35, %v7278_v54 }
0x12ab   : > { %v6353_v29 = vpop.eup %6352  ;;  %v3115_v8 = vmul.f32 %v6351_v59, %v7284_v21 }
0x12ac   : > { %v3116_v14 = vmul.f32 %v6353_v29, %v7282_v55  ;;  %v6355_v49 = vpop.eup %6354 }
0x12ad   : > { %v6357_v52 = vpop.eup %6356 }
0x12de   : > { %v5602_v38 = vpop.f32.mrb[40].mxu1 }
0x12df   : > { %v3368_v23 = vpop.f32.mrb[41].mxu1  ;;  %v3392_v32 = vmul.f32 %v6341_v24, %v5602_v38  ;;  %v6359_v38 = vpop.eup %6358 }
0x12e0   : > { %v3391_v27 = vmul.f32 %v6339_v36, %v3368_v23  ;;  %v3738_v36 = vsel %vm618_vm4, %v6357_v52, 0.0  ;;  %v6361_v22 = vpop.eup %6360  ;;  %v3747_v55 = vsel %vm618_vm4, %v6359_v38, 0.0  ;;  %v4955_v23 = vld [vmem:[%s7592_s7 + $0x30] sm:$0xff] }
0x12e1   : > { %v3744_v19 = vsel %vm618_vm4, %v6361_v22, 0.0 }
0x12e2   : > { %v5605_v9 = vpop.f32.mrb[42].mxu1  ;;  %5608 = vmatprep.mubr.msk.f32.mxu1 %vm814_vm5, %v3391_v27 }
0x12e3   : > { %v3378_v16 = vpop.f32.mrb[43].mxu1  ;;  %5609 = vmatmul.mubr.msk.f32.vlgmr.msra.gmra.mrb[44].mxu1 %vm814_vm5, %v3392_v32  ;;  %v3394_v34 = vmul.f32 %v6347_v51, %v5605_v9 }
0x12e4   : > { %v3393_v47 = vmul.f32 %v6345_v58, %v3378_v16  ;;  %5615 = vmatpush3.msra.mxu1 %v4953_v61  ;;  %v5668_v57 = vpop.f32.mrb[32].mxu0 }
0x12e5   : > { %5935 = vmatprep.subr.bf16.mxu1 %v5934_v33  ;;  %v4086_v15 = vmul.f32 0.35355338, %v5668_v57  ;;  %v4066_v39 = vpop.f32.mrb[33].mxu0 }
0x12e6   : > { %5611 = vmatprep.mubr.msk.f32.mxu1 %vm814_vm5, %v3393_v47  ;;  %v4085_v45 = vmul.f32 0.35355338, %v4066_v39 }
0x12e7   : > { %v4090_v62 = vadd.f32 %v7202_v30, %v4086_v15  ;;  %5612 = vmatmul.mubr.msk.f32.gmra.mrb[46].mxu1 %vm814_vm5, %v3394_v34 }
0x12e8   : > { %v4089_v61 = vadd.f32 %v7202_v30, %v4085_v45  ;;  %5616 = vmatprep.mubr.msk.f32.mxu1 %vm814_vm5, %v3113_v42  ;;  %v5671_v63 = vpop.f32.mrb[34].mxu0 }
0x12e9   : > { %v4088_v1 = vmul.f32 0.35355338, %v5671_v63  ;;  %v4076_v2 = vpop.f32.mrb[35].mxu0  ;;  %v4096_v50 = vsel %vm618_vm4, %v4090_v62, -inf }
0x12ea   : > { %v4087_v6 = vmul.f32 0.35355338, %v4076_v2  ;;  %4097 = vmax.xlane.f32.xlu0 %v4096_v50  ;;  %v4093_v7 = vsel %vm618_vm4, %v4089_v61, -inf }
0x12eb   : > { %v4092_v11 = vadd.f32 %v7202_v30, %v4088_v1  ;;  %5617 = vmatmul.mubr.msk.f32.vlgmr.msra.gmra.mrb[44].mxu1 %vm814_vm5, %v3114_v0  ;;  %4094 = vmax.xlane.f32.xlu1 %v4093_v7 }
0x12ec   : > { %v4091_v54 = vadd.f32 %v7202_v30, %v4087_v6  ;;  %5937 = vmatpush3.bf16.msra.mxu1 %v5934_v33  ;;  %5619 = vmatprep.mubr.msk.f32.mxu1 %vm814_vm5, %v3115_v8  ;;  %v3741_v30 = vsel %vm618_vm4, %v6355_v49, 0.0 }
0x12ed   : > { %5939 = vmatprep.subr.bf16.mxu1 %v5938_v10  ;;  %v4102_v13 = vsel %vm618_vm4, %v4092_v11, -inf }
0x12ee   : > { %4103 = vmax.xlane.f32.xlu0 %v4102_v13  ;;  %v4099_v21 = vsel %vm618_vm4, %v4091_v54, -inf }
0x12ef   : > { %5620 = vmatmul.mubr.msk.f32.gmra.mrb[46].mxu1 %vm814_vm5, %v3116_v14  ;;  %4100 = vmax.xlane.f32.xlu1 %v4099_v21  ;;  %v4956_v14 = vld [vmem:[%s7592_s7 + $0x38] sm:$0xff] }
0x12f0   : > { %5941 = vmatpush3.bf16.msra.mxu1 %v5938_v10  ;;  %5644 = vmatprep.mubr.msk.f32.mxu1 %vm618_vm4, %v6357_v52 }
0x12f1   : > { %5650 = vmatprep.subr.mxu1 %v4955_v23 }
0x12f2   : > { %3742 = vadd.xlane.f32.xlu0 %v3741_v30 }
0x12f3   : > { %5645 = vmatmul.mubr.msk.f32.vlgmr.msra.gmra.mrb[48].mxu1 %vm618_vm4, %v6355_v49  ;;  %3739 = vadd.xlane.f32.xlu1 %v3738_v36 }
0x12f4   : > { %5647 = vmatprep.mubr.msk.f32.mxu1 %vm618_vm4, %v6361_v22  ;;  %5651 = vmatpush3.msra.mxu1 %v4955_v23 }
0x12f6   : > { %3748 = vadd.xlane.f32.xlu0 %v3747_v55 }
0x12f7   : > { %5648 = vmatmul.mubr.msk.f32.gmra.mrb[50].mxu1 %vm618_vm4, %v6359_v38  ;;  %3745 = vadd.xlane.f32.xlu1 %v3744_v19 }
0x1308   : > { %6217 = vrot.lane.b32.xlu1 %v7171_v37, %s7638_s22 }
0x130c   : > { %6222 = vrot.lane.b32.xlu0 %v7181_v48, %s7638_s22  ;;  %s7538_s22 = scalar_lea.hbm %s7599_s14, %s5059_s28 }
0x1377   : > { %v4098_v24 = vpop.xlane.xlu0 %4097 }
0x1378   : > { %v4106_v25 = vsub.f32 %v4090_v62, %v4098_v24  ;;  %v4095_v26 = vpop.xlane.xlu1 %4094 }
0x1379   : > { %v4105_v27 = vsub.f32 %v4089_v61, %v4095_v26 }
0x137a   : > { %v4111_v12 = vmul.f32 1.442695, %v4106_v25 }
0x137b   : > { %v4109_v44 = vmul.f32 1.442695, %v4105_v27  ;;  %v4104_v32 = vpop.xlane.xlu0 %4103 }
0x137c   : > { %6362 = vpow2.f32 %v4111_v12  ;;  %v4108_v46 = vsub.f32 %v4092_v11, %v4104_v32  ;;  %v4101_v9 = vpop.xlane.xlu1 %4100  ;;  %v5028_v32 = vld [vmem:[%s7593_s8 + $0x1] ss:$0 sm:$0xff] }
0x137d   : > { %6364 = vpow2.f32 %v4109_v44  ;;  %v4107_v37 = vsub.f32 %v4091_v54, %v4101_v9 }
0x137e   : > { %v4115_v58 = vmul.f32 1.442695, %v4108_v46 }
0x137f   : > { %v4113_v33 = vmul.f32 1.442695, %v4107_v37  ;;  %v3743_v59 = vpop.xlane.xlu0 %3742 }
0x1380   : > { %6366 = vpow2.f32 %v4115_v58  ;;  %v3740_v16 = vpop.xlane.xlu1 %3739 }
0x1381   : > { %6368 = vpow2.f32 %v4113_v33 }
0x1382   : > { %6370 = vrcp.f32 %v3740_v16 }
0x1383   : > { %6372 = vrcp.f32 %v3743_v59  ;;  %v3749_v20 = vpop.xlane.xlu0 %3748 }
0x1384   : > { %v3746_v48 = vpop.xlane.xlu1 %3745 }
0x1385   : > { %6374 = vrcp.f32 %v3746_v48 }
0x1386   : > { %v6363_v51 = vpop.eup %6362  ;;  %6376 = vrcp.f32 %v3749_v20 }
0x1387   : > { %v6365_v53 = vpop.eup %6364  ;;  %v4120_v56 = vsel %vm618_vm4, %v6363_v51, 0.0  ;;  %v6223_v60 = vpop.permute.xlu0 %6222 }
0x1388   : > { %4121 = vadd.xlane.f32.xlu0 %v4120_v56  ;;  %v6218_v47 = vpop.permute.xlu1 %6217  ;;  %v4117_v57 = vsel %vm618_vm4, %v6365_v53, 0.0  ;;  %v6225_v63 = vunpack.i.h.bf16 %v6223_v60  ;;  %v6224_v0 = vunpack.i.l.bf16 %v6223_v60 }
0x1389   : > { %v6220_v40 = vunpack.i.h.bf16 %v6218_v47  ;;  %v6219_v34 = vunpack.i.l.bf16 %v6218_v47  ;;  %4118 = vadd.xlane.f32.xlu1 %v4117_v57 }
0x138a   : > { %v6367_v15 = vpop.eup %6366  ;;  %v5958_v8 = vpack.c.bf16 %v6225_v63, %v6224_v0 }
0x138b   : > { %v6369_v39 = vpop.eup %6368  ;;  %v5954_v35 = vpack.c.bf16 %v6220_v40, %v6219_v34  ;;  %v4126_v45 = vsel %vm618_vm4, %v6367_v15, 0.0 }
0x138c   : > { %4127 = vadd.xlane.f32.xlu0 %v4126_v45  ;;  %v4123_v42 = vsel %vm618_vm4, %v6369_v39, 0.0  ;;  %v6371_v61 = vpop.eup %6370 }
0x138d   : > { %4124 = vadd.xlane.f32.xlu1 %v4123_v42  ;;  %5955 = vmatprep.subr.bf16.mxu1 %v5954_v35  ;;  %v6373_v2 = vpop.eup %6372 }
0x138f   : > { %v6375_v7 = vpop.eup %6374 }
0x1390   : > { %v6377_v11 = vpop.eup %6376 }
0x13c6   : > { %v5646_v62 = vpop.f32.mrb[48].mxu1 }
0x13c7   : > { %v3840_v1 = vpop.f32.mrb[49].mxu1  ;;  %v3864_v29 = vmul.f32 %v6373_v2, %v5646_v62 }
0x13c8   : > { %v3863_v50 = vmul.f32 %v6371_v61, %v3840_v1 }
0x13ca   : > { %v5649_v6 = vpop.f32.mrb[50].mxu1  ;;  %5652 = vmatprep.mubr.msk.f32.mxu1 %vm814_vm5, %v3863_v50 }
0x13cb   : > { %v3850_v10 = vpop.f32.mrb[51].mxu1  ;;  %5653 = vmatmul.mubr.msk.f32.vlgmr.msra.gmra.mrb[44].mxu1 %vm814_vm5, %v3864_v29  ;;  %v3866_v13 = vmul.f32 %v6377_v11, %v5649_v6 }
0x13cc   : > { %v3865_v54 = vmul.f32 %v6375_v7, %v3850_v10  ;;  %5957 = vmatpush3.bf16.msra.mxu1 %v5954_v35  ;;  %v5030_v10 = vld [vmem:[%s7595_s10 + $0x28] sm:$0xff] }
0x13cd   : > { %5959 = vmatprep.subr.bf16.mxu1 %v5958_v8 }
0x13ce   : > { %5655 = vmatprep.mubr.msk.f32.mxu1 %vm814_vm5, %v3865_v54  ;;  %v5031_v54 = vld [vmem:[%s7595_s10 + $0x30] sm:$0xff] }
0x13cf   : > { %5656 = vmatmul.mubr.msk.f32.gmra.mrb[46].mxu1 %vm814_vm5, %v3866_v13  ;;  %v5032_v13 = vld [vmem:[%s7595_s10 + $0x38] sm:$0xff] }
0x13d0   : > { %5961 = vmatpush3.bf16.msra.mxu1 %v5958_v8  ;;  %5680 = vmatprep.mubr.msk.f32.mxu1 %vm618_vm4, %v6365_v53  ;;  %v5029_v8 = vld [vmem:[%s7595_s10 + $0x20] sm:$0xff] }
0x13d1   : > { %5686 = vmatprep.subr.mxu1 %v4956_v14  ;;  %v5962_v11 = vpack.c.bf16 %v5030_v10, %v5029_v8 }
0x13d3   : > { %5681 = vmatmul.mubr.msk.f32.vlgmr.msra.gmra.mrb[52].mxu1 %vm618_vm4, %v6363_v51  ;;  %5963 = vmatprep.subr.bf16.mxu0 %v5962_v11 }
0x13d4   : > { %5683 = vmatprep.mubr.msk.f32.mxu1 %vm618_vm4, %v6369_v39  ;;  %5687 = vmatpush3.msra.mxu1 %v4956_v14  ;;  %v5966_v14 = vpack.c.bf16 %v5032_v13, %v5031_v54 }
0x13d5   : > { %5965 = vmatpush3.bf16.msra.mxu0 %v5962_v11 }
0x13d6   : > { %5967 = vmatprep.subr.bf16.mxu0 %v5966_v14 }
0x13d7   : > { %5684 = vmatmul.mubr.msk.f32.gmra.mrb[54].mxu1 %vm618_vm4, %v6367_v15 }
0x13d9   : > { %5969 = vmatpush3.bf16.msra.mxu0 %v5966_v14 }
0x1415   : > { %v4122_v21 = vpop.xlane.xlu0 %4121 }
0x1416   : > { %v4119_v49 = vpop.xlane.xlu1 %4118 }
0x1417   : > { %6378 = vrcp.f32 %v4119_v49 }
0x1418   : > { %6380 = vrcp.f32 %v4122_v21 }
0x1419   : > { %v4128_v30 = vpop.xlane.xlu0 %4127 }
0x141a   : > { %v4125_v52 = vpop.xlane.xlu1 %4124 }
0x141b   : > { %6382 = vrcp.f32 %v4125_v52 }
0x141c   : > { %6384 = vrcp.f32 %v4128_v30 }
0x1421   : > { %v6379_v36 = vpop.eup %6378 }
0x1422   : > { %v6381_v55 = vpop.eup %6380 }
0x1425   : > { %v6383_v25 = vpop.eup %6382 }
0x1426   : > { %v6385_v27 = vpop.eup %6384 }
0x14a6   : > { %v5682_v38 = vpop.f32.mrb[52].mxu1 }
0x14a7   : > { %v4219_v22 = vpop.f32.mrb[53].mxu1  ;;  %v4243_v23 = vmul.f32 %v6381_v55, %v5682_v38 }
0x14a8   : > { %v4242_v19 = vmul.f32 %v6379_v36, %v4219_v22 }
0x14aa   : > { %v5685_v24 = vpop.f32.mrb[54].mxu1  ;;  %5688 = vmatprep.mubr.msk.f32.mxu1 %vm814_vm5, %v4242_v19 }
0x14ab   : > { %v4229_v26 = vpop.f32.mrb[55].mxu1  ;;  %5689 = vmatmul.mubr.msk.f32.vlgmr.msra.gmra.mrb[44].mxu1 %vm814_vm5, %v4243_v23  ;;  %v4245_v44 = vmul.f32 %v6385_v27, %v5685_v24 }
0x14ac   : > { %v4244_v12 = vmul.f32 %v6383_v25, %v4229_v26  ;;  %v7455_v26 = vld [vmem:[%s7594_s9 + $0x4] sm:$0xf] }
0x14ad   : > { %v4416_v27 = vrot.slane %v7455_v26, %v2381_v3 }
0x14ae   : > { %5691 = vmatprep.mubr.msk.f32.mxu1 %vm814_vm5, %v4244_v12 }
0x14af   : > { %5692 = vmatmul.mubr.msk.f32.gmra.mrb[46].mxu1 %vm814_vm5, %v4245_v44 }
0x157e   : > { %v5690_v46 = vpop.f32.mrb[44].mxu1 }
0x157f   : > { %v4354_v9 = vadd.f32 %v5690_v46, %v5028_v32  ;;  %v4324_v37 = vpop.f32.mrb[45].mxu1 }
0x1580   : > { %v4353_v58 = vadd.f32 %v5028_v32, %v4324_v37 }
0x1581   : > { %v4358_v33 = vadd.f32 %v4354_v9, %v7146_v31  ;;  %v4424_v9 = vrot.slane %v7455_v26, %v2389_v5 }
0x1582   : > { %v4357_v16 = vadd.f32 %v4353_v58, %v7144_v28  ;;  %v5693_v48 = vpop.f32.mrb[46].mxu1 }
0x1583   : > { %v4356_v51 = vadd.f32 %v5693_v48, %v5028_v32  ;;  %v4334_v53 = vpop.f32.mrb[47].mxu1  ;;  %v4364_v56 = vsel %vm618_vm4, %v4358_v33, 0.0 }
0x1584   : > { %v4355_v47 = vadd.f32 %v5028_v32, %v4334_v53  ;;  %4365 = vadd.xlane.f32.xlu0 %v4364_v56  ;;  %v4361_v57 = vsel %vm618_vm4, %v4357_v16, 0.0 }
0x1585   : > { %v4360_v40 = vadd.f32 %v4356_v51, %v7154_v4  ;;  %4362 = vadd.xlane.f32.xlu1 %v4361_v57 }
0x1586   : > { %v4359_v34 = vadd.f32 %v4355_v47, %v7152_v41 }
0x1587   : > { %v4370_v15 = vsel %vm618_vm4, %v4360_v40, 0.0 }
0x1588   : > { %4371 = vadd.xlane.f32.xlu0 %v4370_v15  ;;  %v4367_v31 = vsel %vm618_vm4, %v4359_v34, 0.0 }
0x1589   : > { %4368 = vadd.xlane.f32.xlu1 %v4367_v31  ;;  %v5041_v31 = vld [vmem:[%s7597_s12 + $0x50] sm:$0xff] }
0x1611   : > { %v4366_v28 = vpop.xlane.xlu0 %4365 }
0x1612   : > { %v4374_v39 = vmul.f32 0.03125, %v4366_v28  ;;  %v4363_v35 = vpop.xlane.xlu1 %4362  ;;  %v5042_v28 = vld [vmem:[%s7597_s12 + $0x58] sm:$0xff] }
0x1613   : > { %v4373_v45 = vmul.f32 0.03125, %v4363_v35  ;;  %v5043_v35 = vld [vmem:[%s7597_s12 + $0x60] sm:$0xff] }
0x1614   : > { %v4378_v42 = vsub.f32 %v4358_v33, %v4374_v39  ;;  %v5974_v39 = vpack.c.bf16 %v5042_v28, %v5041_v31 }
0x1615   : > { %v4377_v59 = vsub.f32 %v4357_v16, %v4373_v45  ;;  %v4372_v20 = vpop.xlane.xlu0 %4371  ;;  %v5044_v45 = vld [vmem:[%s7597_s12 + $0x68] sm:$0xff] }
0x1616   : > { %v4376_v60 = vmul.f32 0.03125, %v4372_v20  ;;  %v4369_v62 = vpop.xlane.xlu1 %4368  ;;  %v4382_v61 = vmul.f32 %v4378_v42, %v4378_v42  ;;  %v5046_v20 = vld [vmem:[%s7597_s12 + $0x78] sm:$0xff] }
0x1617   : > { %v4375_v4 = vmul.f32 0.03125, %v4369_v62  ;;  %v4381_v63 = vmul.f32 %v4377_v59, %v4377_v59  ;;  %v5034_v62 = vld [vmem:[%s7596_s11 + $0x1] ss:$0 sm:$0xff] }
0x1618   : > { %v4380_v0 = vsub.f32 %v4360_v40, %v4376_v60  ;;  %v4388_v41 = vsel %vm618_vm4, %v4382_v61, 0.0  ;;  %v5039_v40 = vld [vmem:[%s7597_s12 + $0x40] sm:$0xff] }
0x1619   : > { %v4379_v1 = vsub.f32 %v4359_v34, %v4375_v4  ;;  %4389 = vadd.xlane.f32.xlu0 %v4388_v41  ;;  %v4385_v2 = vsel %vm618_vm4, %v4381_v63, 0.0  ;;  %v5040_v34 = vld [vmem:[%s7597_s12 + $0x48] sm:$0xff] }
0x161a   : > { %4386 = vadd.xlane.f32.xlu1 %v4385_v2  ;;  %v4384_v50 = vmul.f32 %v4380_v0, %v4380_v0  ;;  %v5970_v15 = vpack.c.bf16 %v5040_v34, %v5039_v40  ;;  %v5048_v34 = vld [vmem:[%s7598_s13 + $0x1] ss:$0 sm:$0xff] }
0x161b   : > { %v4383_v29 = vmul.f32 %v4379_v1, %v4379_v1 }
0x161c   : > { %v4394_v6 = vsel %vm618_vm4, %v4384_v50, 0.0  ;;  %5971 = vmatprep.subr.bf16.mxu0 %v5970_v15 }
0x161d   : > { %4395 = vadd.xlane.f32.xlu0 %v4394_v6  ;;  %v4391_v7 = vsel %vm618_vm4, %v4383_v29, 0.0 }
0x161e   : > { %4392 = vadd.xlane.f32.xlu1 %v4391_v7 }
0x16a6   : > { %v4390_v49 = vpop.xlane.xlu0 %4389 }
0x16a7   : > { %v4398_v21 = vmul.f32 0.03125, %v4390_v49  ;;  %v4387_v52 = vpop.xlane.xlu1 %4386 }
0x16a8   : > { %v4397_v30 = vmul.f32 0.03125, %v4387_v52 }
0x16a9   : > { %v4402_v38 = vadd.f32 1e-12, %v4398_v21 }
0x16aa   : > { %v4401_v36 = vadd.f32 1e-12, %v4397_v30  ;;  %v4396_v22 = vpop.xlane.xlu0 %4395 }
0x16ab   : > { %6386 = vrsqrt.f32 %v4402_v38  ;;  %v4400_v55 = vmul.f32 0.03125, %v4396_v22  ;;  %v4393_v19 = vpop.xlane.xlu1 %4392 }
0x16ac   : > { %6388 = vrsqrt.f32 %v4401_v36  ;;  %v4399_v23 = vmul.f32 0.03125, %v4393_v19 }
0x16ad   : > { %v4404_v24 = vadd.f32 1e-12, %v4400_v55 }
0x16ae   : > { %v4403_v25 = vadd.f32 1e-12, %v4399_v23 }
0x16af   : > { %6390 = vrsqrt.f32 %v4404_v24 }
0x16b0   : > { %6392 = vrsqrt.f32 %v4403_v25 }
0x16b5   : > { %v6387_v12 = vpop.eup %6386 }
0x16b6   : > { %v6389_v44 = vpop.eup %6388  ;;  %v4410_v32 = vmul.f32 %v6387_v12, %v4378_v42  ;;  %v5978_v42 = vpack.c.bf16 %v5044_v45, %v5043_v35 }
0x16b7   : > { %v4409_v46 = vmul.f32 %v6389_v44, %v4377_v59  ;;  %v5045_v59 = vld [vmem:[%s7597_s12 + $0x70] sm:$0xff] }
0x16b8   : > { %v4418_v37 = vmul.f32 %v4416_v27, %v4410_v32  ;;  %v5982_v60 = vpack.c.bf16 %v5046_v20, %v5045_v59 }
0x16b9   : > { %v6391_v58 = vpop.eup %6390  ;;  %v4417_v33 = vmul.f32 %v4416_v27, %v4409_v46 }
0x16ba   : > { %v6393_v16 = vpop.eup %6392  ;;  %v4412_v48 = vmul.f32 %v6391_v58, %v4380_v0  ;;  %v7465_v56 = vadd.f32 %v4424_v9, %v4418_v37 }
0x16bb   : > { %v7463_v51 = vadd.f32 %v4424_v9, %v4417_v33  ;;  %v4411_v53 = vmul.f32 %v6393_v16, %v4379_v1 }
0x16bc   : > { %v4420_v47 = vmul.f32 %v4416_v27, %v4412_v48 }
0x16bd   : > { %5702 = vmatprep.mubr.msk.f32.mxu0 %vm618_vm4, %v7463_v51  ;;  %v4419_v3 = vmul.f32 %v4416_v27, %v4411_v53 }
0x16be   : > { %5703 = vmatmul.mubr.msk.f32.vlgmr.msra.gmra.mrb[36].mxu0 %vm618_vm4, %v7465_v56  ;;  %v7473_v5 = vadd.f32 %v4424_v9, %v4420_v47 }
0x16bf   : > { %v7471_v57 = vadd.f32 %v4424_v9, %v4419_v3  ;;  %5973 = vmatpush3.bf16.msra.mxu0 %v5970_v15 }
0x16c0   : > { %5975 = vmatprep.subr.bf16.mxu0 %v5974_v39 }
0x16c1   : > { %5705 = vmatprep.mubr.msk.f32.mxu0 %vm618_vm4, %v7471_v57 }
0x16c2   : > { %5706 = vmatmul.mubr.msk.f32.gmra.mrb[38].mxu0 %vm618_vm4, %v7473_v5 }
0x16c3   : > { %5977 = vmatpush3.bf16.msra.mxu0 %v5974_v39 }
0x16c4   : > { %5979 = vmatprep.subr.bf16.mxu0 %v5978_v42 }
0x16c7   : > { %5981 = vmatpush3.bf16.msra.mxu0 %v5978_v42 }
0x16c8   : > { %5983 = vmatprep.subr.bf16.mxu0 %v5982_v60 }
0x16cb   : > { %5985 = vmatpush3.bf16.msra.mxu0 %v5982_v60 }
0x1791   : > { %v5704_v61 = vpop.f32.mrb[36].mxu0 }
0x1792   : > { %v4526_v4 = vadd.f32 %v5704_v61, %v5034_v62  ;;  %v4520_v63 = vpop.f32.mrb[37].mxu0 }
0x1793   : > { %v4521_v0 = vadd.f32 %v5034_v62, %v4520_v63 }
0x1794   : > { %v4540_v41 = vmul.f32 %v4526_v4, %v4526_v4 }
0x1795   : > { %v4539_v1 = vmul.f32 %v4521_v0, %v4521_v0  ;;  %v5707_v2 = vpop.f32.mrb[38].mxu0 }
0x1796   : > { %v4544_v50 = vmul.f32 %v4540_v41, %v4526_v4  ;;  %v4536_v29 = vadd.f32 %v5707_v2, %v5034_v62  ;;  %v4530_v6 = vpop.f32.mrb[39].mxu0 }
0x1797   : > { %v4543_v7 = vmul.f32 %v4539_v1, %v4521_v0  ;;  %v4531_v8 = vadd.f32 %v5034_v62, %v4530_v6 }
0x1798   : > { %v4548_v10 = vmul.f32 0.044715, %v4544_v50  ;;  %v4542_v11 = vmul.f32 %v4536_v29, %v4536_v29 }
0x1799   : > { %v4547_v54 = vmul.f32 0.044715, %v4543_v7  ;;  %v4541_v13 = vmul.f32 %v4531_v8, %v4531_v8 }
0x179a   : > { %v4552_v14 = vadd.f32 %v4548_v10, %v4526_v4  ;;  %v4546_v49 = vmul.f32 %v4542_v11, %v4536_v29 }
0x179b   : > { %v4551_v21 = vadd.f32 %v4547_v54, %v4521_v0  ;;  %v4545_v52 = vmul.f32 %v4541_v13, %v4531_v8 }
0x179c   : > { %v4556_v30 = vmul.f32 0.7978846, %v4552_v14  ;;  %v4550_v38 = vmul.f32 0.044715, %v4546_v49 }
0x179d   : > { %v4555_v36 = vmul.f32 0.7978846, %v4551_v21  ;;  %v4549_v22 = vmul.f32 0.044715, %v4545_v52 }
0x179e   : > { %6394 = vtanh.f32 %v4556_v30  ;;  %v4554_v55 = vadd.f32 %v4550_v38, %v4536_v29 }
0x179f   : > { %6396 = vtanh.f32 %v4555_v36  ;;  %v4553_v19 = vadd.f32 %v4549_v22, %v4531_v8 }
0x17a0   : > { %v4558_v23 = vmul.f32 0.7978846, %v4554_v55 }
0x17a1   : > { %v4557_v24 = vmul.f32 0.7978846, %v4553_v19 }
0x17a2   : > { %6398 = vtanh.f32 %v4558_v23 }
0x17a3   : > { %6400 = vtanh.f32 %v4557_v24 }
0x17a8   : > { %v6395_v25 = vpop.eup %6394 }
0x17a9   : > { %v6397_v27 = vpop.eup %6396  ;;  %v4564_v12 = vadd.f32 1.0, %v6395_v25 }
0x17aa   : > { %v4563_v44 = vadd.f32 1.0, %v6397_v27 }
0x17ab   : > { %v4568_v32 = vmul.f32 0.5, %v4564_v12 }
0x17ac   : > { %v6399_v46 = vpop.eup %6398  ;;  %v4567_v9 = vmul.f32 0.5, %v4563_v44 }
0x17ad   : > { %v6401_v37 = vpop.eup %6400  ;;  %v4566_v58 = vadd.f32 1.0, %v6399_v46  ;;  %v4572_v48 = vmul.f32 %v4568_v32, %v4526_v4  ;;  %v4748_v46 = vrot.slane %v7455_v26, %v2710_v17 }
0x17ae   : > { %v4571_v33 = vmul.f32 %v4567_v9, %v4521_v0  ;;  %v4565_v16 = vadd.f32 1.0, %v6401_v37 }
0x17af   : > { %v4570_v53 = vmul.f32 0.5, %v4566_v58  ;;  %v4756_v58 = vrot.slane %v7455_v26, %v2718_v18 }
0x17b0   : > { %5724 = vmatprep.mubr.msk.f32.mxu0 %vm2554_vm7, %v4571_v33  ;;  %v4569_v47 = vmul.f32 0.5, %v4565_v16 }
0x17b1   : > { %5725 = vmatmul.mubr.msk.f32.vlgmr.msra.gmra.mrb[40].mxu0 %vm2554_vm7, %v4572_v48  ;;  %v4574_v40 = vmul.f32 %v4570_v53, %v4536_v29 }
0x17b2   : > { %v4573_v3 = vmul.f32 %v4569_v47, %v4531_v8 }
0x17b4   : > { %5727 = vmatprep.mubr.msk.f32.mxu0 %vm2554_vm7, %v4573_v3 }
0x17b5   : > { %5728 = vmatmul.mubr.msk.f32.gmra.mrb[42].mxu0 %vm2554_vm7, %v4574_v40 }
0x1884   : > { %v5726_v15 = vpop.f32.mrb[40].mxu0 }
0x1885   : > { %v4676_v31 = vadd.f32 %v5726_v15, %v5048_v34  ;;  %v4670_v28 = vpop.f32.mrb[41].mxu0 }
0x1886   : > { %v4671_v39 = vadd.f32 %v5048_v34, %v4670_v28 }
0x1887   : > { %v4690_v35 = vadd.f32 %v4676_v31, %v7465_v56 }
0x1888   : > { %v4689_v45 = vadd.f32 %v4671_v39, %v7463_v51  ;;  %v5729_v42 = vpop.f32.mrb[42].mxu0 }
0x1889   : > { %v4686_v59 = vadd.f32 %v5729_v42, %v5048_v34  ;;  %v4680_v20 = vpop.f32.mrb[43].mxu0  ;;  %v4696_v60 = vsel %vm618_vm4, %v4690_v35, 0.0 }
0x188a   : > { %v4681_v62 = vadd.f32 %v5048_v34, %v4680_v20  ;;  %4697 = vadd.xlane.f32.xlu0 %v4696_v60  ;;  %v4693_v61 = vsel %vm618_vm4, %v4689_v45, 0.0 }
0x188b   : > { %v4692_v4 = vadd.f32 %v4686_v59, %v7473_v5  ;;  %4694 = vadd.xlane.f32.xlu1 %v4693_v61 }
0x188c   : > { %v4691_v63 = vadd.f32 %v4681_v62, %v7471_v57 }
0x188d   : > { %v4702_v0 = vsel %vm618_vm4, %v4692_v4, 0.0 }
0x188e   : > { %4703 = vadd.xlane.f32.xlu0 %v4702_v0  ;;  %v4699_v56 = vsel %vm618_vm4, %v4691_v63, 0.0 }
0x188f   : > { %4700 = vadd.xlane.f32.xlu1 %v4699_v56 }
0x1917   : > { %v4698_v51 = vpop.xlane.xlu0 %4697 }
0x1918   : > { %v4706_v41 = vmul.f32 0.03125, %v4698_v51  ;;  %v4695_v1 = vpop.xlane.xlu1 %4694 }
0x1919   : > { %v4705_v2 = vmul.f32 0.03125, %v4695_v1 }
0x191a   : > { %v4710_v50 = vsub.f32 %v4690_v35, %v4706_v41 }
0x191b   : > { %v4709_v29 = vsub.f32 %v4689_v45, %v4705_v2  ;;  %v4704_v6 = vpop.xlane.xlu0 %4703 }
0x191c   : > { %v4708_v7 = vmul.f32 0.03125, %v4704_v6  ;;  %v4701_v8 = vpop.xlane.xlu1 %4700  ;;  %v4714_v10 = vmul.f32 %v4710_v50, %v4710_v50 }
0x191d   : > { %v4707_v5 = vmul.f32 0.03125, %v4701_v8  ;;  %v4713_v11 = vmul.f32 %v4709_v29, %v4709_v29 }
0x191e   : > { %v4712_v54 = vsub.f32 %v4692_v4, %v4708_v7  ;;  %v4720_v57 = vsel %vm618_vm4, %v4714_v10, 0.0 }
0x191f   : > { %v4711_v13 = vsub.f32 %v4691_v63, %v4707_v5  ;;  %4721 = vadd.xlane.f32.xlu0 %v4720_v57  ;;  %v4717_v14 = vsel %vm618_vm4, %v4713_v11, 0.0 }
0x1920   : > { %4718 = vadd.xlane.f32.xlu1 %v4717_v14  ;;  %v4716_v49 = vmul.f32 %v4712_v54, %v4712_v54 }
0x1921   : > { %v4715_v21 = vmul.f32 %v4711_v13, %v4711_v13 }
0x1922   : > { %v4726_v52 = vsel %vm618_vm4, %v4716_v49, 0.0 }
0x1923   : > { %4727 = vadd.xlane.f32.xlu0 %v4726_v52  ;;  %v4723_v30 = vsel %vm618_vm4, %v4715_v21, 0.0 }
0x1924   : > { %4724 = vadd.xlane.f32.xlu1 %v4723_v30 }
0x19ac   : > { %v4722_v38 = vpop.xlane.xlu0 %4721 }
0x19ad   : > { %v4730_v36 = vmul.f32 0.03125, %v4722_v38  ;;  %v4719_v22 = vpop.xlane.xlu1 %4718 }
0x19ae   : > { %v4729_v55 = vmul.f32 0.03125, %v4719_v22 }
0x19af   : > { %v4734_v19 = vadd.f32 1e-12, %v4730_v36 }
0x19b0   : > { %v4733_v23 = vadd.f32 1e-12, %v4729_v55  ;;  %v4728_v24 = vpop.xlane.xlu0 %4727 }
0x19b1   : > { %6402 = vrsqrt.f32 %v4734_v19  ;;  %v4732_v25 = vmul.f32 0.03125, %v4728_v24  ;;  %v4725_v27 = vpop.xlane.xlu1 %4724 }
0x19b2   : > { %6404 = vrsqrt.f32 %v4733_v23  ;;  %v4731_v12 = vmul.f32 0.03125, %v4725_v27 }
0x19b3   : > { %v4736_v44 = vadd.f32 1e-12, %v4732_v25 }
0x19b4   : > { %v4735_v32 = vadd.f32 1e-12, %v4731_v12 }
0x19b5   : > { %6406 = vrsqrt.f32 %v4736_v44 }
0x19b6   : > { %6408 = vrsqrt.f32 %v4735_v32 }
0x19bb   : > { %v6403_v9 = vpop.eup %6402 }
0x19bc   : > { %v6405_v37 = vpop.eup %6404  ;;  %v4742_v33 = vmul.f32 %v6403_v9, %v4710_v50 }
0x19bd   : > { %v4741_v16 = vmul.f32 %v6405_v37, %v4709_v29 }
0x19be   : > { %v4750_v48 = vmul.f32 %v4748_v46, %v4742_v33 }
0x19bf   : > { %v6407_v53 = vpop.eup %6406  ;;  %v4749_v47 = vmul.f32 %v4748_v46, %v4741_v16 }
0x19c0   : > { %v6409_v3 = vpop.eup %6408  ;;  %v4758_v40 = vadd.f32 %v4756_v58, %v4750_v48  ;;  %v4744_v34 = vmul.f32 %v6407_v53, %v4712_v54 }
0x19c1   : > { %v4757_v15 = vadd.f32 %v4756_v58, %v4749_v47  ;;  %v4743_v31 = vmul.f32 %v6409_v3, %v4711_v13 }
0x19c2   : > { %v4752_v17 = vmul.f32 %v4748_v46, %v4744_v34  ;;  %4762 = vst.msk [vmem:[%s471_s15 + $0x8] sm:$0xff] %vm618_vm4, %v4758_v40 }
0x19c3   : > { %v4751_v43 = vmul.f32 %v4748_v46, %v4743_v31  ;;  %4761 = vst.msk [vmem:[%s471_s15] sm:$0xff] %vm618_vm4, %v4757_v15 }
0x19c4   : > { %v4760_v18 = vadd.f32 %v4756_v58, %v4752_v17 }
0x19c5   : > { %v4759_v26 = vadd.f32 %v4756_v58, %v4751_v43 }
0x19c6   : > { %4764 = vst.msk [vmem:[%s471_s15 + $0x18] sm:$0xff] %vm618_vm4, %v4760_v18 }
0x19c7   : > { %4763 = vst.msk [vmem:[%s471_s15 + $0x10] sm:$0xff] %vm618_vm4, %v4759_v26 }
0x19c8   : > { %6424 = shalt.err (!%p6421_p3)
}
0x19c9   : > { %s6425_s27 = scalar_lea.hbm %s7538_s22, 512  ;;  %s6429_s18 = scalar_lea.hbm %s7599_s14, 1024 }
0x19ca   : > { %p6426_p4 = scmp.ne.s32.totalorder %s7538_s22, %s6425_s27  ;;  %p6430_p9 = scmp.lt.u32.totalorder %s7538_s22, %s7599_s14 }
0x19cb   : > { %p6431_p10 = scmp.lt.u32.totalorder %s6429_s18, %s6425_s27  ;;  %p6433_p12 = scmp.lt.u32.totalorder %s6425_s27, %s7538_s22 }
0x19cc   : > { %p6427_p7 = pnand %p6426_p4, %p6604_p5 }
0x19cd   : > { %p6432_p11 = por %p6431_p10, %p6430_p9 }
0x19ce   : > { %p6428_p8 = pneg %p6427_p7 }
0x19cf   : > { %p6434_p13 = por %p6433_p12, %p6432_p11 }
0x19d1   : > { %p6435_p0 = pnand %p6434_p13, %p6428_p8 }
0x19d3   : > { %6438 = shalt.err (!%p6435_p0)
}
0x19d4   : > { %s6489_s26 = smov 128   ;;  %s6490_s24 = smov 8  }
0x19d5   : > { %6010 = dma.vmem_to_hbm [thread:$0]  (%p6604_p5), %s7540_s21, 512, %s7538_s22, %s7544_s17, %s6489_s26, %s6489_s26, %s6490_s24  }
0x19d6 PF: > { %p6016_p1 = scmp.ge.s32.totalorder %s6473_s16, 2  ;;  %s4794_s28 = sand.u32 1, %s6461_s29  }
0x19d7   : > { %s4795_s27 = scalar_lea.sflag [#allocation3], %s4794_s28 }
0x19d8   : > { %p6013_p2 = pnand %p6016_p1, %p6608_p6 }
0x19da   : > { %6456 = dma.done.wait (!%p6013_p2), %s4795_s27, 512  }
0x19db   : > { %6458 = vsyncadd (!%p6013_p2), %s4795_s27, 4294966784  ;;  %s7640_s16 = sld [smem:[#allocation6_spill]]  ;;  %s7641_s15 = sld [smem:[#allocation5_spill]] }
0x19dc   : > { %s7642_s18 = sld [smem:[#allocation7_spill]]  ;;  %s7643_s29 = smov %s6465_s30 }
0x19e1   : > { %p24_p3 = scmp.ge.s32.totalorder %s7640_s16, 4   ;;  %s7644_s30 = smov %s7641_s15 }
0x19e2   : > { %s7645_s15 = smov %s7642_s18 }
0x19e3   :  { %26 = sbr.rel (!%p24_p3) target bundleno = 3 (0x3), region = 123 }
0x19ea   :  { %4800 = vsyncpa [#allocation3], 1 }
0x19eb   :  { %4802 = vsyncpa [#allocation3 + $0x1], 1 }

</bundles_post_ra>
